<compile_context>
chip_gen: v7x
topology: tpu7x:2x2x1
jax: 0.10.0
libtpu: 0.0.40
codegen_flags: <defaults>
</compile_context>

<pallas_src>
import math
from functools import partial

import jax
import jax.numpy as jnp
from jax.experimental import pallas as pl
from jax.experimental.pallas import tpu as pltpu

hidden_layers = [1024, 512, 256, 128, 120]
output_size = 102

LANE = 128


def _round_up(n, m=LANE):
    return ((n + m - 1) // m) * m


# ---------------------------------------------------------------------------
# Fused Pallas kernel: whole network in one body
# ---------------------------------------------------------------------------
def _fused_mlp_kernel(*refs, valid_out):
    """refs = (x_ref, w0, b0, w1, b1, ..., wL, bL, o_ref).

    Hidden layers: h = relu(h @ W + b)   (dropout is identity in eval mode)
    Final layer  : o = log_softmax(h @ W + b) with padded logit lanes masked.
    """
    x_ref = refs[0]
    o_ref = refs[-1]
    wb = refs[1:-1]
    n_layers = len(wb) // 2

    h = x_ref[...]                                         # (B, F) f32
    for i in range(n_layers):
        w = wb[2 * i][...]                                 # (in, out) bf16
        b = wb[2 * i + 1][...]                             # (1, out)  f32
        # bf16 x bf16 MXU matmul, f32 accumulation.
        z = jnp.dot(h.astype(jnp.bfloat16), w,
                    preferred_element_type=jnp.float32) + b
        if i < n_layers - 1:
            # TODO(synk): nn.Dropout(p=0.2) is stochastic in train mode;
            # eval-mode semantics (identity) are implemented here.
            h = jnp.maximum(z, 0.0)                        # ReLU (f32, VPU)
        else:
            # Mask padded logit lanes before the reduction so the softmax
            # normalizer only covers the real `valid_out` classes.
            lane = jax.lax.broadcasted_iota(jnp.int32, z.shape, 1)
            z = jnp.where(lane < valid_out, z, -jnp.inf)
            m = jnp.max(z, axis=-1, keepdims=True)
            s = z - m
            lse = jnp.log(jnp.sum(jnp.exp(s), axis=-1, keepdims=True))
            o_ref[...] = (s - lse).astype(o_ref.dtype)


# ---------------------------------------------------------------------------
# Parameter init (PyTorch nn.Linear default: U(-1/sqrt(fan_in), 1/sqrt(fan_in)))
# Weights/biases are zero-padded to 128-multiples; weights cast to bf16.
# ---------------------------------------------------------------------------
def init_params(key, input_size, output_size, hidden):
    true_sizes = [input_size] + list(hidden) + [output_size]
    pad_sizes = [_round_up(s) for s in true_sizes]
    params = []
    for i in range(len(true_sizes) - 1):
        fan_in, fan_out = true_sizes[i], true_sizes[i + 1]
        p_in, p_out = pad_sizes[i], pad_sizes[i + 1]
        key, kw, kb = jax.random.split(key, 3)
        bound = 1.0 / math.sqrt(fan_in)
        w = jax.random.uniform(kw, (fan_in, fan_out), jnp.float32, -bound, bound)
        b = jax.random.uniform(kb, (1, fan_out), jnp.float32, -bound, bound)
        # Zero-pad: padded output lanes produce 0 (then ReLU(0)=0), and padded
        # input rows multiply zero activations -> math identical to unpadded.
        w_pad = jnp.zeros((p_in, p_out), jnp.float32).at[:fan_in, :fan_out].set(w)
        b_pad = jnp.zeros((1, p_out), jnp.float32).at[:, :fan_out].set(b)
        params.append((w_pad.astype(jnp.bfloat16), b_pad))   # bf16 W, f32 b
    return params


# ---------------------------------------------------------------------------
# Forward pass (mirrors Build_net.forward in eval mode) — one pallas_call
# ---------------------------------------------------------------------------
def build_net_forward(params, x):
    B = x.shape[0]
    h = x.reshape(B, -1).astype(jnp.float32)          # x.view(x.shape[0], -1)
    p_in = params[0][0].shape[0]
    if h.shape[1] < p_in:                              # pad feature dim if needed
        h = jnp.pad(h, ((0, 0), (0, p_in - h.shape[1])))

    flat = []
    for w, b in params:
        flat.extend((w, b))
    p_out = params[-1][0].shape[1]                     # padded logit width (128)

    vmem = pl.BlockSpec(memory_space=pltpu.MemorySpace.VMEM)
    out_pad = pl.pallas_call(
        partial(_fused_mlp_kernel, valid_out=output_size),
        out_shape=jax.ShapeDtypeStruct((B, p_out), jnp.float32),
        in_specs=[vmem] * (1 + len(flat)),
        out_specs=vmem,
    )(h, *flat)
    return out_pad[:, :output_size]                    # slice back to 102 classes


if __name__ == "__main__":
    key = jax.random.PRNGKey(0)
    k_param, k_x = jax.random.split(key)

    # small image-like input: batch=8, 2 channels, 16x16 spatial -> 512 features
    batch, C, H, W = 8, 2, 16, 16
    input_size = C * H * W
    x = jax.random.normal(k_x, (batch, C, H, W), jnp.float32)

    params = init_params(k_param, input_size, output_size, hidden_layers)

    out = build_net_forward(params, x)
    out = jax.block_until_ready(out)

    assert out.shape == (batch, output_size), out.shape
    # log_softmax rows must (exp-)sum to ~1 over the 102 real classes
    row_sums = jnp.sum(jnp.exp(out), axis=1)
    assert bool(jnp.all(jnp.abs(row_sums - 1.0) < 1e-3)), row_sums
    assert bool(jnp.all(jnp.isfinite(out))), "non-finite log-probs"

    print("KERNEL_OK")
</pallas_src>

<mosaic_0001>
module attributes {stable_mosaic.version = 11 : i64} {
  func.func @_fused_mlp_kernel(%arg0: memref<8x512xf32, #tpu.memory_space<vmem>>, %arg1: memref<512x1024xbf16, #tpu.memory_space<vmem>>, %arg2: memref<1x1024xf32, #tpu.memory_space<vmem>>, %arg3: memref<1024x512xbf16, #tpu.memory_space<vmem>>, %arg4: memref<1x512xf32, #tpu.memory_space<vmem>>, %arg5: memref<512x256xbf16, #tpu.memory_space<vmem>>, %arg6: memref<1x256xf32, #tpu.memory_space<vmem>>, %arg7: memref<256x128xbf16, #tpu.memory_space<vmem>>, %arg8: memref<1x128xf32, #tpu.memory_space<vmem>>, %arg9: memref<128x128xbf16, #tpu.memory_space<vmem>>, %arg10: memref<1x128xf32, #tpu.memory_space<vmem>>, %arg11: memref<128x128xbf16, #tpu.memory_space<vmem>>, %arg12: memref<1x128xf32, #tpu.memory_space<vmem>>, %arg13: memref<8x128xf32, #tpu.memory_space<vmem>>) attributes {dimension_semantics = [], scalar_prefetch = 0 : i64, scratch_operands = 0 : i64, tpu.core_type = #tpu.core_type<tc>} {
    %c0 = arith.constant 0 : index
    %c0_0 = arith.constant 0 : index
    %0 = vector.load %arg0[%c0, %c0_0] : memref<8x512xf32, #tpu.memory_space<vmem>>, vector<8x512xf32>
    %c0_1 = arith.constant 0 : index
    %c0_2 = arith.constant 0 : index
    %1 = vector.load %arg1[%c0_1, %c0_2] : memref<512x1024xbf16, #tpu.memory_space<vmem>>, vector<512x1024xbf16>
    %c0_3 = arith.constant 0 : index
    %c0_4 = arith.constant 0 : index
    %2 = vector.load %arg2[%c0_3, %c0_4] : memref<1x1024xf32, #tpu.memory_space<vmem>>, vector<1x1024xf32>
    %3 = arith.truncf %0 : vector<8x512xf32> to vector<8x512xbf16>
    %cst = arith.constant dense<0.000000e+00> : vector<8x1024xf32>
    %4 = tpu.matmul %3, %1, %cst {dimension_numbers = #tpu.dot_dimension_numbers<[1], [0], [0], [1], [0, 0, 1, 1], [], []>} : vector<8x512xbf16>, vector<512x1024xbf16>, vector<8x1024xf32> -> vector<8x1024xf32>
    %5 = vector.broadcast %2 : vector<1x1024xf32> to vector<8x1024xf32>
    %6 = arith.addf %4, %5 : vector<8x1024xf32>
    %cst_5 = arith.constant 0.000000e+00 : f32
    %7 = vector.broadcast %cst_5 : f32 to vector<8x1024xf32>
    %8 = arith.maximumf %6, %7 : vector<8x1024xf32>
    %c0_6 = arith.constant 0 : index
    %c0_7 = arith.constant 0 : index
    %9 = vector.load %arg3[%c0_6, %c0_7] : memref<1024x512xbf16, #tpu.memory_space<vmem>>, vector<1024x512xbf16>
    %c0_8 = arith.constant 0 : index
    %c0_9 = arith.constant 0 : index
    %10 = vector.load %arg4[%c0_8, %c0_9] : memref<1x512xf32, #tpu.memory_space<vmem>>, vector<1x512xf32>
    %11 = arith.truncf %8 : vector<8x1024xf32> to vector<8x1024xbf16>
    %cst_10 = arith.constant dense<0.000000e+00> : vector<8x512xf32>
    %12 = tpu.matmul %11, %9, %cst_10 {dimension_numbers = #tpu.dot_dimension_numbers<[1], [0], [0], [1], [0, 0, 1, 1], [], []>} : vector<8x1024xbf16>, vector<1024x512xbf16>, vector<8x512xf32> -> vector<8x512xf32>
    %13 = vector.broadcast %10 : vector<1x512xf32> to vector<8x512xf32>
    %14 = arith.addf %12, %13 : vector<8x512xf32>
    %cst_11 = arith.constant 0.000000e+00 : f32
    %15 = vector.broadcast %cst_11 : f32 to vector<8x512xf32>
    %16 = arith.maximumf %14, %15 : vector<8x512xf32>
    %c0_12 = arith.constant 0 : index
    %c0_13 = arith.constant 0 : index
    %17 = vector.load %arg5[%c0_12, %c0_13] : memref<512x256xbf16, #tpu.memory_space<vmem>>, vector<512x256xbf16>
    %c0_14 = arith.constant 0 : index
    %c0_15 = arith.constant 0 : index
    %18 = vector.load %arg6[%c0_14, %c0_15] : memref<1x256xf32, #tpu.memory_space<vmem>>, vector<1x256xf32>
    %19 = arith.truncf %16 : vector<8x512xf32> to vector<8x512xbf16>
    %cst_16 = arith.constant dense<0.000000e+00> : vector<8x256xf32>
    %20 = tpu.matmul %19, %17, %cst_16 {dimension_numbers = #tpu.dot_dimension_numbers<[1], [0], [0], [1], [0, 0, 1, 1], [], []>} : vector<8x512xbf16>, vector<512x256xbf16>, vector<8x256xf32> -> vector<8x256xf32>
    %21 = vector.broadcast %18 : vector<1x256xf32> to vector<8x256xf32>
    %22 = arith.addf %20, %21 : vector<8x256xf32>
    %cst_17 = arith.constant 0.000000e+00 : f32
    %23 = vector.broadcast %cst_17 : f32 to vector<8x256xf32>
    %24 = arith.maximumf %22, %23 : vector<8x256xf32>
    %c0_18 = arith.constant 0 : index
    %c0_19 = arith.constant 0 : index
    %25 = vector.load %arg7[%c0_18, %c0_19] : memref<256x128xbf16, #tpu.memory_space<vmem>>, vector<256x128xbf16>
    %c0_20 = arith.constant 0 : index
    %c0_21 = arith.constant 0 : index
    %26 = vector.load %arg8[%c0_20, %c0_21] : memref<1x128xf32, #tpu.memory_space<vmem>>, vector<1x128xf32>
    %27 = arith.truncf %24 : vector<8x256xf32> to vector<8x256xbf16>
    %cst_22 = arith.constant dense<0.000000e+00> : vector<8x128xf32>
    %28 = tpu.matmul %27, %25, %cst_22 {dimension_numbers = #tpu.dot_dimension_numbers<[1], [0], [0], [1], [0, 0, 1, 1], [], []>} : vector<8x256xbf16>, vector<256x128xbf16>, vector<8x128xf32> -> vector<8x128xf32>
    %29 = vector.broadcast %26 : vector<1x128xf32> to vector<8x128xf32>
    %30 = arith.addf %28, %29 : vector<8x128xf32>
    %cst_23 = arith.constant 0.000000e+00 : f32
    %31 = vector.broadcast %cst_23 : f32 to vector<8x128xf32>
    %32 = arith.maximumf %30, %31 : vector<8x128xf32>
    %c0_24 = arith.constant 0 : index
    %c0_25 = arith.constant 0 : index
    %33 = vector.load %arg9[%c0_24, %c0_25] : memref<128x128xbf16, #tpu.memory_space<vmem>>, vector<128x128xbf16>
    %c0_26 = arith.constant 0 : index
    %c0_27 = arith.constant 0 : index
    %34 = vector.load %arg10[%c0_26, %c0_27] : memref<1x128xf32, #tpu.memory_space<vmem>>, vector<1x128xf32>
    %35 = arith.truncf %32 : vector<8x128xf32> to vector<8x128xbf16>
    %cst_28 = arith.constant dense<0.000000e+00> : vector<8x128xf32>
    %36 = tpu.matmul %35, %33, %cst_28 {dimension_numbers = #tpu.dot_dimension_numbers<[1], [0], [0], [1], [0, 0, 1, 1], [], []>} : vector<8x128xbf16>, vector<128x128xbf16>, vector<8x128xf32> -> vector<8x128xf32>
    %37 = vector.broadcast %34 : vector<1x128xf32> to vector<8x128xf32>
    %38 = arith.addf %36, %37 : vector<8x128xf32>
    %cst_29 = arith.constant 0.000000e+00 : f32
    %39 = vector.broadcast %cst_29 : f32 to vector<8x128xf32>
    %40 = arith.maximumf %38, %39 : vector<8x128xf32>
    %c0_30 = arith.constant 0 : index
    %c0_31 = arith.constant 0 : index
    %41 = vector.load %arg11[%c0_30, %c0_31] : memref<128x128xbf16, #tpu.memory_space<vmem>>, vector<128x128xbf16>
    %c0_32 = arith.constant 0 : index
    %c0_33 = arith.constant 0 : index
    %42 = vector.load %arg12[%c0_32, %c0_33] : memref<1x128xf32, #tpu.memory_space<vmem>>, vector<1x128xf32>
    %43 = arith.truncf %40 : vector<8x128xf32> to vector<8x128xbf16>
    %cst_34 = arith.constant dense<0.000000e+00> : vector<8x128xf32>
    %44 = tpu.matmul %43, %41, %cst_34 {dimension_numbers = #tpu.dot_dimension_numbers<[1], [0], [0], [1], [0, 0, 1, 1], [], []>} : vector<8x128xbf16>, vector<128x128xbf16>, vector<8x128xf32> -> vector<8x128xf32>
    %45 = vector.broadcast %42 : vector<1x128xf32> to vector<8x128xf32>
    %46 = arith.addf %44, %45 : vector<8x128xf32>
    %47 = tpu.iota {dimensions = array<i32: 1>} : vector<8x128xi32>
    %c102_i32 = arith.constant 102 : i32
    %48 = vector.broadcast %c102_i32 : i32 to vector<8x128xi32>
    %49 = arith.cmpi slt, %47, %48 : vector<8x128xi32>
    %cst_35 = arith.constant 0xFF800000 : f32
    %50 = vector.broadcast %cst_35 : f32 to vector<8x128xf32>
    %51 = arith.select %49, %46, %50 : vector<8x128xi1>, vector<8x128xf32>
    %cst_36 = arith.constant dense<0xFF800000> : vector<8xf32>
    %52 = vector.multi_reduction <maximumf>, %51, %cst_36 [1] : vector<8x128xf32> to vector<8xf32>
    %53 = vector.shape_cast %52 : vector<8xf32> to vector<8x1xf32>
    %54 = vector.broadcast %53 : vector<8x1xf32> to vector<8x128xf32>
    %55 = arith.subf %51, %54 : vector<8x128xf32>
    %56 = math.exp %55 : vector<8x128xf32>
    %cst_37 = arith.constant dense<0.000000e+00> : vector<8xf32>
    %57 = vector.multi_reduction <add>, %56, %cst_37 [1] : vector<8x128xf32> to vector<8xf32>
    %58 = vector.shape_cast %57 : vector<8xf32> to vector<8x1xf32>
    %59 = math.log %58 : vector<8x1xf32>
    %60 = vector.broadcast %59 : vector<8x1xf32> to vector<8x128xf32>
    %61 = arith.subf %55, %60 : vector<8x128xf32>
    %c0_38 = arith.constant 0 : index
    %c0_39 = arith.constant 0 : index
    %62 = vector.load %arg13[%c0_38, %c0_39] : memref<8x128xf32, #tpu.memory_space<vmem>>, vector<8x128xf32>
    tpu.vector_store %arg13[%c0_38, %c0_39], %61 {strides = array<i32>} : memref<8x128xf32, #tpu.memory_space<vmem>>, vector<8x128xf32>,
    return
  }
}

</mosaic_0001>

<bundles_post_ra>
// kernel: tpu_custom_call.1
= control target key start
LH: loop header
LB: loop body
LE: loop exit
PB: predicated region body
PF: predicated region fallthrough
CT: control target
= control target key end

     0   :  { %18 = vsyncpa [#allocation3], 0  ;;  %s6711_s0 = inlined_call_operand.hbm [shape: f32[8,512], index: 0, kind: input, shape index: {}]   ;;  %s6712_s1 = inlined_call_operand.hbm [shape: bf16[512,1024], index: 1, kind: input, shape index: {}]   ;;  %s6713_s2 = inlined_call_operand.hbm [shape: f32[1,1024], index: 2, kind: input, shape index: {}]   ;;  %s6714_s3 = inlined_call_operand.hbm [shape: bf16[1024,512], index: 3, kind: input, shape index: {}]   ;;  %s6715_s4 = inlined_call_operand.vmem [shape: f32[1,512], index: 4, kind: input, shape index: {}]   ;;  %s6716_s5 = inlined_call_operand.hbm [shape: bf16[512,256], index: 5, kind: input, shape index: {}]   ;;  %s6717_s6 = inlined_call_operand.vmem [shape: f32[1,256], index: 6, kind: input, shape index: {}]   ;;  %s6718_s7 = inlined_call_operand.hbm [shape: bf16[256,128], index: 7, kind: input, shape index: {}]   ;;  %s6719_s8 = inlined_call_operand.vmem [shape: f32[1,128], index: 8, kind: input, shape index: {}]   ;;  %s6720_s9 = inlined_call_operand.hbm [shape: bf16[128,128], index: 9, kind: input, shape index: {}]   ;;  %s6721_s10 = inlined_call_operand.vmem [shape: f32[1,128], index: 10, kind: input, shape index: {}]   ;;  %s6722_s11 = inlined_call_operand.hbm [shape: bf16[128,128], index: 11, kind: input, shape index: {}]   ;;  %s6723_s12 = inlined_call_operand.vmem [shape: f32[1,128], index: 12, kind: input, shape index: {}]   ;;  %s6724_s13 = inlined_call_operand.hbm [shape: f32[8,128], index: 13, kind: output, shape index: {}]  }
   0x1   :  { %19 = vsyncpa [#allocation6], 0 }
   0x2   :  { %20 = vsyncpa [#allocation9], 0 }
   0x3   :  { %21 = vsyncpa [#allocation12], 0 }
   0x4   :  { %22 = vsyncpa [#allocation15], 0 }
   0x5   :  { %23 = vsyncpa [#allocation4], 0  ;;  %s6386_s25 = smov [#allocation5]   ;;  %s6176_s29 = scalar_lea.hbm %s6712_s1, 32768 }
   0x6   :  { %s39_s26 = sshll.u32 %s6386_s25, 4  ;;  %p6177_p0 = scmp.ne.s32.totalorder %s6712_s1, %s6176_s29  ;;  %s40_s26 = int_to_ptr.vmem [resolvable:$true] %s39_s26 }
   0x7   :  { %p6180_p1 = scmp.lt.u32.totalorder %s6176_s29, %s6712_s1 }
   0x9   :  { %p6182_p2 = pnand %p6180_p1, %p6177_p0 }
   0xb   :  { %6185 = shalt.err (!%p6182_p2)
}
   0xc   :  { %s6186_s17 = scalar_lea.vmem %s40_s26, 32768  ;;  %p6191_p4 = scmp.lt.s32.totalorder %s40_s26, %s40_s26 }
   0xd   :  { %p6187_p3 = scmp.ne.s32.totalorder %s40_s26, %s6186_s17  ;;  %p6192_p5 = scmp.lt.s32.totalorder %s6186_s17, %s6186_s17 }
   0xf   :  { %p6193_p6 = por %p6192_p5, %p6191_p4 }
  0x11   :  { %p6194_p7 = pnand %p6193_p6, %p6187_p3 }
  0x13   :  { %6197 = shalt.err (!%p6194_p7)
}
  0x14   :  { %s6387_s18 = smov 512   ;;  %s6388_s19 = smov 32  }
  0x15   :  { %45 = dma.hbm_to_vmem [thread:$0]  %s6712_s1, 32768, %s40_s26, [#allocation6], %s6387_s18, %s6387_s18, %s6388_s19  }
  0x16   :  { %s6389_s22 = smov [#allocation8]   ;;  %s6198_s27 = scalar_lea.hbm %s6714_s3, 32768 }
  0x17   :  { %s61_s23 = sshll.u32 %s6389_s22, 4  ;;  %p6199_p8 = scmp.ne.s32.totalorder %s6714_s3, %s6198_s27  ;;  %s62_s23 = int_to_ptr.vmem [resolvable:$true] %s61_s23 }
  0x18   :  { %p6202_p9 = scmp.lt.u32.totalorder %s6198_s27, %s6714_s3 }
  0x1a   :  { %p6204_p10 = pnand %p6202_p9, %p6199_p8 }
  0x1c   :  { %6207 = shalt.err (!%p6204_p10)
}
  0x1d   :  { %s6208_s15 = scalar_lea.vmem %s62_s23, 32768  ;;  %p6213_p12 = scmp.lt.s32.totalorder %s62_s23, %s62_s23 }
  0x1e   :  { %p6209_p11 = scmp.ne.s32.totalorder %s62_s23, %s6208_s15  ;;  %p6214_p13 = scmp.lt.s32.totalorder %s6208_s15, %s6208_s15 }
  0x20   :  { %p6215_p0 = por %p6214_p13, %p6213_p12 }
  0x22   :  { %p6216_p1 = pnand %p6215_p0, %p6209_p11 }
  0x24   :  { %6219 = shalt.err (!%p6216_p1)
}
  0x25   :  { %s6390_s1 = smov 256   ;;  %s6391_s26 = smov 16  }
  0x26   :  { %67 = dma.hbm_to_vmem [thread:$0]  %s6714_s3, 32768, %s62_s23, [#allocation9], %s6390_s1, %s6390_s1, %s6391_s26  }
  0x27   :  { %s6392_s18 = smov [#allocation11]   ;;  %s6220_s22 = scalar_lea.hbm %s6718_s7, 2048 }
  0x28   :  { %s89_s19 = sshll.u32 %s6392_s18, 4  ;;  %p6221_p2 = scmp.ne.s32.totalorder %s6718_s7, %s6220_s22  ;;  %s90_s19 = int_to_ptr.vmem [resolvable:$true] %s89_s19 }
  0x29   :  { %p6224_p3 = scmp.lt.u32.totalorder %s6220_s22, %s6718_s7 }
  0x2b   :  { %p6226_p4 = pnand %p6224_p3, %p6221_p2 }
  0x2d   :  { %6229 = shalt.err (!%p6226_p4)
}
  0x2e   :  { %s6230_s29 = scalar_lea.vmem %s90_s19, 2048  ;;  %p6235_p6 = scmp.lt.s32.totalorder %s90_s19, %s90_s19 }
  0x2f   :  { %p6231_p5 = scmp.ne.s32.totalorder %s90_s19, %s6230_s29  ;;  %p6236_p7 = scmp.lt.s32.totalorder %s6230_s29, %s6230_s29 }
  0x31   :  { %p6237_p8 = por %p6236_p7, %p6235_p6 }
  0x33   :  { %p6238_p9 = pnand %p6237_p8, %p6231_p5 }
  0x35   :  { %6241 = shalt.err (!%p6238_p9)
}
  0x36   :  { %s6393_s3 = smov 64   ;;  %s6394_s23 = smov 4  }
  0x37   :  { %95 = dma.hbm_to_vmem [thread:$0]  %s6718_s7, 2048, %s90_s19, [#allocation12], %s6393_s3, %s6393_s3, %s6394_s23  }
  0x38   :  { %s6395_s15 = smov [#allocation2]   ;;  %s6396_s26 = smov [#allocation7]  }
  0x39   :  { %s30_s1 = sshll.u32 %s6395_s15, 4  ;;  %s52_s16 = sshll.u32 %s6396_s26, 4  ;;  %s31_s1 = int_to_ptr.vmem [resolvable:$true] %s30_s1  ;;  %s53_s16 = int_to_ptr.vmem [resolvable:$true] %s52_s16 }
  0x3a   :  { %s6242_s20 = scalar_lea.hbm %s6711_s0, 512 }
  0x3b   :  { %p6243_p10 = scmp.ne.s32.totalorder %s6711_s0, %s6242_s20  ;;  %p6246_p11 = scmp.lt.u32.totalorder %s6242_s20, %s6711_s0 }
  0x3d   :  { %p6248_p12 = pnand %p6246_p11, %p6243_p10 }
  0x3f   :  { %6251 = shalt.err (!%p6248_p12)
}
  0x40   :  { %s6252_s7 = scalar_lea.vmem %s31_s1, 512  ;;  %p6257_p0 = scmp.lt.s32.totalorder %s31_s1, %s31_s1 }
  0x41   :  { %p6253_p13 = scmp.ne.s32.totalorder %s31_s1, %s6252_s7  ;;  %p6258_p1 = scmp.lt.s32.totalorder %s6252_s7, %s6252_s7 }
  0x43   :  { %p6259_p2 = por %p6258_p1, %p6257_p0 }
  0x45   :  { %p6260_p3 = pnand %p6259_p2, %p6253_p13 }
  0x47   :  { %6263 = shalt.err (!%p6260_p3)
}
  0x48   :  { %33 = dma.hbm_to_vmem [thread:$0]  %s6711_s0, 512, %s31_s1, [#allocation3]  }
  0x49   :  { %s6264_s30 = scalar_lea.hbm %s6713_s2, 128 }
  0x4a   :  { %p6265_p4 = scmp.ne.s32.totalorder %s6713_s2, %s6264_s30  ;;  %p6268_p5 = scmp.lt.u32.totalorder %s6264_s30, %s6713_s2 }
  0x4c   :  { %p6270_p6 = pnand %p6268_p5, %p6265_p4 }
  0x4e   :  { %6273 = shalt.err (!%p6270_p6)
}
  0x4f   :  { %s6274_s18 = scalar_lea.vmem %s53_s16, 128  ;;  %p6279_p8 = scmp.lt.s32.totalorder %s53_s16, %s53_s16 }
  0x50   :  { %p6275_p7 = scmp.ne.s32.totalorder %s53_s16, %s6274_s18  ;;  %p6280_p9 = scmp.lt.s32.totalorder %s6274_s18, %s6274_s18 }
  0x52   :  { %p6281_p10 = por %p6280_p9, %p6279_p8 }
  0x54   :  { %p6282_p11 = pnand %p6281_p10, %p6275_p7 }
  0x56   :  { %6285 = shalt.err (!%p6282_p11)
}
  0x57   :  { %55 = dma.hbm_to_vmem [thread:$0]  %s6713_s2, 128, %s53_s16, [#allocation6]  }
  0x58   :  { %s6397_s20 = smov [#allocation10]   ;;  %s6286_s25 = scalar_lea.hbm %s6716_s5, 8192 }
  0x59   :  { %s75_s21 = sshll.u32 %s6397_s20, 4  ;;  %p6287_p12 = scmp.ne.s32.totalorder %s6716_s5, %s6286_s25  ;;  %s76_s21 = int_to_ptr.vmem [resolvable:$true] %s75_s21 }
  0x5a   :  { %p6290_p13 = scmp.lt.u32.totalorder %s6286_s25, %s6716_s5 }
  0x5c   :  { %p6292_p0 = pnand %p6290_p13, %p6287_p12 }
  0x5e   :  { %6295 = shalt.err (!%p6292_p0)
}
  0x5f   :  { %s6296_s29 = scalar_lea.vmem %s76_s21, 8192  ;;  %p6301_p2 = scmp.lt.s32.totalorder %s76_s21, %s76_s21 }
  0x60   :  { %p6297_p1 = scmp.ne.s32.totalorder %s76_s21, %s6296_s29  ;;  %p6302_p3 = scmp.lt.s32.totalorder %s6296_s29, %s6296_s29 }
  0x62   :  { %p6303_p4 = por %p6302_p3, %p6301_p2 }
  0x64   :  { %p6304_p5 = pnand %p6303_p4, %p6297_p1 }
  0x66   :  { %6307 = shalt.err (!%p6304_p5)
}
  0x67   :  { %s6398_s2 = smov 128   ;;  %s6399_s16 = smov 8  }
  0x68   :  { %81 = dma.hbm_to_vmem [thread:$0]  %s6716_s5, 8192, %s76_s21, [#allocation9], %s6398_s2, %s6398_s2, %s6399_s16  }
  0x69   :  { %s6400_s15 = smov [#allocation13]   ;;  %s6401_s17 = smov [#allocation14]  }
  0x6a   :  { %s103_s26 = sshll.u32 %s6400_s15, 4  ;;  %s117_s18 = sshll.u32 %s6401_s17, 4  ;;  %s104_s26 = int_to_ptr.vmem [resolvable:$true] %s103_s26  ;;  %s6550_s18 = int_to_ptr.vmem [resolvable:$true] %s117_s18 }
  0x6b   :  { %s6308_s20 = scalar_lea.hbm %s6720_s9, 1024 }
  0x6c   :  { %p6309_p6 = scmp.ne.s32.totalorder %s6720_s9, %s6308_s20  ;;  %p6312_p7 = scmp.lt.u32.totalorder %s6308_s20, %s6720_s9 }
  0x6e   :  { %p6314_p8 = pnand %p6312_p7, %p6309_p6 }
  0x70   :  { %6317 = shalt.err (!%p6314_p8)
}
  0x71   :  { %s6318_s5 = scalar_lea.vmem %s104_s26, 1024  ;;  %p6323_p10 = scmp.lt.s32.totalorder %s104_s26, %s104_s26 }
  0x72   :  { %p6319_p9 = scmp.ne.s32.totalorder %s104_s26, %s6318_s5  ;;  %p6324_p11 = scmp.lt.s32.totalorder %s6318_s5, %s6318_s5 }
  0x74   :  { %p6325_p12 = por %p6324_p11, %p6323_p10 }
  0x76   :  { %p6326_p13 = pnand %p6325_p12, %p6319_p9 }
  0x78   :  { %6329 = shalt.err (!%p6326_p13)
}
  0x79   :  { %109 = dma.hbm_to_vmem [thread:$0]  %s6720_s9, 1024, %s104_s26, [#allocation12], %s6393_s3, %s6393_s3, %s6394_s23  }
  0x7a   :  { %s6330_s29 = scalar_lea.hbm %s6722_s11, 1024 }
  0x7b   :  { %p6331_p0 = scmp.ne.s32.totalorder %s6722_s11, %s6330_s29  ;;  %p6334_p1 = scmp.lt.u32.totalorder %s6330_s29, %s6722_s11 }
  0x7d   :  { %p6336_p2 = pnand %p6334_p1, %p6331_p0 }
  0x7f   :  { %6339 = shalt.err (!%p6336_p2)
}
  0x80   :  { %s6340_s15 = scalar_lea.vmem %s6550_s18, 1024  ;;  %p6345_p4 = scmp.lt.s32.totalorder %s6550_s18, %s6550_s18 }
  0x81   :  { %p6341_p3 = scmp.ne.s32.totalorder %s6550_s18, %s6340_s15  ;;  %p6346_p5 = scmp.lt.s32.totalorder %s6340_s15, %s6340_s15 }
  0x83   :  { %p6347_p6 = por %p6346_p5, %p6345_p4 }
  0x85   :  { %p6348_p7 = pnand %p6347_p6, %p6341_p3 }
  0x87   :  { %6351 = shalt.err (!%p6348_p7)
}
  0x88   :  { %123 = dma.hbm_to_vmem [thread:$0]  %s6722_s11, 1024, %s6550_s18, [#allocation15], %s6393_s3, %s6393_s3, %s6394_s23  }
  0x89   :  { %6374 = dma.done.wait [#allocation3], 512  }
  0x8a   :  { %6375 = vsyncadd [#allocation3], 4294966784 }
  0x8b   :  { %6376 = dma.done.wait [#allocation6], 32896  }
  0x8c   :  { %6377 = vsyncadd [#allocation6], 4294934400 }
  0x8d   :  { %6378 = dma.done.wait [#allocation9], 40960  }
  0x8e   :  { %6379 = vsyncadd [#allocation9], 4294926336 }
  0x8f   :  { %6380 = dma.done.wait [#allocation12], 3072  }
  0x90   :  { %6381 = vsyncadd [#allocation12], 4294964224 }
  0x91   :  { %6382 = dma.done.wait [#allocation15], 1024  }
  0x92   :  { %6383 = vsyncadd [#allocation15], 4294966272  ;;  %v155_v0 = vld [vmem:[#allocation5] sm:$0xff]  ;;  %v156_v2 = vld [vmem:[#allocation5 + $0x8] sm:$0xff]  ;;  %vm6403_vm0 = vmmov 0  }
  0x93   :  { %v159_v1 = vld [vmem:[#allocation5 + $0x20] sm:$0xff]  ;;  %v160_v4 = vld [vmem:[#allocation5 + $0x28] sm:$0xff] }
  0x94   :  { %v4893_v3 = vcombine.high %v155_v0, %v159_v1  ;;  %v4892_v5 = vcombine.low %v155_v0, %v159_v1  ;;  %v163_v6 = vld [vmem:[#allocation5 + $0x40] sm:$0xff]  ;;  %v4895_v8 = vcombine.high %v156_v2, %v160_v4  ;;  %v4894_v9 = vcombine.low %v156_v2, %v160_v4  ;;  %v164_v11 = vld [vmem:[#allocation5 + $0x48] sm:$0xff] }
  0x95   :  { %v167_v7 = vld [vmem:[#allocation5 + $0x60] sm:$0xff]  ;;  %v168_v12 = vld [vmem:[#allocation5 + $0x68] sm:$0xff] }
  0x96   :  { %v4901_v10 = vcombine.high %v163_v6, %v167_v7  ;;  %v171_v13 = vld [vmem:[#allocation5 + $0x80] sm:$0xff]  ;;  %1737 = vmatprep.subr.bf16.mxu0 %v4893_v3  ;;  %v4903_v14 = vcombine.high %v164_v11, %v168_v12  ;;  %v172_v16 = vld [vmem:[#allocation5 + $0x88] sm:$0xff]  ;;  %1819 = vmatprep.subr.bf16.mxu1 %v4895_v8  ;;  %v4900_v18 = vcombine.low %v163_v6, %v167_v7 }
  0x97   :  { %v175_v15 = vld [vmem:[#allocation5 + $0xa0] sm:$0xff]  ;;  %v176_v17 = vld [vmem:[#allocation5 + $0xa8] sm:$0xff]  ;;  %1738 = vmatpush1.bf16.msra.mxu0 %v4892_v5  ;;  %1820 = vmatpush1.bf16.msra.mxu1 %v4894_v9  ;;  %v4902_v19 = vcombine.low %v164_v11, %v168_v12 }
  0x98   :  { %1739 = vmatprep.subr.bf16.mxu0 %v4901_v10  ;;  %v4909_v20 = vcombine.high %v171_v13, %v175_v15  ;;  %1821 = vmatprep.subr.bf16.mxu1 %v4903_v14  ;;  %v4911_v21 = vcombine.high %v172_v16, %v176_v17  ;;  %v179_v22 = vld [vmem:[#allocation5 + $0xc0] sm:$0xff]  ;;  %v180_v24 = vld [vmem:[#allocation5 + $0xc8] sm:$0xff]  ;;  %v4908_v26 = vcombine.low %v171_v13, %v175_v15 }
  0x99   :  { %v183_v23 = vld [vmem:[#allocation5 + $0xe0] sm:$0xff]  ;;  %v184_v25 = vld [vmem:[#allocation5 + $0xe8] sm:$0xff]  ;;  %v4910_v27 = vcombine.low %v172_v16, %v176_v17 }
  0x9a   :  { %v4917_v28 = vcombine.high %v179_v22, %v183_v23  ;;  %v4919_v29 = vcombine.high %v180_v24, %v184_v25  ;;  %v187_v30 = vld [vmem:[#allocation5 + $0x100] sm:$0xff]  ;;  %v188_v32 = vld [vmem:[#allocation5 + $0x108] sm:$0xff]  ;;  %v4916_v34 = vcombine.low %v179_v22, %v183_v23  ;;  %v4918_v35 = vcombine.low %v180_v24, %v184_v25 }
  0x9b   :  { %1740 = vmatpush1.bf16.msra.mxu0 %v4900_v18  ;;  %1822 = vmatpush1.bf16.msra.mxu1 %v4902_v19  ;;  %v191_v31 = vld [vmem:[#allocation5 + $0x120] sm:$0xff]  ;;  %v192_v33 = vld [vmem:[#allocation5 + $0x128] sm:$0xff] }
  0x9c   :  { %1741 = vmatprep.subr.bf16.mxu0 %v4909_v20  ;;  %1823 = vmatprep.subr.bf16.mxu1 %v4911_v21  ;;  %v4925_v36 = vcombine.high %v187_v30, %v191_v31  ;;  %v4927_v37 = vcombine.high %v188_v32, %v192_v33  ;;  %v195_v38 = vld [vmem:[#allocation5 + $0x140] sm:$0xff]  ;;  %v196_v40 = vld [vmem:[#allocation5 + $0x148] sm:$0xff]  ;;  %v4924_v42 = vcombine.low %v187_v30, %v191_v31 }
  0x9d   :  { %v199_v39 = vld [vmem:[#allocation5 + $0x160] sm:$0xff]  ;;  %v200_v41 = vld [vmem:[#allocation5 + $0x168] sm:$0xff]  ;;  %v4926_v43 = vcombine.low %v188_v32, %v192_v33 }
  0x9e   :  { %v4933_v44 = vcombine.high %v195_v38, %v199_v39  ;;  %v4935_v45 = vcombine.high %v196_v40, %v200_v41  ;;  %v203_v46 = vld [vmem:[#allocation5 + $0x180] sm:$0xff]  ;;  %v204_v48 = vld [vmem:[#allocation5 + $0x188] sm:$0xff]  ;;  %v4932_v50 = vcombine.low %v195_v38, %v199_v39  ;;  %v4934_v51 = vcombine.low %v196_v40, %v200_v41 }
  0x9f   :  { %1742 = vmatpush1.bf16.msra.mxu0 %v4908_v26  ;;  %1824 = vmatpush1.bf16.msra.mxu1 %v4910_v27  ;;  %v207_v47 = vld [vmem:[#allocation5 + $0x1a0] sm:$0xff]  ;;  %v208_v49 = vld [vmem:[#allocation5 + $0x1a8] sm:$0xff] }
  0xa0   :  { %1743 = vmatprep.subr.bf16.mxu0 %v4917_v28  ;;  %1825 = vmatprep.subr.bf16.mxu1 %v4919_v29  ;;  %v4941_v52 = vcombine.high %v203_v46, %v207_v47  ;;  %v152_v53 = vld [vmem:[#allocation2 + $0x8] sm:$0xff]  ;;  %v4943_v54 = vcombine.high %v204_v48, %v208_v49  ;;  %v211_v55 = vld [vmem:[#allocation5 + $0x1c0] sm:$0xff]  ;;  %v4940_v60 = vcombine.low %v203_v46, %v207_v47 }
  0xa1   :  { %v215_v56 = vld [vmem:[#allocation5 + $0x1e0] sm:$0xff]  ;;  %v6587_v57 = vpack.c.bf16 %v152_v53, %v152_v53  ;;  %v212_v58 = vld [vmem:[#allocation5 + $0x1c8] sm:$0xff]  ;;  %v4942_v61 = vcombine.low %v204_v48, %v208_v49 }
  0xa2   :  { %v216_v59 = vld [vmem:[#allocation5 + $0x1e8] sm:$0xff]  ;;  %v4949_v62 = vcombine.high %v211_v55, %v215_v56  ;;  %v219_v0 = vld [vmem:[#allocation5 + $0x200] sm:$0xff]  ;;  %v4948_v4 = vcombine.low %v211_v55, %v215_v56 }
  0xa3   :  { %1744 = vmatpush1.bf16.msra.mxu0 %v4916_v34  ;;  %1826 = vmatpush1.bf16.msra.mxu1 %v4918_v35  ;;  %v4951_v63 = vcombine.high %v212_v58, %v216_v59  ;;  %v223_v1 = vld [vmem:[#allocation5 + $0x220] sm:$0xff]  ;;  %v220_v2 = vld [vmem:[#allocation5 + $0x208] sm:$0xff]  ;;  %v4950_v5 = vcombine.low %v212_v58, %v216_v59 }
  0xa4   :  { %1745 = vmatprep.subr.bf16.mxu0 %v4925_v36  ;;  %1827 = vmatprep.subr.bf16.mxu1 %v4927_v37  ;;  %v224_v3 = vld [vmem:[#allocation5 + $0x228] sm:$0xff]  ;;  %v4957_v6 = vcombine.high %v219_v0, %v223_v1  ;;  %v227_v8 = vld [vmem:[#allocation5 + $0x240] sm:$0xff]  ;;  %v4956_v12 = vcombine.low %v219_v0, %v223_v1 }
  0xa5   :  { %1769 = vmatprep.mubr.bf16.mxu0 %v6587_v57  ;;  %1851 = vmatprep.mubr.bf16.mxu1 %v6587_v57  ;;  %v4959_v7 = vcombine.high %v220_v2, %v224_v3  ;;  %v231_v9 = vld [vmem:[#allocation5 + $0x260] sm:$0xff]  ;;  %v228_v10 = vld [vmem:[#allocation5 + $0x248] sm:$0xff]  ;;  %v4958_v13 = vcombine.low %v220_v2, %v224_v3 }
  0xa6   :  { %v232_v11 = vld [vmem:[#allocation5 + $0x268] sm:$0xff]  ;;  %v4965_v14 = vcombine.high %v227_v8, %v231_v9  ;;  %v235_v16 = vld [vmem:[#allocation5 + $0x280] sm:$0xff]  ;;  %v4964_v20 = vcombine.low %v227_v8, %v231_v9 }
  0xa7   :  { %1746 = vmatpush1.bf16.msra.mxu0 %v4924_v42  ;;  %1828 = vmatpush1.bf16.msra.mxu1 %v4926_v43  ;;  %v4967_v15 = vcombine.high %v228_v10, %v232_v11  ;;  %v239_v17 = vld [vmem:[#allocation5 + $0x2a0] sm:$0xff]  ;;  %v236_v18 = vld [vmem:[#allocation5 + $0x288] sm:$0xff]  ;;  %v4966_v21 = vcombine.low %v228_v10, %v232_v11 }
  0xa8   :  { %1747 = vmatprep.subr.bf16.mxu0 %v4933_v44  ;;  %1829 = vmatprep.subr.bf16.mxu1 %v4935_v45  ;;  %v240_v19 = vld [vmem:[#allocation5 + $0x2a8] sm:$0xff]  ;;  %v4973_v22 = vcombine.high %v235_v16, %v239_v17  ;;  %v243_v24 = vld [vmem:[#allocation5 + $0x2c0] sm:$0xff]  ;;  %v4972_v28 = vcombine.low %v235_v16, %v239_v17 }
  0xa9   :  { %v4975_v23 = vcombine.high %v236_v18, %v240_v19  ;;  %v247_v25 = vld [vmem:[#allocation5 + $0x2e0] sm:$0xff]  ;;  %v244_v26 = vld [vmem:[#allocation5 + $0x2c8] sm:$0xff]  ;;  %v4974_v29 = vcombine.low %v236_v18, %v240_v19 }
  0xaa   :  { %v248_v27 = vld [vmem:[#allocation5 + $0x2e8] sm:$0xff]  ;;  %v4981_v30 = vcombine.high %v243_v24, %v247_v25  ;;  %v251_v32 = vld [vmem:[#allocation5 + $0x300] sm:$0xff]  ;;  %v4980_v36 = vcombine.low %v243_v24, %v247_v25 }
  0xab   :  { %1748 = vmatpush1.bf16.msra.mxu0 %v4932_v50  ;;  %1830 = vmatpush1.bf16.msra.mxu1 %v4934_v51  ;;  %v4983_v31 = vcombine.high %v244_v26, %v248_v27  ;;  %v255_v33 = vld [vmem:[#allocation5 + $0x320] sm:$0xff]  ;;  %v252_v34 = vld [vmem:[#allocation5 + $0x308] sm:$0xff]  ;;  %v4982_v37 = vcombine.low %v244_v26, %v248_v27 }
  0xac   :  { %1749 = vmatprep.subr.bf16.mxu0 %v4941_v52  ;;  %1831 = vmatprep.subr.bf16.mxu1 %v4943_v54  ;;  %v256_v35 = vld [vmem:[#allocation5 + $0x328] sm:$0xff]  ;;  %v4989_v38 = vcombine.high %v251_v32, %v255_v33  ;;  %v259_v40 = vld [vmem:[#allocation5 + $0x340] sm:$0xff]  ;;  %v4988_v44 = vcombine.low %v251_v32, %v255_v33 }
  0xad   :  { %v4991_v39 = vcombine.high %v252_v34, %v256_v35  ;;  %v263_v41 = vld [vmem:[#allocation5 + $0x360] sm:$0xff]  ;;  %v260_v42 = vld [vmem:[#allocation5 + $0x348] sm:$0xff]  ;;  %v4990_v45 = vcombine.low %v252_v34, %v256_v35 }
  0xae   :  { %v264_v43 = vld [vmem:[#allocation5 + $0x368] sm:$0xff]  ;;  %v4997_v46 = vcombine.high %v259_v40, %v263_v41  ;;  %v267_v48 = vld [vmem:[#allocation5 + $0x380] sm:$0xff]  ;;  %v4996_v52 = vcombine.low %v259_v40, %v263_v41 }
  0xaf   :  { %1750 = vmatpush1.bf16.msra.mxu0 %v4940_v60  ;;  %1832 = vmatpush1.bf16.msra.mxu1 %v4942_v61  ;;  %v4999_v47 = vcombine.high %v260_v42, %v264_v43  ;;  %v271_v49 = vld [vmem:[#allocation5 + $0x3a0] sm:$0xff]  ;;  %v268_v50 = vld [vmem:[#allocation5 + $0x388] sm:$0xff]  ;;  %v4998_v53 = vcombine.low %v260_v42, %v264_v43 }
  0xb0   :  { %1751 = vmatprep.subr.bf16.mxu0 %v4949_v62  ;;  %1833 = vmatprep.subr.bf16.mxu1 %v4951_v63  ;;  %v272_v51 = vld [vmem:[#allocation5 + $0x3a8] sm:$0xff]  ;;  %v5005_v54 = vcombine.high %v267_v48, %v271_v49  ;;  %v275_v56 = vld [vmem:[#allocation5 + $0x3c0] sm:$0xff]  ;;  %v5004_v61 = vcombine.low %v267_v48, %v271_v49 }
  0xb1   :  { %v5007_v55 = vcombine.high %v268_v50, %v272_v51  ;;  %v279_v58 = vld [vmem:[#allocation5 + $0x3e0] sm:$0xff]  ;;  %v276_v59 = vld [vmem:[#allocation5 + $0x3c8] sm:$0xff]  ;;  %v5006_v62 = vcombine.low %v268_v50, %v272_v51 }
  0xb2   :  { %v280_v60 = vld [vmem:[#allocation5 + $0x3e8] sm:$0xff]  ;;  %v5013_v63 = vcombine.high %v275_v56, %v279_v58  ;;  %v283_v1 = vld [vmem:[#allocation5 + $0x400] sm:$0xff] }
  0xb3   :  { %1752 = vmatpush1.bf16.msra.mxu0 %v4948_v4  ;;  %1834 = vmatpush1.bf16.msra.mxu1 %v4950_v5  ;;  %v5015_v0 = vcombine.high %v276_v59, %v280_v60  ;;  %v287_v2 = vld [vmem:[#allocation5 + $0x420] sm:$0xff]  ;;  %v284_v3 = vld [vmem:[#allocation5 + $0x408] sm:$0xff]  ;;  %v5012_v5 = vcombine.low %v275_v56, %v279_v58 }
  0xb4   :  { %1753 = vmatprep.subr.bf16.mxu0 %v4957_v6  ;;  %1835 = vmatprep.subr.bf16.mxu1 %v4959_v7  ;;  %v288_v4 = vld [vmem:[#allocation5 + $0x428] sm:$0xff]  ;;  %v151_v6 = vld [vmem:[#allocation2] sm:$0xff]  ;;  %v5014_v7 = vcombine.low %v276_v59, %v280_v60  ;;  %v5021_v8 = vcombine.high %v283_v1, %v287_v2  ;;  %v5020_v16 = vcombine.low %v283_v1, %v287_v2 }
  0xb5   :  { %v5023_v9 = vcombine.high %v284_v3, %v288_v4  ;;  %v291_v10 = vld [vmem:[#allocation5 + $0x440] sm:$0xff]  ;;  %v5022_v17 = vcombine.low %v284_v3, %v288_v4  ;;  %v312_v32 = vld [vmem:[#allocation5 + $0x4e8] sm:$0xff] }
  0xb6   :  { %v295_v11 = vld [vmem:[#allocation5 + $0x460] sm:$0xff]  ;;  %v320_v40 = vld [vmem:[#allocation5 + $0x528] sm:$0xff] }
  0xb7   :  { %1754 = vmatpush1.bf16.msra.mxu0 %v4956_v12  ;;  %1836 = vmatpush1.bf16.msra.mxu1 %v4958_v13  ;;  %v6591_v12 = vpack.c.bf16 %v151_v6, %v151_v6  ;;  %v292_v13 = vld [vmem:[#allocation5 + $0x448] sm:$0xff]  ;;  %v5029_v18 = vcombine.high %v291_v10, %v295_v11  ;;  %v299_v19 = vld [vmem:[#allocation5 + $0x480] sm:$0xff]  ;;  %v5028_v25 = vcombine.low %v291_v10, %v295_v11 }
  0xb8   :  { %1755 = vmatprep.subr.bf16.mxu0 %v4965_v14  ;;  %1837 = vmatprep.subr.bf16.mxu1 %v4967_v15  ;;  %v296_v14 = vld [vmem:[#allocation5 + $0x468] sm:$0xff]  ;;  %v154_v15 = vld [vmem:[#allocation2 + $0x18] sm:$0xff]  ;;  %v351_v6 = vld [vmem:[#allocation5 + $0x620] sm:$0xff] }
  0xb9   :  { %v6593_v24 = vpack.c.bf16 %v154_v15, %v154_v15  ;;  %v5030_v26 = vcombine.low %v292_v13, %v296_v14  ;;  %v328_v48 = vld [vmem:[#allocation5 + $0x568] sm:$0xff]  ;;  %v359_v15 = vld [vmem:[#allocation5 + $0x660] sm:$0xff] }
  0xba   :  { %v336_v56 = vld [vmem:[#allocation5 + $0x5a8] sm:$0xff] }
  0xbb   :  { %1756 = vmatpush1.bf16.msra.mxu0 %v4964_v20  ;;  %1838 = vmatpush1.bf16.msra.mxu1 %v4966_v21  ;;  %v303_v20 = vld [vmem:[#allocation5 + $0x4a0] sm:$0xff]  ;;  %v5031_v21 = vcombine.high %v292_v13, %v296_v14  ;;  %v344_v1 = vld [vmem:[#allocation5 + $0x5e8] sm:$0xff] }
  0xbc   :  { %1757 = vmatprep.subr.bf16.mxu0 %v4973_v22  ;;  %1839 = vmatprep.subr.bf16.mxu1 %v4975_v23  ;;  %v300_v22 = vld [vmem:[#allocation5 + $0x488] sm:$0xff]  ;;  %v5037_v27 = vcombine.high %v299_v19, %v303_v20  ;;  %v5036_v33 = vcombine.low %v299_v19, %v303_v20  ;;  %v355_v14 = vld [vmem:[#allocation5 + $0x640] sm:$0xff] }
  0xbd   :  { %v304_v23 = vld [vmem:[#allocation5 + $0x4a8] sm:$0xff] }
  0xbe   :  { %v5038_v34 = vcombine.low %v300_v22, %v304_v23 }
  0xbf   :  { %1758 = vmatpush1.bf16.msra.mxu0 %v4972_v28  ;;  %1840 = vmatpush1.bf16.msra.mxu1 %v4974_v29  ;;  %v307_v28 = vld [vmem:[#allocation5 + $0x4c0] sm:$0xff] }
  0xc0   :  { %1759 = vmatprep.subr.bf16.mxu0 %v4981_v30  ;;  %1841 = vmatprep.subr.bf16.mxu1 %v4983_v31  ;;  %v311_v29 = vld [vmem:[#allocation5 + $0x4e0] sm:$0xff]  ;;  %v308_v30 = vld [vmem:[#allocation5 + $0x4c8] sm:$0xff]  ;;  %v5039_v31 = vcombine.high %v300_v22, %v304_v23 }
  0xc1   :  { %v5045_v35 = vcombine.high %v307_v28, %v311_v29  ;;  %v5044_v41 = vcombine.low %v307_v28, %v311_v29  ;;  %v5046_v42 = vcombine.low %v308_v30, %v312_v32  ;;  %v363_v22 = vld [vmem:[#allocation5 + $0x680] sm:$0xff]  ;;  %v5092_v28 = vcombine.low %v355_v14, %v359_v15 }
  0xc2   :  { %v367_v23 = vld [vmem:[#allocation5 + $0x6a0] sm:$0xff] }
  0xc3   :  { %1760 = vmatpush1.bf16.msra.mxu0 %v4980_v36  ;;  %1842 = vmatpush1.bf16.msra.mxu1 %v4982_v37  ;;  %v315_v36 = vld [vmem:[#allocation5 + $0x500] sm:$0xff] }
  0xc4   :  { %1761 = vmatprep.subr.bf16.mxu0 %v4989_v38  ;;  %1843 = vmatprep.subr.bf16.mxu1 %v4991_v39  ;;  %v319_v37 = vld [vmem:[#allocation5 + $0x520] sm:$0xff]  ;;  %v316_v38 = vld [vmem:[#allocation5 + $0x508] sm:$0xff]  ;;  %v5047_v39 = vcombine.high %v308_v30, %v312_v32  ;;  %v5101_v30 = vcombine.high %v363_v22, %v367_v23 }
  0xc5   :  { %v5053_v43 = vcombine.high %v315_v36, %v319_v37  ;;  %v5052_v49 = vcombine.low %v315_v36, %v319_v37  ;;  %v5054_v50 = vcombine.low %v316_v38, %v320_v40  ;;  %v375_v32 = vld [vmem:[#allocation5 + $0x6e0] sm:$0xff]  ;;  %v5100_v36 = vcombine.low %v363_v22, %v367_v23  ;;  %v170_v22 = vld [vmem:[#allocation5 + $0x78] sm:$0xff] }
  0xc7   :  { %1762 = vmatpush1.bf16.msra.mxu0 %v4988_v44  ;;  %1844 = vmatpush1.bf16.msra.mxu1 %v4990_v45  ;;  %v323_v44 = vld [vmem:[#allocation5 + $0x540] sm:$0xff] }
  0xc8   :  { %1763 = vmatprep.subr.bf16.mxu0 %v4997_v46  ;;  %1845 = vmatprep.subr.bf16.mxu1 %v4999_v47  ;;  %v327_v45 = vld [vmem:[#allocation5 + $0x560] sm:$0xff]  ;;  %v324_v46 = vld [vmem:[#allocation5 + $0x548] sm:$0xff]  ;;  %v5055_v47 = vcombine.high %v316_v38, %v320_v40 }
  0xc9   :  { %v5061_v51 = vcombine.high %v323_v44, %v327_v45  ;;  %v5060_v58 = vcombine.low %v323_v44, %v327_v45  ;;  %v5062_v59 = vcombine.low %v324_v46, %v328_v48  ;;  %v383_v40 = vld [vmem:[#allocation5 + $0x720] sm:$0xff] }
  0xcb   :  { %1764 = vmatpush1.bf16.msra.mxu0 %v4996_v52  ;;  %1846 = vmatpush1.bf16.msra.mxu1 %v4998_v53  ;;  %v331_v52 = vld [vmem:[#allocation5 + $0x580] sm:$0xff] }
  0xcc   :  { %1765 = vmatprep.subr.bf16.mxu0 %v5005_v54  ;;  %1847 = vmatprep.subr.bf16.mxu1 %v5007_v55  ;;  %v335_v53 = vld [vmem:[#allocation5 + $0x5a0] sm:$0xff]  ;;  %v332_v54 = vld [vmem:[#allocation5 + $0x588] sm:$0xff]  ;;  %v5063_v55 = vcombine.high %v324_v46, %v328_v48 }
  0xcd   :  { %v5069_v60 = vcombine.high %v331_v52, %v335_v53  ;;  %v5068_v2 = vcombine.low %v331_v52, %v335_v53  ;;  %v5070_v3 = vcombine.low %v332_v54, %v336_v56  ;;  %v391_v48 = vld [vmem:[#allocation5 + $0x760] sm:$0xff] }
  0xcf   :  { %1766 = vmatpush1.bf16.msra.mxu0 %v5004_v61  ;;  %1848 = vmatpush1.bf16.msra.mxu1 %v5006_v62  ;;  %v339_v61 = vld [vmem:[#allocation5 + $0x5c0] sm:$0xff] }
  0xd0   :  { %1767 = vmatprep.subr.bf16.mxu0 %v5013_v63  ;;  %1849 = vmatprep.subr.bf16.mxu1 %v5015_v0  ;;  %v343_v62 = vld [vmem:[#allocation5 + $0x5e0] sm:$0xff]  ;;  %v340_v63 = vld [vmem:[#allocation5 + $0x5c8] sm:$0xff]  ;;  %v5071_v0 = vcombine.high %v332_v54, %v336_v56 }
  0xd1   :  { %v5077_v4 = vcombine.high %v339_v61, %v343_v62  ;;  %v5076_v10 = vcombine.low %v339_v61, %v343_v62  ;;  %v5078_v11 = vcombine.low %v340_v63, %v344_v1  ;;  %v399_v56 = vld [vmem:[#allocation5 + $0x7a0] sm:$0xff] }
  0xd3   :  { %1768 = vmatpush1.bf16.msra.mxu0 %v5012_v5  ;;  %1850 = vmatpush1.bf16.msra.mxu1 %v5014_v7  ;;  %v347_v5 = vld [vmem:[#allocation5 + $0x600] sm:$0xff]  ;;  %v348_v7 = vld [vmem:[#allocation5 + $0x608] sm:$0xff] }
  0xd4   :  { %1778 = vmatprep.subr.bf16.mxu0 %v5021_v8  ;;  %1860 = vmatprep.subr.bf16.mxu1 %v5023_v9  ;;  %v5079_v8 = vcombine.high %v340_v63, %v344_v1  ;;  %v352_v9 = vld [vmem:[#allocation5 + $0x628] sm:$0xff]  ;;  %v5085_v13 = vcombine.high %v347_v5, %v351_v6  ;;  %v5084_v19 = vcombine.low %v347_v5, %v351_v6  ;;  %v407_v1 = vld [vmem:[#allocation5 + $0x7e0] sm:$0xff] }
  0xd5   :  { %v5086_v20 = vcombine.low %v348_v7, %v352_v9 }
  0xd6   :  { %1770 = vmatmul.mubr.bf16.vlgmr.msra.gmra.mrb[0].mxu0 %v6591_v12  ;;  %1852 = vmatmul.mubr.bf16.vlgmr.msra.gmra.mrb[0].mxu1 %v6591_v12 }
  0xd7   :  { %1779 = vmatpush1.bf16.msra.mxu0 %v5020_v16  ;;  %1861 = vmatpush1.bf16.msra.mxu1 %v5022_v17  ;;  %v356_v16 = vld [vmem:[#allocation5 + $0x648] sm:$0xff]  ;;  %v5087_v17 = vcombine.high %v348_v7, %v352_v9  ;;  %v161_v9 = vld [vmem:[#allocation5 + $0x30] sm:$0xff] }
  0xd8   :  { %1780 = vmatprep.subr.bf16.mxu0 %v5029_v18  ;;  %1862 = vmatprep.subr.bf16.mxu1 %v5031_v21  ;;  %v360_v18 = vld [vmem:[#allocation5 + $0x668] sm:$0xff]  ;;  %v5093_v21 = vcombine.high %v355_v14, %v359_v15  ;;  %v162_v14 = vld [vmem:[#allocation5 + $0x38] sm:$0xff] }
  0xd9   :  { %1810 = vmatprep.mubr.bf16.mxu0 %v6593_v24  ;;  %1892 = vmatprep.mubr.bf16.mxu1 %v6593_v24  ;;  %v5094_v29 = vcombine.low %v356_v16, %v360_v18 }
  0xdb   :  { %1781 = vmatpush1.bf16.msra.mxu0 %v5028_v25  ;;  %1863 = vmatpush1.bf16.msra.mxu1 %v5030_v26  ;;  %v364_v25 = vld [vmem:[#allocation5 + $0x688] sm:$0xff]  ;;  %v5095_v26 = vcombine.high %v356_v16, %v360_v18  ;;  %v165_v18 = vld [vmem:[#allocation5 + $0x50] sm:$0xff] }
  0xdc   :  { %1782 = vmatprep.subr.bf16.mxu0 %v5037_v27  ;;  %1864 = vmatprep.subr.bf16.mxu1 %v5039_v31  ;;  %v368_v27 = vld [vmem:[#allocation5 + $0x6a8] sm:$0xff]  ;;  %v371_v31 = vld [vmem:[#allocation5 + $0x6c0] sm:$0xff] }
  0xdd   :  { %v5102_v37 = vcombine.low %v364_v25, %v368_v27  ;;  %v5109_v38 = vcombine.high %v371_v31, %v375_v32  ;;  %v5108_v44 = vcombine.low %v371_v31, %v375_v32  ;;  %v178_v31 = vld [vmem:[#allocation5 + $0xb8] sm:$0xff] }
  0xdf   :  { %1783 = vmatpush1.bf16.msra.mxu0 %v5036_v33  ;;  %1865 = vmatpush1.bf16.msra.mxu1 %v5038_v34  ;;  %v372_v33 = vld [vmem:[#allocation5 + $0x6c8] sm:$0xff]  ;;  %v5103_v34 = vcombine.high %v364_v25, %v368_v27  ;;  %v177_v27 = vld [vmem:[#allocation5 + $0xb0] sm:$0xff] }
  0xe0   :  { %1784 = vmatprep.subr.bf16.mxu0 %v5045_v35  ;;  %1866 = vmatprep.subr.bf16.mxu1 %v5047_v39  ;;  %v376_v35 = vld [vmem:[#allocation5 + $0x6e8] sm:$0xff]  ;;  %v379_v39 = vld [vmem:[#allocation5 + $0x700] sm:$0xff] }
  0xe1   :  { %v5110_v45 = vcombine.low %v372_v33, %v376_v35  ;;  %v5117_v46 = vcombine.high %v379_v39, %v383_v40  ;;  %v5116_v52 = vcombine.low %v379_v39, %v383_v40  ;;  %v182_v39 = vld [vmem:[#allocation5 + $0xd8] sm:$0xff] }
  0xe2   :  { %v186_v40 = vld [vmem:[#allocation5 + $0xf8] sm:$0xff] }
  0xe3   :  { %1785 = vmatpush1.bf16.msra.mxu0 %v5044_v41  ;;  %1867 = vmatpush1.bf16.msra.mxu1 %v5046_v42  ;;  %v380_v41 = vld [vmem:[#allocation5 + $0x708] sm:$0xff]  ;;  %v5111_v42 = vcombine.high %v372_v33, %v376_v35 }
  0xe4   :  { %1786 = vmatprep.subr.bf16.mxu0 %v5053_v43  ;;  %1868 = vmatprep.subr.bf16.mxu1 %v5055_v47  ;;  %v384_v43 = vld [vmem:[#allocation5 + $0x728] sm:$0xff]  ;;  %v387_v47 = vld [vmem:[#allocation5 + $0x740] sm:$0xff] }
  0xe5   :  { %v5118_v53 = vcombine.low %v380_v41, %v384_v43  ;;  %v5125_v54 = vcombine.high %v387_v47, %v391_v48  ;;  %v5124_v61 = vcombine.low %v387_v47, %v391_v48  ;;  %v4923_v47 = vcombine.high %v182_v39, %v186_v40  ;;  %v194_v48 = vld [vmem:[#allocation5 + $0x138] sm:$0xff] }
  0xe7   :  { %1787 = vmatpush1.bf16.msra.mxu0 %v5052_v49  ;;  %1869 = vmatpush1.bf16.msra.mxu1 %v5054_v50  ;;  %v388_v49 = vld [vmem:[#allocation5 + $0x748] sm:$0xff]  ;;  %v5119_v50 = vcombine.high %v380_v41, %v384_v43 }
  0xe8   :  { %1788 = vmatprep.subr.bf16.mxu0 %v5061_v51  ;;  %1870 = vmatprep.subr.bf16.mxu1 %v5063_v55  ;;  %v392_v51 = vld [vmem:[#allocation5 + $0x768] sm:$0xff]  ;;  %v395_v55 = vld [vmem:[#allocation5 + $0x780] sm:$0xff] }
  0xe9   :  { %v5126_v62 = vcombine.low %v388_v49, %v392_v51  ;;  %v5133_v63 = vcombine.high %v395_v55, %v399_v56  ;;  %v5132_v5 = vcombine.low %v395_v55, %v399_v56  ;;  %v202_v55 = vld [vmem:[#allocation5 + $0x178] sm:$0xff] }
  0xeb   :  { %1789 = vmatpush1.bf16.msra.mxu0 %v5060_v58  ;;  %1871 = vmatpush1.bf16.msra.mxu1 %v5062_v59  ;;  %v396_v58 = vld [vmem:[#allocation5 + $0x788] sm:$0xff]  ;;  %v5127_v59 = vcombine.high %v388_v49, %v392_v51 }
  0xec   :  { %1790 = vmatprep.subr.bf16.mxu0 %v5069_v60  ;;  %1872 = vmatprep.subr.bf16.mxu1 %v5071_v0  ;;  %v400_v60 = vld [vmem:[#allocation5 + $0x7a8] sm:$0xff]  ;;  %v403_v0 = vld [vmem:[#allocation5 + $0x7c0] sm:$0xff] }
  0xed   :  { %v5134_v6 = vcombine.low %v396_v58, %v400_v60  ;;  %v5141_v7 = vcombine.high %v403_v0, %v407_v1  ;;  %v5140_v15 = vcombine.low %v403_v0, %v407_v1  ;;  %v210_v0 = vld [vmem:[#allocation5 + $0x1b8] sm:$0xff] }
  0xef   :  { %1791 = vmatpush1.bf16.msra.mxu0 %v5068_v2  ;;  %1873 = vmatpush1.bf16.msra.mxu1 %v5070_v3  ;;  %v404_v2 = vld [vmem:[#allocation5 + $0x7c8] sm:$0xff]  ;;  %v5135_v3 = vcombine.high %v396_v58, %v400_v60  ;;  %v205_v60 = vld [vmem:[#allocation5 + $0x190] sm:$0xff] }
  0xf0   :  { %1792 = vmatprep.subr.bf16.mxu0 %v5077_v4  ;;  %1874 = vmatprep.subr.bf16.mxu1 %v5079_v8  ;;  %v408_v4 = vld [vmem:[#allocation5 + $0x7e8] sm:$0xff]  ;;  %v157_v8 = vld [vmem:[#allocation5 + $0x10] sm:$0xff] }
  0xf1   :  { %v5142_v16 = vcombine.low %v404_v2, %v408_v4  ;;  %v4896_v25 = vcombine.low %v157_v8, %v161_v9 }
  0xf3   :  { %1793 = vmatpush1.bf16.msra.mxu0 %v5076_v10  ;;  %1875 = vmatpush1.bf16.msra.mxu1 %v5078_v11  ;;  %v158_v10 = vld [vmem:[#allocation5 + $0x18] sm:$0xff]  ;;  %v5143_v11 = vcombine.high %v404_v2, %v408_v4  ;;  %v213_v4 = vld [vmem:[#allocation5 + $0x1d0] sm:$0xff] }
  0xf4   :  { %1794 = vmatprep.subr.bf16.mxu0 %v5085_v13  ;;  %1876 = vmatprep.subr.bf16.mxu1 %v5087_v17  ;;  %v153_v13 = vld [vmem:[#allocation2 + $0x10] sm:$0xff]  ;;  %v4897_v17 = vcombine.high %v157_v8, %v161_v9  ;;  %v218_v8 = vld [vmem:[#allocation5 + $0x1f8] sm:$0xff] }
  0xf5   :  { %v6599_v23 = vpack.c.bf16 %v153_v13, %v153_v13  ;;  %v221_v13 = vld [vmem:[#allocation5 + $0x210] sm:$0xff] }
  0xf7   :  { %1795 = vmatpush1.bf16.msra.mxu0 %v5084_v19  ;;  %1877 = vmatpush1.bf16.msra.mxu1 %v5086_v20  ;;  %v169_v19 = vld [vmem:[#allocation5 + $0x70] sm:$0xff]  ;;  %v166_v20 = vld [vmem:[#allocation5 + $0x58] sm:$0xff] }
  0xf8   :  { %1796 = vmatprep.subr.bf16.mxu0 %v5093_v21  ;;  %1878 = vmatprep.subr.bf16.mxu1 %v5095_v26  ;;  %v4899_v21 = vcombine.high %v158_v10, %v162_v14  ;;  %v173_v26 = vld [vmem:[#allocation5 + $0x90] sm:$0xff]  ;;  %v4907_v32 = vcombine.high %v166_v20, %v170_v22  ;;  %v4904_v33 = vcombine.low %v165_v18, %v169_v19 }
  0xf9   :  { %v4913_v35 = vcombine.high %v173_v26, %v177_v27  ;;  %v4912_v41 = vcombine.low %v173_v26, %v177_v27  ;;  %v234_v27 = vld [vmem:[#allocation5 + $0x278] sm:$0xff] }
  0xfb   :  { %1797 = vmatpush1.bf16.msra.mxu0 %v5092_v28  ;;  %1879 = vmatpush1.bf16.msra.mxu1 %v5094_v29  ;;  %v4898_v28 = vcombine.low %v158_v10, %v162_v14  ;;  %v4905_v29 = vcombine.high %v165_v18, %v169_v19  ;;  %v225_v14 = vld [vmem:[#allocation5 + $0x230] sm:$0xff] }
  0xfc   :  { %1798 = vmatprep.subr.bf16.mxu0 %v5101_v30  ;;  %1880 = vmatprep.subr.bf16.mxu1 %v5103_v34  ;;  %v174_v30 = vld [vmem:[#allocation5 + $0x98] sm:$0xff]  ;;  %v4906_v34 = vcombine.low %v166_v20, %v170_v22  ;;  %v4961_v20 = vcombine.high %v221_v13, %v225_v14  ;;  %v233_v22 = vld [vmem:[#allocation5 + $0x270] sm:$0xff] }
  0xff   :  { %1799 = vmatpush1.bf16.msra.mxu0 %v5100_v36  ;;  %1881 = vmatpush1.bf16.msra.mxu1 %v5102_v37  ;;  %v181_v36 = vld [vmem:[#allocation5 + $0xd0] sm:$0xff] }
 0x100   :  { %1800 = vmatprep.subr.bf16.mxu0 %v5109_v38  ;;  %1882 = vmatprep.subr.bf16.mxu1 %v5111_v42  ;;  %v185_v37 = vld [vmem:[#allocation5 + $0xf0] sm:$0xff]  ;;  %v4915_v38 = vcombine.high %v174_v30, %v178_v31  ;;  %v4914_v42 = vcombine.low %v174_v30, %v178_v31 }
 0x101   :  { %v4921_v43 = vcombine.high %v181_v36, %v185_v37  ;;  %v4920_v49 = vcombine.low %v181_v36, %v185_v37  ;;  %v237_v31 = vld [vmem:[#allocation5 + $0x290] sm:$0xff] }
 0x103   :  { %1801 = vmatpush1.bf16.msra.mxu0 %v5108_v44  ;;  %1883 = vmatpush1.bf16.msra.mxu1 %v5110_v45  ;;  %v189_v44 = vld [vmem:[#allocation5 + $0x110] sm:$0xff] }
 0x104   :  { %1802 = vmatprep.subr.bf16.mxu0 %v5117_v46  ;;  %1884 = vmatprep.subr.bf16.mxu1 %v5119_v50  ;;  %v193_v45 = vld [vmem:[#allocation5 + $0x130] sm:$0xff]  ;;  %v190_v46 = vld [vmem:[#allocation5 + $0x118] sm:$0xff]  ;;  %v4922_v50 = vcombine.low %v182_v39, %v186_v40 }
 0x105   :  { %v4929_v51 = vcombine.high %v189_v44, %v193_v45  ;;  %v4928_v56 = vcombine.low %v189_v44, %v193_v45  ;;  %v4930_v58 = vcombine.low %v190_v46, %v194_v48  ;;  %v245_v39 = vld [vmem:[#allocation5 + $0x2d0] sm:$0xff] }
 0x106   :  { %v249_v40 = vld [vmem:[#allocation5 + $0x2f0] sm:$0xff] }
 0x107   :  { %1803 = vmatpush1.bf16.msra.mxu0 %v5116_v52  ;;  %1885 = vmatpush1.bf16.msra.mxu1 %v5118_v53  ;;  %v197_v52 = vld [vmem:[#allocation5 + $0x150] sm:$0xff]  ;;  %v198_v53 = vld [vmem:[#allocation5 + $0x158] sm:$0xff] }
 0x108   :  { %1804 = vmatprep.subr.bf16.mxu0 %v5125_v54  ;;  %1886 = vmatprep.subr.bf16.mxu1 %v5127_v59  ;;  %v4931_v54 = vcombine.high %v190_v46, %v194_v48  ;;  %v4938_v2 = vcombine.low %v198_v53, %v202_v55  ;;  %v4985_v46 = vcombine.high %v245_v39, %v249_v40  ;;  %v257_v48 = vld [vmem:[#allocation5 + $0x330] sm:$0xff] }
 0x10b   :  { %1805 = vmatpush1.bf16.msra.mxu0 %v5124_v61  ;;  %1887 = vmatpush1.bf16.msra.mxu1 %v5126_v62  ;;  %v209_v61 = vld [vmem:[#allocation5 + $0x1b0] sm:$0xff]  ;;  %v206_v62 = vld [vmem:[#allocation5 + $0x198] sm:$0xff] }
 0x10c   :  { %1806 = vmatprep.subr.bf16.mxu0 %v5133_v63  ;;  %1888 = vmatprep.subr.bf16.mxu1 %v5135_v3  ;;  %v4939_v63 = vcombine.high %v198_v53, %v202_v55  ;;  %v4945_v3 = vcombine.high %v205_v60, %v209_v61  ;;  %v4944_v9 = vcombine.low %v205_v60, %v209_v61  ;;  %v265_v55 = vld [vmem:[#allocation5 + $0x370] sm:$0xff] }
 0x10d   :  { %v4946_v10 = vcombine.low %v206_v62, %v210_v0 }
 0x10f   :  { %1807 = vmatpush1.bf16.msra.mxu0 %v5132_v5  ;;  %1889 = vmatpush1.bf16.msra.mxu1 %v5134_v6  ;;  %v217_v5 = vld [vmem:[#allocation5 + $0x1f0] sm:$0xff]  ;;  %v214_v6 = vld [vmem:[#allocation5 + $0x1d8] sm:$0xff] }
 0x110   :  { %1808 = vmatprep.subr.bf16.mxu0 %v5141_v7  ;;  %1890 = vmatprep.subr.bf16.mxu1 %v5143_v11  ;;  %v4947_v7 = vcombine.high %v206_v62, %v210_v0  ;;  %v4953_v11 = vcombine.high %v213_v4, %v217_v5  ;;  %v4952_v18 = vcombine.low %v213_v4, %v217_v5  ;;  %v273_v0 = vld [vmem:[#allocation5 + $0x3b0] sm:$0xff] }
 0x111   :  { %v4954_v19 = vcombine.low %v214_v6, %v218_v8 }
 0x113   :  { %1809 = vmatpush1.bf16.msra.mxu0 %v5140_v15  ;;  %1891 = vmatpush1.bf16.msra.mxu1 %v5142_v16  ;;  %v222_v15 = vld [vmem:[#allocation5 + $0x218] sm:$0xff]  ;;  %v4955_v16 = vcombine.high %v214_v6, %v218_v8  ;;  %v281_v8 = vld [vmem:[#allocation5 + $0x3f0] sm:$0xff] }
 0x114   :  { %1901 = vmatprep.subr.bf16.mxu0 %v4897_v17  ;;  %1983 = vmatprep.subr.bf16.mxu1 %v4899_v21  ;;  %v226_v17 = vld [vmem:[#allocation5 + $0x238] sm:$0xff]  ;;  %v229_v21 = vld [vmem:[#allocation5 + $0x250] sm:$0xff] }
 0x115   :  { %v4963_v26 = vcombine.high %v222_v15, %v226_v17  ;;  %v4969_v30 = vcombine.high %v229_v21, %v233_v22  ;;  %v4968_v36 = vcombine.low %v229_v21, %v233_v22  ;;  %v293_v22 = vld [vmem:[#allocation5 + $0x450] sm:$0xff] }
 0x116   :  { %1811 = vmatmul.mubr.bf16.vlgmr.msra.gmra.mrb[0].mxu0 %v6599_v23  ;;  %1893 = vmatmul.mubr.bf16.vlgmr.msra.gmra.mrb[0].mxu1 %v6599_v23 }
 0x117   :  { %1902 = vmatpush1.bf16.msra.mxu0 %v4896_v25  ;;  %1984 = vmatpush1.bf16.msra.mxu1 %v4898_v28  ;;  %v230_v25 = vld [vmem:[#allocation5 + $0x258] sm:$0xff]  ;;  %v4960_v28 = vcombine.low %v221_v13, %v225_v14  ;;  %v285_v14 = vld [vmem:[#allocation5 + $0x410] sm:$0xff] }
 0x118   :  { %1903 = vmatprep.subr.bf16.mxu0 %v4905_v29  ;;  %1985 = vmatprep.subr.bf16.mxu1 %v4907_v32  ;;  %v4962_v29 = vcombine.low %v222_v15, %v226_v17  ;;  %v241_v32 = vld [vmem:[#allocation5 + $0x2b0] sm:$0xff]  ;;  %v4970_v37 = vcombine.low %v230_v25, %v234_v27 }
 0x119   :  { %1933 = vmatprep.mubr.bf16.mxu0 %v6587_v57  ;;  %2015 = vmatprep.mubr.bf16.mxu1 %v6587_v57  ;;  %v201_v57 = vld [vmem:[#allocation5 + $0x170] sm:$0xff]  ;;  %v4976_v44 = vcombine.low %v237_v31, %v241_v32 }
 0x11a   :  { %v4937_v59 = vcombine.high %v197_v52, %v201_v57  ;;  %v4936_v1 = vcombine.low %v197_v52, %v201_v57  ;;  %v4984_v52 = vcombine.low %v245_v39, %v249_v40  ;;  %v289_v15 = vld [vmem:[#allocation5 + $0x430] sm:$0xff] }
 0x11b   :  { %1904 = vmatpush1.bf16.msra.mxu0 %v4904_v33  ;;  %1986 = vmatpush1.bf16.msra.mxu1 %v4906_v34  ;;  %v238_v33 = vld [vmem:[#allocation5 + $0x298] sm:$0xff]  ;;  %v4971_v34 = vcombine.high %v230_v25, %v234_v27  ;;  %v297_v25 = vld [vmem:[#allocation5 + $0x470] sm:$0xff]  ;;  %v5025_v27 = vcombine.high %v285_v14, %v289_v15 }
 0x11c   :  { %1905 = vmatprep.subr.bf16.mxu0 %v4913_v35  ;;  %1987 = vmatprep.subr.bf16.mxu1 %v4915_v38  ;;  %v242_v35 = vld [vmem:[#allocation5 + $0x2b8] sm:$0xff]  ;;  %v4977_v38 = vcombine.high %v237_v31, %v241_v32  ;;  %v5024_v31 = vcombine.low %v285_v14, %v289_v15  ;;  %v301_v32 = vld [vmem:[#allocation5 + $0x490] sm:$0xff]  ;;  %v5032_v39 = vcombine.low %v293_v22, %v297_v25 }
 0x11d   :  { %v4978_v45 = vcombine.low %v238_v33, %v242_v35  ;;  %v309_v40 = vld [vmem:[#allocation5 + $0x4d0] sm:$0xff] }
 0x11f   :  { %1906 = vmatpush1.bf16.msra.mxu0 %v4912_v41  ;;  %1988 = vmatpush1.bf16.msra.mxu1 %v4914_v42  ;;  %v246_v41 = vld [vmem:[#allocation5 + $0x2d8] sm:$0xff]  ;;  %v4979_v42 = vcombine.high %v238_v33, %v242_v35  ;;  %v305_v33 = vld [vmem:[#allocation5 + $0x4b0] sm:$0xff]  ;;  %v5033_v35 = vcombine.high %v293_v22, %v297_v25 }
 0x120   :  { %1907 = vmatprep.subr.bf16.mxu0 %v4921_v43  ;;  %1989 = vmatprep.subr.bf16.mxu1 %v4923_v47  ;;  %v250_v43 = vld [vmem:[#allocation5 + $0x2f8] sm:$0xff]  ;;  %v253_v47 = vld [vmem:[#allocation5 + $0x310] sm:$0xff] }
 0x121   :  { %v4986_v57 = vcombine.low %v246_v41, %v250_v43  ;;  %v4993_v53 = vcombine.high %v253_v47, %v257_v48  ;;  %v4992_v60 = vcombine.low %v253_v47, %v257_v48  ;;  %v5040_v47 = vcombine.low %v301_v32, %v305_v33  ;;  %v317_v48 = vld [vmem:[#allocation5 + $0x510] sm:$0xff] }
 0x123   :  { %1908 = vmatpush1.bf16.msra.mxu0 %v4920_v49  ;;  %1990 = vmatpush1.bf16.msra.mxu1 %v4922_v50  ;;  %v254_v49 = vld [vmem:[#allocation5 + $0x318] sm:$0xff]  ;;  %v4987_v50 = vcombine.high %v246_v41, %v250_v43  ;;  %v313_v41 = vld [vmem:[#allocation5 + $0x4f0] sm:$0xff]  ;;  %v5041_v43 = vcombine.high %v301_v32, %v305_v33 }
 0x124   :  { %1909 = vmatprep.subr.bf16.mxu0 %v4929_v51  ;;  %1991 = vmatprep.subr.bf16.mxu1 %v4931_v54  ;;  %v258_v51 = vld [vmem:[#allocation5 + $0x338] sm:$0xff]  ;;  %v261_v54 = vld [vmem:[#allocation5 + $0x350] sm:$0xff] }
 0x125   :  { %v4994_v61 = vcombine.low %v254_v49, %v258_v51  ;;  %v5001_v62 = vcombine.high %v261_v54, %v265_v55  ;;  %v5000_v4 = vcombine.low %v261_v54, %v265_v55  ;;  %v325_v54 = vld [vmem:[#allocation5 + $0x550] sm:$0xff] }
 0x126   :  { %v329_v55 = vld [vmem:[#allocation5 + $0x570] sm:$0xff] }
 0x127   :  { %1910 = vmatpush1.bf16.msra.mxu0 %v4928_v56  ;;  %1992 = vmatpush1.bf16.msra.mxu1 %v4930_v58  ;;  %v262_v56 = vld [vmem:[#allocation5 + $0x358] sm:$0xff]  ;;  %v4995_v58 = vcombine.high %v254_v49, %v258_v51  ;;  %v321_v49 = vld [vmem:[#allocation5 + $0x530] sm:$0xff] }
 0x128   :  { %1911 = vmatprep.subr.bf16.mxu0 %v4937_v59  ;;  %1993 = vmatprep.subr.bf16.mxu1 %v4939_v63  ;;  %v266_v59 = vld [vmem:[#allocation5 + $0x378] sm:$0xff]  ;;  %v269_v63 = vld [vmem:[#allocation5 + $0x390] sm:$0xff] }
 0x129   :  { %v5002_v5 = vcombine.low %v262_v56, %v266_v59  ;;  %v5009_v6 = vcombine.high %v269_v63, %v273_v0  ;;  %v5008_v13 = vcombine.low %v269_v63, %v273_v0  ;;  %v318_v51 = vld [vmem:[#allocation5 + $0x518] sm:$0xff]  ;;  %v337_v63 = vld [vmem:[#allocation5 + $0x5b0] sm:$0xff] }
 0x12b   :  { %1912 = vmatpush1.bf16.msra.mxu0 %v4936_v1  ;;  %1994 = vmatpush1.bf16.msra.mxu1 %v4938_v2  ;;  %v270_v1 = vld [vmem:[#allocation5 + $0x398] sm:$0xff]  ;;  %v5003_v2 = vcombine.high %v262_v56, %v266_v59 }
 0x12c   :  { %1913 = vmatprep.subr.bf16.mxu0 %v4945_v3  ;;  %1995 = vmatprep.subr.bf16.mxu1 %v4947_v7  ;;  %v274_v3 = vld [vmem:[#allocation5 + $0x3b8] sm:$0xff]  ;;  %v277_v7 = vld [vmem:[#allocation5 + $0x3d0] sm:$0xff] }
 0x12d   :  { %v5017_v17 = vcombine.high %v277_v7, %v281_v8  ;;  %v5016_v21 = vcombine.low %v277_v7, %v281_v8  ;;  %v330_v59 = vld [vmem:[#allocation5 + $0x578] sm:$0xff]  ;;  %v341_v8 = vld [vmem:[#allocation5 + $0x5d0] sm:$0xff] }
 0x12f   :  { %1914 = vmatpush1.bf16.msra.mxu0 %v4944_v9  ;;  %1996 = vmatpush1.bf16.msra.mxu1 %v4946_v10  ;;  %v278_v9 = vld [vmem:[#allocation5 + $0x3d8] sm:$0xff]  ;;  %v5011_v10 = vcombine.high %v270_v1, %v274_v3 }
 0x130   :  { %1915 = vmatprep.subr.bf16.mxu0 %v4953_v11  ;;  %1997 = vmatprep.subr.bf16.mxu1 %v4955_v16  ;;  %v282_v11 = vld [vmem:[#allocation5 + $0x3f8] sm:$0xff]  ;;  %v5010_v16 = vcombine.low %v270_v1, %v274_v3  ;;  %v5065_v1 = vcombine.high %v325_v54, %v329_v55 }
 0x131   :  { %v338_v3 = vld [vmem:[#allocation5 + $0x5b8] sm:$0xff] }
 0x133   :  { %1916 = vmatpush1.bf16.msra.mxu0 %v4952_v18  ;;  %1998 = vmatpush1.bf16.msra.mxu1 %v4954_v19  ;;  %v286_v18 = vld [vmem:[#allocation5 + $0x418] sm:$0xff] }
 0x134   :  { %1917 = vmatprep.subr.bf16.mxu0 %v4961_v20  ;;  %1999 = vmatprep.subr.bf16.mxu1 %v4963_v26  ;;  %v290_v19 = vld [vmem:[#allocation5 + $0x438] sm:$0xff]  ;;  %v5019_v20 = vcombine.high %v278_v9, %v282_v11  ;;  %v5018_v26 = vcombine.low %v278_v9, %v282_v11  ;;  %v345_v9 = vld [vmem:[#allocation5 + $0x5f0] sm:$0xff] }
 0x135   :  { %v342_v11 = vld [vmem:[#allocation5 + $0x5d8] sm:$0xff]  ;;  %v5080_v22 = vcombine.low %v341_v8, %v345_v9 }
 0x137   :  { %1918 = vmatpush1.bf16.msra.mxu0 %v4960_v28  ;;  %2000 = vmatpush1.bf16.msra.mxu1 %v4962_v29  ;;  %v294_v28 = vld [vmem:[#allocation5 + $0x458] sm:$0xff] }
 0x138   :  { %1919 = vmatprep.subr.bf16.mxu0 %v4969_v30  ;;  %2001 = vmatprep.subr.bf16.mxu1 %v4971_v34  ;;  %v298_v29 = vld [vmem:[#allocation5 + $0x478] sm:$0xff]  ;;  %v5027_v30 = vcombine.high %v286_v18, %v290_v19  ;;  %v5026_v34 = vcombine.low %v286_v18, %v290_v19  ;;  %v353_v18 = vld [vmem:[#allocation5 + $0x630] sm:$0xff] }
 0x13b   :  { %1920 = vmatpush1.bf16.msra.mxu0 %v4968_v36  ;;  %2002 = vmatpush1.bf16.msra.mxu1 %v4970_v37  ;;  %v302_v36 = vld [vmem:[#allocation5 + $0x498] sm:$0xff] }
 0x13c   :  { %1921 = vmatprep.subr.bf16.mxu0 %v4977_v38  ;;  %2003 = vmatprep.subr.bf16.mxu1 %v4979_v42  ;;  %v306_v37 = vld [vmem:[#allocation5 + $0x4b8] sm:$0xff]  ;;  %v5035_v38 = vcombine.high %v294_v28, %v298_v29  ;;  %v5034_v42 = vcombine.low %v294_v28, %v298_v29  ;;  %v361_v28 = vld [vmem:[#allocation5 + $0x670] sm:$0xff] }
 0x13f   :  { %1922 = vmatpush1.bf16.msra.mxu0 %v4976_v44  ;;  %2004 = vmatpush1.bf16.msra.mxu1 %v4978_v45  ;;  %v310_v44 = vld [vmem:[#allocation5 + $0x4d8] sm:$0xff] }
 0x140   :  { %1923 = vmatprep.subr.bf16.mxu0 %v4985_v46  ;;  %2005 = vmatprep.subr.bf16.mxu1 %v4987_v50  ;;  %v314_v45 = vld [vmem:[#allocation5 + $0x4f8] sm:$0xff]  ;;  %v5043_v46 = vcombine.high %v302_v36, %v306_v37  ;;  %v5049_v50 = vcombine.high %v309_v40, %v313_v41 }
 0x141   :  { %v5050_v56 = vcombine.low %v310_v44, %v314_v45 }
 0x143   :  { %1924 = vmatpush1.bf16.msra.mxu0 %v4984_v52  ;;  %2006 = vmatpush1.bf16.msra.mxu1 %v4986_v57  ;;  %v322_v52 = vld [vmem:[#allocation5 + $0x538] sm:$0xff]  ;;  %v5051_v57 = vcombine.high %v310_v44, %v314_v45 }
 0x144   :  { %1925 = vmatprep.subr.bf16.mxu0 %v4993_v53  ;;  %2007 = vmatprep.subr.bf16.mxu1 %v4995_v58  ;;  %v5048_v53 = vcombine.low %v309_v40, %v313_v41  ;;  %v326_v58 = vld [vmem:[#allocation5 + $0x558] sm:$0xff]  ;;  %v5058_v0 = vcombine.low %v318_v51, %v322_v52  ;;  %v373_v41 = vld [vmem:[#allocation5 + $0x6d0] sm:$0xff] }
 0x145   :  { %v374_v45 = vld [vmem:[#allocation5 + $0x6d8] sm:$0xff] }
 0x147   :  { %1926 = vmatpush1.bf16.msra.mxu0 %v4992_v60  ;;  %2008 = vmatpush1.bf16.msra.mxu1 %v4994_v61  ;;  %v5059_v60 = vcombine.high %v318_v51, %v322_v52  ;;  %v5056_v61 = vcombine.low %v317_v48, %v321_v49  ;;  %v382_v52 = vld [vmem:[#allocation5 + $0x718] sm:$0xff] }
 0x148   :  { %1927 = vmatprep.subr.bf16.mxu0 %v5001_v62  ;;  %2009 = vmatprep.subr.bf16.mxu1 %v5003_v2  ;;  %v333_v62 = vld [vmem:[#allocation5 + $0x590] sm:$0xff]  ;;  %v334_v2 = vld [vmem:[#allocation5 + $0x598] sm:$0xff] }
 0x149   :  { %v5073_v7 = vcombine.high %v333_v62, %v337_v63  ;;  %v5072_v14 = vcombine.low %v333_v62, %v337_v63  ;;  %v5074_v15 = vcombine.low %v334_v2, %v338_v3  ;;  %v397_v63 = vld [vmem:[#allocation5 + $0x790] sm:$0xff] }
 0x14b   :  { %1928 = vmatpush1.bf16.msra.mxu0 %v5000_v4  ;;  %2010 = vmatpush1.bf16.msra.mxu1 %v5002_v5  ;;  %v5067_v4 = vcombine.high %v326_v58, %v330_v59  ;;  %v5064_v5 = vcombine.low %v325_v54, %v329_v55  ;;  %v389_v55 = vld [vmem:[#allocation5 + $0x750] sm:$0xff] }
 0x14c   :  { %1929 = vmatprep.subr.bf16.mxu0 %v5009_v6  ;;  %2011 = vmatprep.subr.bf16.mxu1 %v5011_v10  ;;  %v5066_v6 = vcombine.low %v326_v58, %v330_v59  ;;  %v5075_v10 = vcombine.high %v334_v2, %v338_v3  ;;  %v390_v59 = vld [vmem:[#allocation5 + $0x758] sm:$0xff] }
 0x14d   :  { %v398_v3 = vld [vmem:[#allocation5 + $0x798] sm:$0xff] }
 0x14f   :  { %1930 = vmatpush1.bf16.msra.mxu0 %v5008_v13  ;;  %2012 = vmatpush1.bf16.msra.mxu1 %v5010_v16  ;;  %v346_v13 = vld [vmem:[#allocation5 + $0x5f8] sm:$0xff]  ;;  %v5081_v16 = vcombine.high %v341_v8, %v345_v9 }
 0x150   :  { %1931 = vmatprep.subr.bf16.mxu0 %v5017_v17  ;;  %2013 = vmatprep.subr.bf16.mxu1 %v5019_v20  ;;  %v349_v17 = vld [vmem:[#allocation5 + $0x610] sm:$0xff]  ;;  %v5083_v19 = vcombine.high %v342_v11, %v346_v13  ;;  %v350_v20 = vld [vmem:[#allocation5 + $0x618] sm:$0xff]  ;;  %v5082_v25 = vcombine.low %v342_v11, %v346_v13 }
 0x151   :  { %v5088_v32 = vcombine.low %v349_v17, %v353_v18  ;;  %v409_v11 = vld [vmem:[#allocation5 + $0x7f0] sm:$0xff]  ;;  %v406_v13 = vld [vmem:[#allocation5 + $0x7d8] sm:$0xff] }
 0x153   :  { %1932 = vmatpush1.bf16.msra.mxu0 %v5016_v21  ;;  %2014 = vmatpush1.bf16.msra.mxu1 %v5018_v26  ;;  %v354_v21 = vld [vmem:[#allocation5 + $0x638] sm:$0xff]  ;;  %v5089_v26 = vcombine.high %v349_v17, %v353_v18 }
 0x154   :  { %1942 = vmatprep.subr.bf16.mxu0 %v5025_v27  ;;  %2024 = vmatprep.subr.bf16.mxu1 %v5027_v30  ;;  %v357_v27 = vld [vmem:[#allocation5 + $0x650] sm:$0xff]  ;;  %v5091_v29 = vcombine.high %v350_v20, %v354_v21  ;;  %v358_v30 = vld [vmem:[#allocation5 + $0x658] sm:$0xff]  ;;  %v5090_v33 = vcombine.low %v350_v20, %v354_v21 }
 0x155   :  { %v5096_v40 = vcombine.low %v357_v27, %v361_v28  ;;  %v5662_v21 = vld [vmem:[#allocation8 + $0x4] ss:$16 sps:$4 sm:$0xff]  }
 0x156   :  { %1934 = vmatmul.mubr.bf16.vlgmr.msra.gmra.mrb[4].mxu0 %v6591_v12  ;;  %2016 = vmatmul.mubr.bf16.vlgmr.msra.gmra.mrb[4].mxu1 %v6591_v12  ;;  %v5042_v12 = vcombine.low %v302_v36, %v306_v37  ;;  %v369_v36 = vld [vmem:[#allocation5 + $0x6b0] sm:$0xff]  ;;  %v366_v37 = vld [vmem:[#allocation5 + $0x698] sm:$0xff] }
 0x157   :  { %1943 = vmatpush1.bf16.msra.mxu0 %v5024_v31  ;;  %2025 = vmatpush1.bf16.msra.mxu1 %v5026_v34  ;;  %v362_v31 = vld [vmem:[#allocation5 + $0x678] sm:$0xff]  ;;  %v5097_v34 = vcombine.high %v357_v27, %v361_v28  ;;  %v5671_v28 = vld [vmem:[#allocation8 + $0x2c] ss:$16 sps:$4 sm:$0xff]  }
 0x158   :  { %1944 = vmatprep.subr.bf16.mxu0 %v5033_v35  ;;  %2026 = vmatprep.subr.bf16.mxu1 %v5035_v38  ;;  %v365_v35 = vld [vmem:[#allocation5 + $0x690] sm:$0xff]  ;;  %v5099_v38 = vcombine.high %v358_v30, %v362_v31  ;;  %v5668_v27 = vld [vmem:[#allocation8 + $0x24] ss:$16 sps:$4 sm:$0xff]  }
 0x159   :  { %1974 = vmatprep.mubr.bf16.mxu0 %v6593_v24  ;;  %2056 = vmatprep.mubr.bf16.mxu1 %v6593_v24  ;;  %v5057_v24 = vcombine.high %v317_v48, %v321_v49  ;;  %v5105_v44 = vcombine.high %v365_v35, %v369_v36  ;;  %v5104_v48 = vcombine.low %v365_v35, %v369_v36  ;;  %v381_v49 = vld [vmem:[#allocation5 + $0x710] sm:$0xff]  ;;  %v5680_v35 = vld [vmem:[#allocation8 + $0x64] ss:$16 sps:$4 sm:$0xff]  }
 0x15a   :  { %v5683_v36 = vld [vmem:[#allocation8 + $0x6c] ss:$16 sps:$4 sm:$0xff]  }
 0x15b   :  { %1945 = vmatpush1.bf16.msra.mxu0 %v5032_v39  ;;  %2027 = vmatpush1.bf16.msra.mxu1 %v5034_v42  ;;  %v370_v39 = vld [vmem:[#allocation5 + $0x6b8] sm:$0xff]  ;;  %v377_v42 = vld [vmem:[#allocation5 + $0x6f0] sm:$0xff] }
 0x15c   :  { %1946 = vmatprep.subr.bf16.mxu0 %v5041_v43  ;;  %2028 = vmatprep.subr.bf16.mxu1 %v5043_v46  ;;  %v5098_v43 = vcombine.low %v358_v30, %v362_v31  ;;  %v378_v46 = vld [vmem:[#allocation5 + $0x6f8] sm:$0xff]  ;;  %v5113_v51 = vcombine.high %v373_v41, %v377_v42  ;;  %v5112_v54 = vcombine.low %v373_v41, %v377_v42  ;;  %v5669_v30 = vld [vmem:[#allocation8 + $0x28] ss:$16 sps:$4 sm:$0xff]  }
 0x15d   :  { %v5674_v31 = vld [vmem:[#allocation8 + $0x44] ss:$16 sps:$4 sm:$0xff]   ;;  %v5687_v41 = vld [vmem:[#allocation8 + $0x88] ss:$16 sps:$4 sm:$0xff]  }
 0x15e   :  { %v5692_v42 = vld [vmem:[#allocation8 + $0xa4] ss:$16 sps:$4 sm:$0xff]  }
 0x15f   :  { %1947 = vmatpush1.bf16.msra.mxu0 %v5040_v47  ;;  %2029 = vmatpush1.bf16.msra.mxu1 %v5042_v12  ;;  %v5107_v47 = vcombine.high %v366_v37, %v370_v39  ;;  %v385_v12 = vld [vmem:[#allocation5 + $0x730] sm:$0xff] }
 0x160   :  { %1948 = vmatprep.subr.bf16.mxu0 %v5049_v50  ;;  %2030 = vmatprep.subr.bf16.mxu1 %v5051_v57  ;;  %v5106_v50 = vcombine.low %v366_v37, %v370_v39  ;;  %v386_v57 = vld [vmem:[#allocation5 + $0x738] sm:$0xff]  ;;  %v5121_v58 = vcombine.high %v381_v49, %v385_v12  ;;  %v5120_v62 = vcombine.low %v381_v49, %v385_v12  ;;  %v5689_v39 = vld [vmem:[#allocation8 + $0x8c] ss:$16 sps:$4 sm:$0xff]   ;;  %v5699_v49 = vld [vmem:[#allocation8 + $0xc8] ss:$16 sps:$4 sm:$0xff]  }
 0x161   :  { %v5678_v37 = vld [vmem:[#allocation8 + $0x60] ss:$16 sps:$4 sm:$0xff]   ;;  %v5704_v12 = vld [vmem:[#allocation8 + $0xe4] ss:$16 sps:$4 sm:$0xff]  }
 0x163   :  { %1949 = vmatpush1.bf16.msra.mxu0 %v5048_v53  ;;  %2031 = vmatpush1.bf16.msra.mxu1 %v5050_v56  ;;  %v5115_v53 = vcombine.high %v374_v45, %v378_v46  ;;  %v393_v56 = vld [vmem:[#allocation5 + $0x770] sm:$0xff] }
 0x164   :  { %1950 = vmatprep.subr.bf16.mxu0 %v5057_v24  ;;  %2032 = vmatprep.subr.bf16.mxu1 %v5059_v60  ;;  %v5114_v24 = vcombine.low %v374_v45, %v378_v46  ;;  %v394_v60 = vld [vmem:[#allocation5 + $0x778] sm:$0xff]  ;;  %v5129_v2 = vcombine.high %v389_v55, %v393_v56  ;;  %v5693_v45 = vld [vmem:[#allocation8 + $0xa8] ss:$16 sps:$4 sm:$0xff]  }
 0x165   :  { %v5698_v46 = vld [vmem:[#allocation8 + $0xc4] ss:$16 sps:$4 sm:$0xff]  }
 0x167   :  { %1951 = vmatpush1.bf16.msra.mxu0 %v5056_v61  ;;  %2033 = vmatpush1.bf16.msra.mxu1 %v5058_v0  ;;  %v5123_v61 = vcombine.high %v382_v52, %v386_v57  ;;  %v401_v0 = vld [vmem:[#allocation5 + $0x7b0] sm:$0xff] }
 0x168   :  { %1952 = vmatprep.subr.bf16.mxu0 %v5065_v1  ;;  %2034 = vmatprep.subr.bf16.mxu1 %v5067_v4  ;;  %v5122_v1 = vcombine.low %v382_v52, %v386_v57  ;;  %v402_v4 = vld [vmem:[#allocation5 + $0x7b8] sm:$0xff]  ;;  %v5137_v8 = vcombine.high %v397_v63, %v401_v0  ;;  %v5705_v52 = vld [vmem:[#allocation8 + $0xe8] ss:$16 sps:$4 sm:$0xff]  }
 0x169   :  { %v5139_v9 = vcombine.high %v398_v3, %v402_v4  ;;  %v5710_v57 = vld [vmem:[#allocation8 + $0x104] ss:$16 sps:$4 sm:$0xff]  }
 0x16b   :  { %1953 = vmatpush1.bf16.msra.mxu0 %v5064_v5  ;;  %2035 = vmatpush1.bf16.msra.mxu1 %v5066_v6  ;;  %v5131_v5 = vcombine.high %v390_v59, %v394_v60  ;;  %v5128_v6 = vcombine.low %v389_v55, %v393_v56  ;;  %v5711_v55 = vld [vmem:[#allocation8 + $0x108] ss:$16 sps:$4 sm:$0xff]   ;;  %v5716_v56 = vld [vmem:[#allocation8 + $0x124] ss:$16 sps:$4 sm:$0xff]  }
 0x16c   :  { %1954 = vmatprep.subr.bf16.mxu0 %v5073_v7  ;;  %2036 = vmatprep.subr.bf16.mxu1 %v5075_v10  ;;  %v5130_v7 = vcombine.low %v390_v59, %v394_v60  ;;  %v405_v10 = vld [vmem:[#allocation5 + $0x7d0] sm:$0xff]  ;;  %v5722_v60 = vld [vmem:[#allocation8 + $0x144] ss:$16 sps:$4 sm:$0xff]  }
 0x16d   :  { %v5145_v17 = vcombine.high %v405_v10, %v409_v11  ;;  %v5717_v59 = vld [vmem:[#allocation8 + $0x128] ss:$16 sps:$4 sm:$0xff]  }
 0x16f   :  { %1955 = vmatpush1.bf16.msra.mxu0 %v5072_v14  ;;  %2037 = vmatpush1.bf16.msra.mxu1 %v5074_v15  ;;  %v410_v14 = vld [vmem:[#allocation5 + $0x7f8] sm:$0xff]  ;;  %v5136_v15 = vcombine.low %v397_v63, %v401_v0  ;;  %v5723_v63 = vld [vmem:[#allocation8 + $0x148] ss:$16 sps:$4 sm:$0xff]  }
 0x170   :  { %1956 = vmatprep.subr.bf16.mxu0 %v5081_v16  ;;  %2038 = vmatprep.subr.bf16.mxu1 %v5083_v19  ;;  %v5138_v16 = vcombine.low %v398_v3, %v402_v4  ;;  %v5147_v18 = vcombine.high %v406_v13, %v410_v14  ;;  %v5144_v19 = vcombine.low %v405_v10, %v409_v11  ;;  %v5728_v0 = vld [vmem:[#allocation8 + $0x164] ss:$16 sps:$4 sm:$0xff]   ;;  %v5729_v3 = vld [vmem:[#allocation8 + $0x168] ss:$16 sps:$4 sm:$0xff]   ;;  %v5738_v10 = vld [vmem:[#allocation8 + $0x1a0] ss:$16 sps:$4 sm:$0xff]  }
 0x171   :  { %v5146_v20 = vcombine.low %v406_v13, %v410_v14  ;;  %v5734_v4 = vld [vmem:[#allocation8 + $0x184] ss:$16 sps:$4 sm:$0xff]   ;;  %v5741_v11 = vld [vmem:[#allocation8 + $0x1a8] ss:$16 sps:$4 sm:$0xff]   ;;  %v5749_v14 = vld [vmem:[#allocation8 + $0x1cc] ss:$16 sps:$4 sm:$0xff]  }
 0x172   :  { %v5746_v13 = vld [vmem:[#allocation8 + $0x1c4] ss:$16 sps:$4 sm:$0xff]  }
 0x173   :  { %1957 = vmatpush1.bf16.msra.mxu0 %v5080_v22  ;;  %2039 = vmatpush1.bf16.msra.mxu1 %v5082_v25  ;;  %v5665_v22 = vld [vmem:[#allocation8 + $0xc] ss:$16 sps:$4 sm:$0xff]   ;;  %v5660_v25 = vld [vmem:[#allocation8] ss:$16 sps:$4 sm:$0xff]  }
 0x174   :  { %1958 = vmatprep.subr.bf16.mxu0 %v5089_v26  ;;  %2040 = vmatprep.subr.bf16.mxu1 %v5091_v29  ;;  %v5663_v26 = vld [vmem:[#allocation8 + $0x8] ss:$16 sps:$4 sm:$0xff]   ;;  %v5666_v29 = vld [vmem:[#allocation8 + $0x20] ss:$16 sps:$4 sm:$0xff]  }
 0x177   :  { %1959 = vmatpush1.bf16.msra.mxu0 %v5088_v32  ;;  %2041 = vmatpush1.bf16.msra.mxu1 %v5090_v33  ;;  %v5677_v32 = vld [vmem:[#allocation8 + $0x4c] ss:$16 sps:$4 sm:$0xff]   ;;  %v5672_v33 = vld [vmem:[#allocation8 + $0x40] ss:$16 sps:$4 sm:$0xff]  }
 0x178   :  { %1960 = vmatprep.subr.bf16.mxu0 %v5097_v34  ;;  %2042 = vmatprep.subr.bf16.mxu1 %v5099_v38  ;;  %v5675_v34 = vld [vmem:[#allocation8 + $0x48] ss:$16 sps:$4 sm:$0xff]   ;;  %v5686_v38 = vld [vmem:[#allocation8 + $0x84] ss:$16 sps:$4 sm:$0xff]  }
 0x17b   :  { %1961 = vmatpush1.bf16.msra.mxu0 %v5096_v40  ;;  %2043 = vmatpush1.bf16.msra.mxu1 %v5098_v43  ;;  %v5684_v40 = vld [vmem:[#allocation8 + $0x80] ss:$16 sps:$4 sm:$0xff]   ;;  %v5695_v43 = vld [vmem:[#allocation8 + $0xac] ss:$16 sps:$4 sm:$0xff]  }
 0x17c   :  { %1962 = vmatprep.subr.bf16.mxu0 %v5105_v44  ;;  %2044 = vmatprep.subr.bf16.mxu1 %v5107_v47  ;;  %v5690_v44 = vld [vmem:[#allocation8 + $0xa0] ss:$16 sps:$4 sm:$0xff]   ;;  %v5701_v47 = vld [vmem:[#allocation8 + $0xcc] ss:$16 sps:$4 sm:$0xff]  }
 0x17f   :  { %1963 = vmatpush1.bf16.msra.mxu0 %v5104_v48  ;;  %2045 = vmatpush1.bf16.msra.mxu1 %v5106_v50  ;;  %v5696_v48 = vld [vmem:[#allocation8 + $0xc0] ss:$16 sps:$4 sm:$0xff]   ;;  %v5707_v50 = vld [vmem:[#allocation8 + $0xec] ss:$16 sps:$4 sm:$0xff]  }
 0x180   :  { %1964 = vmatprep.subr.bf16.mxu0 %v5113_v51  ;;  %2046 = vmatprep.subr.bf16.mxu1 %v5115_v53  ;;  %v5702_v51 = vld [vmem:[#allocation8 + $0xe0] ss:$16 sps:$4 sm:$0xff]   ;;  %v5713_v53 = vld [vmem:[#allocation8 + $0x10c] ss:$16 sps:$4 sm:$0xff]  }
 0x183   :  { %1965 = vmatpush1.bf16.msra.mxu0 %v5112_v54  ;;  %2047 = vmatpush1.bf16.msra.mxu1 %v5114_v24  ;;  %v5708_v54 = vld [vmem:[#allocation8 + $0x100] ss:$16 sps:$4 sm:$0xff]   ;;  %v5719_v24 = vld [vmem:[#allocation8 + $0x12c] ss:$16 sps:$4 sm:$0xff]  }
 0x184   :  { %1966 = vmatprep.subr.bf16.mxu0 %v5121_v58  ;;  %2048 = vmatprep.subr.bf16.mxu1 %v5123_v61  ;;  %v5714_v58 = vld [vmem:[#allocation8 + $0x120] ss:$16 sps:$4 sm:$0xff]   ;;  %v5725_v61 = vld [vmem:[#allocation8 + $0x14c] ss:$16 sps:$4 sm:$0xff]  }
 0x187   :  { %1967 = vmatpush1.bf16.msra.mxu0 %v5120_v62  ;;  %2049 = vmatpush1.bf16.msra.mxu1 %v5122_v1  ;;  %v5720_v62 = vld [vmem:[#allocation8 + $0x140] ss:$16 sps:$4 sm:$0xff]   ;;  %v5731_v1 = vld [vmem:[#allocation8 + $0x16c] ss:$16 sps:$4 sm:$0xff]  }
 0x188   :  { %1968 = vmatprep.subr.bf16.mxu0 %v5129_v2  ;;  %2050 = vmatprep.subr.bf16.mxu1 %v5131_v5  ;;  %v5726_v2 = vld [vmem:[#allocation8 + $0x160] ss:$16 sps:$4 sm:$0xff]   ;;  %v5737_v5 = vld [vmem:[#allocation8 + $0x18c] ss:$16 sps:$4 sm:$0xff]  }
 0x18b   :  { %1969 = vmatpush1.bf16.msra.mxu0 %v5128_v6  ;;  %2051 = vmatpush1.bf16.msra.mxu1 %v5130_v7  ;;  %v5732_v6 = vld [vmem:[#allocation8 + $0x180] ss:$16 sps:$4 sm:$0xff]   ;;  %v5735_v7 = vld [vmem:[#allocation8 + $0x188] ss:$16 sps:$4 sm:$0xff]  }
 0x18c   :  { %1970 = vmatprep.subr.bf16.mxu0 %v5137_v8  ;;  %2052 = vmatprep.subr.bf16.mxu1 %v5139_v9  ;;  %v5740_v8 = vld [vmem:[#allocation8 + $0x1a4] ss:$16 sps:$4 sm:$0xff]   ;;  %v5743_v9 = vld [vmem:[#allocation8 + $0x1ac] ss:$16 sps:$4 sm:$0xff]  }
 0x18f   :  { %1971 = vmatpush1.bf16.msra.mxu0 %v5136_v15  ;;  %2053 = vmatpush1.bf16.msra.mxu1 %v5138_v16  ;;  %v5744_v15 = vld [vmem:[#allocation8 + $0x1c0] ss:$16 sps:$4 sm:$0xff]   ;;  %v5747_v16 = vld [vmem:[#allocation8 + $0x1c8] ss:$16 sps:$4 sm:$0xff]  }
 0x190   :  { %1972 = vmatprep.subr.bf16.mxu0 %v5145_v17  ;;  %2054 = vmatprep.subr.bf16.mxu1 %v5147_v18  ;;  %v5752_v17 = vld [vmem:[#allocation8 + $0x1e4] ss:$16 sps:$4 sm:$0xff]   ;;  %v5755_v18 = vld [vmem:[#allocation8 + $0x1ec] ss:$16 sps:$4 sm:$0xff]  }
 0x193   :  { %1973 = vmatpush1.bf16.msra.mxu0 %v5144_v19  ;;  %2055 = vmatpush1.bf16.msra.mxu1 %v5146_v20  ;;  %v5750_v19 = vld [vmem:[#allocation8 + $0x1e0] ss:$16 sps:$4 sm:$0xff]   ;;  %v5753_v20 = vld [vmem:[#allocation8 + $0x1e8] ss:$16 sps:$4 sm:$0xff]  }
 0x194   :  { %3639 = vmatprep.subr.bf16.mxu0 %v5662_v21  ;;  %3803 = vmatprep.subr.bf16.mxu1 %v5665_v22  ;;  %v5758_v21 = vld [vmem:[#allocation8 + $0x204] ss:$16 sps:$4 sm:$0xff]   ;;  %v5761_v22 = vld [vmem:[#allocation8 + $0x20c] ss:$16 sps:$4 sm:$0xff]  }
 0x196   :  { %1975 = vmatmul.mubr.bf16.vlgmr.msra.gmra.mrb[4].mxu0 %v6599_v23  ;;  %2057 = vmatmul.mubr.bf16.vlgmr.msra.gmra.mrb[4].mxu1 %v6599_v23  ;;  %v5681_v23 = vld [vmem:[#allocation8 + $0x68] ss:$16 sps:$4 sm:$0xff]  }
 0x197   :  { %3640 = vmatpush1.bf16.msra.mxu0 %v5660_v25  ;;  %3804 = vmatpush1.bf16.msra.mxu1 %v5663_v26  ;;  %v417_v25 = vlaneseq }
 0x198   :  { %3641 = vmatprep.subr.bf16.mxu0 %v5668_v27  ;;  %3805 = vmatprep.subr.bf16.mxu1 %v5671_v28  ;;  %v6617_v28 = vld [vmem:[#allocation7] sm:$0xff] }
 0x199   :  { %v6612_v26 = vshrl.u32 %v417_v25, 7 }
 0x19b   :  { %3642 = vmatpush1.bf16.msra.mxu0 %v5666_v29  ;;  %3806 = vmatpush1.bf16.msra.mxu1 %v5669_v30  ;;  %v6615_v27 = vsub.s32 0, %v6612_v26  ;;  %v6620_v29 = vsub.s32 1, %v6612_v26  ;;  %v431_v30 = vsub.s32 3, %v6612_v26 }
 0x19c   :  { %3643 = vmatprep.subr.bf16.mxu0 %v5674_v31  ;;  %3807 = vmatprep.subr.bf16.mxu1 %v5677_v32 }
 0x19d   :  { %v420_v31 = vrot.slane %v6617_v28, %v6615_v27  ;;  %v424_v32 = vrot.slane %v6617_v28, %v6620_v29 }
 0x19f   :  { %3644 = vmatpush1.bf16.msra.mxu0 %v5672_v33  ;;  %3808 = vmatpush1.bf16.msra.mxu1 %v5675_v34  ;;  %v432_v33 = vrot.slane %v6617_v28, %v431_v30 }
 0x1a0   :  { %3645 = vmatprep.subr.bf16.mxu0 %v5680_v35  ;;  %3809 = vmatprep.subr.bf16.mxu1 %v5683_v36 }
 0x1a3   :  { %3646 = vmatpush1.bf16.msra.mxu0 %v5678_v37  ;;  %3810 = vmatpush1.bf16.msra.mxu1 %v5681_v23 }
 0x1a4   :  { %3647 = vmatprep.subr.bf16.mxu0 %v5686_v38  ;;  %3811 = vmatprep.subr.bf16.mxu1 %v5689_v39 }
 0x1a7   :  { %3648 = vmatpush1.bf16.msra.mxu0 %v5684_v40  ;;  %3812 = vmatpush1.bf16.msra.mxu1 %v5687_v41 }
 0x1a8   :  { %3649 = vmatprep.subr.bf16.mxu0 %v5692_v42  ;;  %3813 = vmatprep.subr.bf16.mxu1 %v5695_v43 }
 0x1ab   :  { %3650 = vmatpush1.bf16.msra.mxu0 %v5690_v44  ;;  %3814 = vmatpush1.bf16.msra.mxu1 %v5693_v45 }
 0x1ac   :  { %3651 = vmatprep.subr.bf16.mxu0 %v5698_v46  ;;  %3815 = vmatprep.subr.bf16.mxu1 %v5701_v47 }
 0x1af   :  { %3652 = vmatpush1.bf16.msra.mxu0 %v5696_v48  ;;  %3816 = vmatpush1.bf16.msra.mxu1 %v5699_v49  ;;  %v5756_v48 = vld [vmem:[#allocation8 + $0x200] ss:$16 sps:$4 sm:$0xff]   ;;  %v5759_v49 = vld [vmem:[#allocation8 + $0x208] ss:$16 sps:$4 sm:$0xff]  }
 0x1b0   :  { %3653 = vmatprep.subr.bf16.mxu0 %v5704_v12  ;;  %3817 = vmatprep.subr.bf16.mxu1 %v5707_v50  ;;  %v5764_v50 = vld [vmem:[#allocation8 + $0x224] ss:$16 sps:$4 sm:$0xff]  }
 0x1b3   :  { %3654 = vmatpush1.bf16.msra.mxu0 %v5702_v51  ;;  %3818 = vmatpush1.bf16.msra.mxu1 %v5705_v52  ;;  %v5767_v51 = vld [vmem:[#allocation8 + $0x22c] ss:$16 sps:$4 sm:$0xff]  }
 0x1b4   :  { %3655 = vmatprep.subr.bf16.mxu0 %v5710_v57  ;;  %3819 = vmatprep.subr.bf16.mxu1 %v5713_v53  ;;  %v5762_v57 = vld [vmem:[#allocation8 + $0x220] ss:$16 sps:$4 sm:$0xff]   ;;  %v5765_v53 = vld [vmem:[#allocation8 + $0x228] ss:$16 sps:$4 sm:$0xff]  }
 0x1b7   :  { %3656 = vmatpush1.bf16.msra.mxu0 %v5708_v54  ;;  %3820 = vmatpush1.bf16.msra.mxu1 %v5711_v55  ;;  %v5770_v54 = vld [vmem:[#allocation8 + $0x244] ss:$16 sps:$4 sm:$0xff]   ;;  %v5773_v55 = vld [vmem:[#allocation8 + $0x24c] ss:$16 sps:$4 sm:$0xff]  }
 0x1b8   :  { %3657 = vmatprep.subr.bf16.mxu0 %v5716_v56  ;;  %3821 = vmatprep.subr.bf16.mxu1 %v5719_v24  ;;  %v5768_v56 = vld [vmem:[#allocation8 + $0x240] ss:$16 sps:$4 sm:$0xff]   ;;  %v5771_v24 = vld [vmem:[#allocation8 + $0x248] ss:$16 sps:$4 sm:$0xff]  }
 0x1bb   :  { %3658 = vmatpush1.bf16.msra.mxu0 %v5714_v58  ;;  %3822 = vmatpush1.bf16.msra.mxu1 %v5717_v59  ;;  %v5776_v58 = vld [vmem:[#allocation8 + $0x264] ss:$16 sps:$4 sm:$0xff]   ;;  %v5779_v59 = vld [vmem:[#allocation8 + $0x26c] ss:$16 sps:$4 sm:$0xff]  }
 0x1bc   :  { %3659 = vmatprep.subr.bf16.mxu0 %v5722_v60  ;;  %3823 = vmatprep.subr.bf16.mxu1 %v5725_v61  ;;  %v5774_v60 = vld [vmem:[#allocation8 + $0x260] ss:$16 sps:$4 sm:$0xff]   ;;  %v5777_v61 = vld [vmem:[#allocation8 + $0x268] ss:$16 sps:$4 sm:$0xff]  }
 0x1bf   :  { %3660 = vmatpush1.bf16.msra.mxu0 %v5720_v62  ;;  %3824 = vmatpush1.bf16.msra.mxu1 %v5723_v63  ;;  %v5782_v62 = vld [vmem:[#allocation8 + $0x284] ss:$16 sps:$4 sm:$0xff]   ;;  %v5785_v63 = vld [vmem:[#allocation8 + $0x28c] ss:$16 sps:$4 sm:$0xff]  }
 0x1c0   :  { %3661 = vmatprep.subr.bf16.mxu0 %v5728_v0  ;;  %3825 = vmatprep.subr.bf16.mxu1 %v5731_v1  ;;  %v5780_v0 = vld [vmem:[#allocation8 + $0x280] ss:$16 sps:$4 sm:$0xff]   ;;  %v5783_v1 = vld [vmem:[#allocation8 + $0x288] ss:$16 sps:$4 sm:$0xff]  }
 0x1c3   :  { %3662 = vmatpush1.bf16.msra.mxu0 %v5726_v2  ;;  %3826 = vmatpush1.bf16.msra.mxu1 %v5729_v3  ;;  %v5788_v2 = vld [vmem:[#allocation8 + $0x2a4] ss:$16 sps:$4 sm:$0xff]   ;;  %v5791_v3 = vld [vmem:[#allocation8 + $0x2ac] ss:$16 sps:$4 sm:$0xff]  }
 0x1c4   :  { %3663 = vmatprep.subr.bf16.mxu0 %v5734_v4  ;;  %3827 = vmatprep.subr.bf16.mxu1 %v5737_v5  ;;  %v5786_v4 = vld [vmem:[#allocation8 + $0x2a0] ss:$16 sps:$4 sm:$0xff]   ;;  %v5789_v5 = vld [vmem:[#allocation8 + $0x2a8] ss:$16 sps:$4 sm:$0xff]  }
 0x1c7   :  { %3664 = vmatpush1.bf16.msra.mxu0 %v5732_v6  ;;  %3828 = vmatpush1.bf16.msra.mxu1 %v5735_v7  ;;  %v5794_v6 = vld [vmem:[#allocation8 + $0x2c4] ss:$16 sps:$4 sm:$0xff]   ;;  %v5797_v7 = vld [vmem:[#allocation8 + $0x2cc] ss:$16 sps:$4 sm:$0xff]  }
 0x1c8   :  { %3665 = vmatprep.subr.bf16.mxu0 %v5740_v8  ;;  %3829 = vmatprep.subr.bf16.mxu1 %v5743_v9  ;;  %v5792_v8 = vld [vmem:[#allocation8 + $0x2c0] ss:$16 sps:$4 sm:$0xff]   ;;  %v5795_v9 = vld [vmem:[#allocation8 + $0x2c8] ss:$16 sps:$4 sm:$0xff]  }
 0x1cb   :  { %3666 = vmatpush1.bf16.msra.mxu0 %v5738_v10  ;;  %3830 = vmatpush1.bf16.msra.mxu1 %v5741_v11  ;;  %v5800_v10 = vld [vmem:[#allocation8 + $0x2e4] ss:$16 sps:$4 sm:$0xff]   ;;  %v5803_v11 = vld [vmem:[#allocation8 + $0x2ec] ss:$16 sps:$4 sm:$0xff]  }
 0x1cc   :  { %3667 = vmatprep.subr.bf16.mxu0 %v5746_v13  ;;  %3831 = vmatprep.subr.bf16.mxu1 %v5749_v14  ;;  %v5798_v13 = vld [vmem:[#allocation8 + $0x2e0] ss:$16 sps:$4 sm:$0xff]   ;;  %v5801_v14 = vld [vmem:[#allocation8 + $0x2e8] ss:$16 sps:$4 sm:$0xff]  }
 0x1cf   :  { %3668 = vmatpush1.bf16.msra.mxu0 %v5744_v15  ;;  %3832 = vmatpush1.bf16.msra.mxu1 %v5747_v16  ;;  %v5806_v15 = vld [vmem:[#allocation8 + $0x304] ss:$16 sps:$4 sm:$0xff]   ;;  %v5809_v16 = vld [vmem:[#allocation8 + $0x30c] ss:$16 sps:$4 sm:$0xff]  }
 0x1d0   :  { %3669 = vmatprep.subr.bf16.mxu0 %v5752_v17  ;;  %3833 = vmatprep.subr.bf16.mxu1 %v5755_v18  ;;  %v5804_v17 = vld [vmem:[#allocation8 + $0x300] ss:$16 sps:$4 sm:$0xff]   ;;  %v5807_v18 = vld [vmem:[#allocation8 + $0x308] ss:$16 sps:$4 sm:$0xff]  }
 0x1d3   :  { %3670 = vmatpush1.bf16.msra.mxu0 %v5750_v19  ;;  %3834 = vmatpush1.bf16.msra.mxu1 %v5753_v20  ;;  %v5812_v19 = vld [vmem:[#allocation8 + $0x324] ss:$16 sps:$4 sm:$0xff]   ;;  %v5815_v20 = vld [vmem:[#allocation8 + $0x32c] ss:$16 sps:$4 sm:$0xff]  }
 0x1d4   :  { %3680 = vmatprep.subr.bf16.mxu0 %v5758_v21  ;;  %3844 = vmatprep.subr.bf16.mxu1 %v5761_v22  ;;  %v5810_v21 = vld [vmem:[#allocation8 + $0x320] ss:$16 sps:$4 sm:$0xff]   ;;  %v5813_v22 = vld [vmem:[#allocation8 + $0x328] ss:$16 sps:$4 sm:$0xff]  }
 0x1e9   :  { %v1812_v34 = vpop.f32.mrb[0].mxu0  ;;  %v6630_v36 = vpop.f32.mrb[0].mxu1 }
 0x1ea   :  { %v5583_v35 = vadd.f32 %v1812_v34, %v420_v31  ;;  %v1814_v37 = vpop.f32.mrb[1].mxu0  ;;  %v1896_v38 = vpop.f32.mrb[1].mxu1  ;;  %v5818_v31 = vld [vmem:[#allocation8 + $0x344] ss:$16 sps:$4 sm:$0xff]   ;;  %v5819_v34 = vld [vmem:[#allocation8 + $0x348] ss:$16 sps:$4 sm:$0xff]  }
 0x1eb   :  { %v5584_v23 = vadd.f32 %v1814_v37, %v424_v32  ;;  %v1816_v39 = vpop.f32.mrb[2].mxu0  ;;  %v5586_v41 = vadd.f32 %v1896_v38, %v432_v33  ;;  %v1898_v42 = vpop.f32.mrb[2].mxu1  ;;  %v5821_v32 = vld [vmem:[#allocation8 + $0x34c] ss:$16 sps:$4 sm:$0xff]   ;;  %v5816_v33 = vld [vmem:[#allocation8 + $0x340] ss:$16 sps:$4 sm:$0xff]  }
 0x1ec   :  { %v2065_v40 = vmax.f32 %v5583_v35, 0.0  ;;  %v1817_v43 = vpop.f32.mrb[3].mxu0  ;;  %v1899_v45 = vpop.f32.mrb[3].mxu1  ;;  %v5824_v35 = vld [vmem:[#allocation8 + $0x364] ss:$16 sps:$4 sm:$0xff]  }
 0x1ed   :  { %v2066_v44 = vmax.f32 %v5584_v23, 0.0  ;;  %v2068_v46 = vmax.f32 %v5586_v41, 0.0  ;;  %v5827_v37 = vld [vmem:[#allocation8 + $0x36c] ss:$16 sps:$4 sm:$0xff]   ;;  %v5822_v23 = vld [vmem:[#allocation8 + $0x360] ss:$16 sps:$4 sm:$0xff]  }
 0x1ee   :  { %v2330_v12 = vpack.c.bf16 %v2065_v40, %v2065_v40  ;;  %v5825_v38 = vld [vmem:[#allocation8 + $0x368] ss:$16 sps:$4 sm:$0xff]   ;;  %v5830_v39 = vld [vmem:[#allocation8 + $0x384] ss:$16 sps:$4 sm:$0xff]   ;;  %v5833_v40 = vld [vmem:[#allocation8 + $0x38c] ss:$16 sps:$4 sm:$0xff]  }
 0x1ef   :  { %v2331_v47 = vpack.c.bf16 %v2066_v44, %v2066_v44  ;;  %v2333_v52 = vpack.c.bf16 %v2068_v46, %v2068_v46  ;;  %v5828_v41 = vld [vmem:[#allocation8 + $0x380] ss:$16 sps:$4 sm:$0xff]   ;;  %v5831_v42 = vld [vmem:[#allocation8 + $0x388] ss:$16 sps:$4 sm:$0xff]   ;;  %v427_v43 = vsub.s32 2, %v6612_v26 }
 0x1f0   :  { %v5836_v44 = vld [vmem:[#allocation8 + $0x3a4] ss:$16 sps:$4 sm:$0xff]   ;;  %v5839_v45 = vld [vmem:[#allocation8 + $0x3ac] ss:$16 sps:$4 sm:$0xff]   ;;  %v5834_v46 = vld [vmem:[#allocation8 + $0x3a0] ss:$16 sps:$4 sm:$0xff]  }
 0x1f1   :  { %3671 = vmatprep.mubr.bf16.mxu0 %v2331_v47  ;;  %3835 = vmatprep.mubr.bf16.mxu1 %v2331_v47  ;;  %v5837_v47 = vld [vmem:[#allocation8 + $0x3a8] ss:$16 sps:$4 sm:$0xff]  }
 0x1f2   :  { %3672 = vmatmul.mubr.bf16.vlgmr.msra.gmra.mrb[8].mxu0 %v2330_v12  ;;  %3836 = vmatmul.mubr.bf16.vlgmr.msra.gmra.mrb[8].mxu1 %v2330_v12  ;;  %v5845_v12 = vld [vmem:[#allocation8 + $0x3cc] ss:$16 sps:$4 sm:$0xff]  }
 0x1f3   :  { %3681 = vmatpush1.bf16.msra.mxu0 %v5756_v48  ;;  %3845 = vmatpush1.bf16.msra.mxu1 %v5759_v49  ;;  %v428_v48 = vrot.slane %v6617_v28, %v427_v43  ;;  %v5842_v49 = vld [vmem:[#allocation8 + $0x3c4] ss:$16 sps:$4 sm:$0xff]  }
 0x1f4   :  { %3712 = vmatprep.mubr.bf16.mxu0 %v2333_v52  ;;  %3876 = vmatprep.mubr.bf16.mxu1 %v2333_v52 }
 0x1f5   :  { %3682 = vmatprep.subr.bf16.mxu0 %v5764_v50  ;;  %3846 = vmatprep.subr.bf16.mxu1 %v5767_v51  ;;  %v5840_v50 = vld [vmem:[#allocation8 + $0x3c0] ss:$16 sps:$4 sm:$0xff]   ;;  %v5843_v51 = vld [vmem:[#allocation8 + $0x3c8] ss:$16 sps:$4 sm:$0xff]   ;;  %v5585_v52 = vadd.f32 %v6630_v36, %v428_v48  ;;  %v5860_v36 = vld [vmem:[#allocation8 + $0x424] ss:$16 sps:$4 sm:$0xff]  }
 0x1f6   :  { %v5923_v48 = vld [vmem:[#allocation8 + $0x56c] ss:$16 sps:$4 sm:$0xff]  }
 0x1f7   :  { %3683 = vmatpush1.bf16.msra.mxu0 %v5762_v57  ;;  %3847 = vmatpush1.bf16.msra.mxu1 %v5765_v53  ;;  %v5848_v57 = vld [vmem:[#allocation8 + $0x3e4] ss:$16 sps:$4 sm:$0xff]   ;;  %v5851_v53 = vld [vmem:[#allocation8 + $0x3ec] ss:$16 sps:$4 sm:$0xff]  }
 0x1f8   :  { %3684 = vmatprep.subr.bf16.mxu0 %v5770_v54  ;;  %3848 = vmatprep.subr.bf16.mxu1 %v5773_v55  ;;  %v5846_v54 = vld [vmem:[#allocation8 + $0x3e0] ss:$16 sps:$4 sm:$0xff]   ;;  %v5849_v55 = vld [vmem:[#allocation8 + $0x3e8] ss:$16 sps:$4 sm:$0xff]  }
 0x1fb   :  { %3685 = vmatpush1.bf16.msra.mxu0 %v5768_v56  ;;  %3849 = vmatpush1.bf16.msra.mxu1 %v5771_v24  ;;  %v2067_v56 = vmax.f32 %v5585_v52, 0.0  ;;  %v5854_v24 = vld [vmem:[#allocation8 + $0x404] ss:$16 sps:$4 sm:$0xff]   ;;  %v5924_v52 = vld [vmem:[#allocation8 + $0x580] ss:$16 sps:$4 sm:$0xff]  }
 0x1fc   :  { %3686 = vmatprep.subr.bf16.mxu0 %v5776_v58  ;;  %3850 = vmatprep.subr.bf16.mxu1 %v5779_v59  ;;  %v5857_v58 = vld [vmem:[#allocation8 + $0x40c] ss:$16 sps:$4 sm:$0xff]   ;;  %v5852_v59 = vld [vmem:[#allocation8 + $0x400] ss:$16 sps:$4 sm:$0xff]  }
 0x1ff   :  { %3687 = vmatpush1.bf16.msra.mxu0 %v5774_v60  ;;  %3851 = vmatpush1.bf16.msra.mxu1 %v5777_v61  ;;  %v5855_v60 = vld [vmem:[#allocation8 + $0x408] ss:$16 sps:$4 sm:$0xff]   ;;  %v2332_v61 = vpack.c.bf16 %v2067_v56, %v2067_v56  ;;  %v5930_v56 = vld [vmem:[#allocation8 + $0x5a0] ss:$16 sps:$4 sm:$0xff]  }
 0x200   :  { %3688 = vmatprep.subr.bf16.mxu0 %v5782_v62  ;;  %3852 = vmatprep.subr.bf16.mxu1 %v5785_v63  ;;  %v5863_v62 = vld [vmem:[#allocation8 + $0x42c] ss:$16 sps:$4 sm:$0xff]   ;;  %v5858_v63 = vld [vmem:[#allocation8 + $0x420] ss:$16 sps:$4 sm:$0xff]  }
 0x203   :  { %3689 = vmatpush1.bf16.msra.mxu0 %v5780_v0  ;;  %3853 = vmatpush1.bf16.msra.mxu1 %v5783_v1  ;;  %v5861_v0 = vld [vmem:[#allocation8 + $0x428] ss:$16 sps:$4 sm:$0xff]   ;;  %v5866_v1 = vld [vmem:[#allocation8 + $0x444] ss:$16 sps:$4 sm:$0xff]  }
 0x204   :  { %3690 = vmatprep.subr.bf16.mxu0 %v5788_v2  ;;  %3854 = vmatprep.subr.bf16.mxu1 %v5791_v3  ;;  %v5869_v2 = vld [vmem:[#allocation8 + $0x44c] ss:$16 sps:$4 sm:$0xff]   ;;  %v5864_v3 = vld [vmem:[#allocation8 + $0x440] ss:$16 sps:$4 sm:$0xff]  }
 0x207   :  { %3691 = vmatpush1.bf16.msra.mxu0 %v5786_v4  ;;  %3855 = vmatpush1.bf16.msra.mxu1 %v5789_v5  ;;  %v5867_v4 = vld [vmem:[#allocation8 + $0x448] ss:$16 sps:$4 sm:$0xff]   ;;  %v5872_v5 = vld [vmem:[#allocation8 + $0x464] ss:$16 sps:$4 sm:$0xff]  }
 0x208   :  { %3692 = vmatprep.subr.bf16.mxu0 %v5794_v6  ;;  %3856 = vmatprep.subr.bf16.mxu1 %v5797_v7  ;;  %v5875_v6 = vld [vmem:[#allocation8 + $0x46c] ss:$16 sps:$4 sm:$0xff]   ;;  %v5870_v7 = vld [vmem:[#allocation8 + $0x460] ss:$16 sps:$4 sm:$0xff]  }
 0x20b   :  { %3693 = vmatpush1.bf16.msra.mxu0 %v5792_v8  ;;  %3857 = vmatpush1.bf16.msra.mxu1 %v5795_v9  ;;  %v5873_v8 = vld [vmem:[#allocation8 + $0x468] ss:$16 sps:$4 sm:$0xff]   ;;  %v5878_v9 = vld [vmem:[#allocation8 + $0x484] ss:$16 sps:$4 sm:$0xff]  }
 0x20c   :  { %3694 = vmatprep.subr.bf16.mxu0 %v5800_v10  ;;  %3858 = vmatprep.subr.bf16.mxu1 %v5803_v11  ;;  %v5881_v10 = vld [vmem:[#allocation8 + $0x48c] ss:$16 sps:$4 sm:$0xff]   ;;  %v5876_v11 = vld [vmem:[#allocation8 + $0x480] ss:$16 sps:$4 sm:$0xff]  }
 0x20f   :  { %3695 = vmatpush1.bf16.msra.mxu0 %v5798_v13  ;;  %3859 = vmatpush1.bf16.msra.mxu1 %v5801_v14  ;;  %v5879_v13 = vld [vmem:[#allocation8 + $0x488] ss:$16 sps:$4 sm:$0xff]   ;;  %v5884_v14 = vld [vmem:[#allocation8 + $0x4a4] ss:$16 sps:$4 sm:$0xff]  }
 0x210   :  { %3696 = vmatprep.subr.bf16.mxu0 %v5806_v15  ;;  %3860 = vmatprep.subr.bf16.mxu1 %v5809_v16  ;;  %v5887_v15 = vld [vmem:[#allocation8 + $0x4ac] ss:$16 sps:$4 sm:$0xff]   ;;  %v5882_v16 = vld [vmem:[#allocation8 + $0x4a0] ss:$16 sps:$4 sm:$0xff]  }
 0x213   :  { %3697 = vmatpush1.bf16.msra.mxu0 %v5804_v17  ;;  %3861 = vmatpush1.bf16.msra.mxu1 %v5807_v18  ;;  %v5885_v17 = vld [vmem:[#allocation8 + $0x4a8] ss:$16 sps:$4 sm:$0xff]   ;;  %v5890_v18 = vld [vmem:[#allocation8 + $0x4c4] ss:$16 sps:$4 sm:$0xff]  }
 0x214   :  { %3698 = vmatprep.subr.bf16.mxu0 %v5812_v19  ;;  %3862 = vmatprep.subr.bf16.mxu1 %v5815_v20  ;;  %v5893_v19 = vld [vmem:[#allocation8 + $0x4cc] ss:$16 sps:$4 sm:$0xff]   ;;  %v5888_v20 = vld [vmem:[#allocation8 + $0x4c0] ss:$16 sps:$4 sm:$0xff]  }
 0x217   :  { %3699 = vmatpush1.bf16.msra.mxu0 %v5810_v21  ;;  %3863 = vmatpush1.bf16.msra.mxu1 %v5813_v22  ;;  %v5891_v21 = vld [vmem:[#allocation8 + $0x4c8] ss:$16 sps:$4 sm:$0xff]   ;;  %v5896_v22 = vld [vmem:[#allocation8 + $0x4e4] ss:$16 sps:$4 sm:$0xff]  }
 0x218   :  { %3700 = vmatprep.subr.bf16.mxu0 %v5818_v31  ;;  %3864 = vmatprep.subr.bf16.mxu1 %v5821_v32  ;;  %v5899_v31 = vld [vmem:[#allocation8 + $0x4ec] ss:$16 sps:$4 sm:$0xff]   ;;  %v5894_v32 = vld [vmem:[#allocation8 + $0x4e0] ss:$16 sps:$4 sm:$0xff]  }
 0x21b   :  { %3701 = vmatpush1.bf16.msra.mxu0 %v5816_v33  ;;  %3865 = vmatpush1.bf16.msra.mxu1 %v5819_v34  ;;  %v5897_v33 = vld [vmem:[#allocation8 + $0x4e8] ss:$16 sps:$4 sm:$0xff]   ;;  %v5902_v34 = vld [vmem:[#allocation8 + $0x504] ss:$16 sps:$4 sm:$0xff]  }
 0x21c   :  { %3702 = vmatprep.subr.bf16.mxu0 %v5824_v35  ;;  %3866 = vmatprep.subr.bf16.mxu1 %v5827_v37  ;;  %v5905_v35 = vld [vmem:[#allocation8 + $0x50c] ss:$16 sps:$4 sm:$0xff]   ;;  %v5900_v37 = vld [vmem:[#allocation8 + $0x500] ss:$16 sps:$4 sm:$0xff]  }
 0x21f   :  { %3703 = vmatpush1.bf16.msra.mxu0 %v5822_v23  ;;  %3867 = vmatpush1.bf16.msra.mxu1 %v5825_v38  ;;  %v5903_v23 = vld [vmem:[#allocation8 + $0x508] ss:$16 sps:$4 sm:$0xff]   ;;  %v5908_v38 = vld [vmem:[#allocation8 + $0x524] ss:$16 sps:$4 sm:$0xff]  }
 0x220   :  { %3704 = vmatprep.subr.bf16.mxu0 %v5830_v39  ;;  %3868 = vmatprep.subr.bf16.mxu1 %v5833_v40  ;;  %v5911_v39 = vld [vmem:[#allocation8 + $0x52c] ss:$16 sps:$4 sm:$0xff]   ;;  %v5906_v40 = vld [vmem:[#allocation8 + $0x520] ss:$16 sps:$4 sm:$0xff]  }
 0x223   :  { %3705 = vmatpush1.bf16.msra.mxu0 %v5828_v41  ;;  %3869 = vmatpush1.bf16.msra.mxu1 %v5831_v42  ;;  %v5909_v41 = vld [vmem:[#allocation8 + $0x528] ss:$16 sps:$4 sm:$0xff]   ;;  %v5914_v42 = vld [vmem:[#allocation8 + $0x544] ss:$16 sps:$4 sm:$0xff]  }
 0x224   :  { %3706 = vmatprep.subr.bf16.mxu0 %v5836_v44  ;;  %3870 = vmatprep.subr.bf16.mxu1 %v5839_v45  ;;  %v5917_v44 = vld [vmem:[#allocation8 + $0x54c] ss:$16 sps:$4 sm:$0xff]   ;;  %v5912_v45 = vld [vmem:[#allocation8 + $0x540] ss:$16 sps:$4 sm:$0xff]  }
 0x227   :  { %3707 = vmatpush1.bf16.msra.mxu0 %v5834_v46  ;;  %3871 = vmatpush1.bf16.msra.mxu1 %v5837_v47  ;;  %v5915_v46 = vld [vmem:[#allocation8 + $0x548] ss:$16 sps:$4 sm:$0xff]   ;;  %v5920_v47 = vld [vmem:[#allocation8 + $0x564] ss:$16 sps:$4 sm:$0xff]  }
 0x228   :  { %3708 = vmatprep.subr.bf16.mxu0 %v5842_v49  ;;  %3872 = vmatprep.subr.bf16.mxu1 %v5845_v12  ;;  %v5918_v49 = vld [vmem:[#allocation8 + $0x560] ss:$16 sps:$4 sm:$0xff]   ;;  %v5921_v12 = vld [vmem:[#allocation8 + $0x568] ss:$16 sps:$4 sm:$0xff]  }
 0x22b   :  { %3709 = vmatpush1.bf16.msra.mxu0 %v5840_v50  ;;  %3873 = vmatpush1.bf16.msra.mxu1 %v5843_v51  ;;  %v5926_v50 = vld [vmem:[#allocation8 + $0x584] ss:$16 sps:$4 sm:$0xff]   ;;  %v5929_v51 = vld [vmem:[#allocation8 + $0x58c] ss:$16 sps:$4 sm:$0xff]  }
 0x22c   :  { %3710 = vmatprep.subr.bf16.mxu0 %v5848_v57  ;;  %3874 = vmatprep.subr.bf16.mxu1 %v5851_v53  ;;  %v5927_v57 = vld [vmem:[#allocation8 + $0x588] ss:$16 sps:$4 sm:$0xff]   ;;  %v5932_v53 = vld [vmem:[#allocation8 + $0x5a4] ss:$16 sps:$4 sm:$0xff]  }
 0x22f   :  { %3711 = vmatpush1.bf16.msra.mxu0 %v5846_v54  ;;  %3875 = vmatpush1.bf16.msra.mxu1 %v5849_v55  ;;  %v5935_v54 = vld [vmem:[#allocation8 + $0x5ac] ss:$16 sps:$4 sm:$0xff]   ;;  %v435_v55 = vsub.s32 4, %v6612_v26 }
 0x230   :  { %3721 = vmatprep.subr.bf16.mxu0 %v5854_v24  ;;  %3885 = vmatprep.subr.bf16.mxu1 %v5857_v58  ;;  %v5933_v24 = vld [vmem:[#allocation8 + $0x5a8] ss:$16 sps:$4 sm:$0xff]   ;;  %v439_v58 = vsub.s32 5, %v6612_v26 }
 0x232   :  { %3713 = vmatmul.mubr.bf16.vlgmr.msra.gmra.mrb[8].mxu0 %v2332_v61  ;;  %3877 = vmatmul.mubr.bf16.vlgmr.msra.gmra.mrb[8].mxu1 %v2332_v61  ;;  %v447_v61 = vsub.s32 7, %v6612_v26 }
 0x233   :  { %3722 = vmatpush1.bf16.msra.mxu0 %v5852_v59  ;;  %3886 = vmatpush1.bf16.msra.mxu1 %v5855_v60  ;;  %v5938_v59 = vld [vmem:[#allocation8 + $0x5c4] ss:$16 sps:$4 sm:$0xff]   ;;  %v5941_v60 = vld [vmem:[#allocation8 + $0x5cc] ss:$16 sps:$4 sm:$0xff]  }
 0x234   :  { %3723 = vmatprep.subr.bf16.mxu0 %v5860_v36  ;;  %3887 = vmatprep.subr.bf16.mxu1 %v5863_v62  ;;  %v436_v36 = vrot.slane %v6617_v28, %v435_v55  ;;  %v5936_v62 = vld [vmem:[#allocation8 + $0x5c0] ss:$16 sps:$4 sm:$0xff]   ;;  %v5986_v55 = vld [vmem:[#allocation8 + $0x6c4] ss:$16 sps:$4 sm:$0xff]  }
 0x237   :  { %3724 = vmatpush1.bf16.msra.mxu0 %v5858_v63  ;;  %3888 = vmatpush1.bf16.msra.mxu1 %v5861_v0  ;;  %v5939_v63 = vld [vmem:[#allocation8 + $0x5c8] ss:$16 sps:$4 sm:$0xff]   ;;  %v440_v0 = vrot.slane %v6617_v28, %v439_v58 }
 0x238   :  { %3725 = vmatprep.subr.bf16.mxu0 %v5866_v1  ;;  %3889 = vmatprep.subr.bf16.mxu1 %v5869_v2  ;;  %v448_v1 = vrot.slane %v6617_v28, %v447_v61  ;;  %v5944_v2 = vld [vmem:[#allocation8 + $0x5e4] ss:$16 sps:$4 sm:$0xff]   ;;  %v5987_v58 = vld [vmem:[#allocation8 + $0x6c8] ss:$16 sps:$4 sm:$0xff]   ;;  %v5990_v61 = vld [vmem:[#allocation8 + $0x6e0] ss:$16 sps:$4 sm:$0xff]  }
 0x23b   :  { %3726 = vmatpush1.bf16.msra.mxu0 %v5864_v3  ;;  %3890 = vmatpush1.bf16.msra.mxu1 %v5867_v4  ;;  %v5947_v3 = vld [vmem:[#allocation8 + $0x5ec] ss:$16 sps:$4 sm:$0xff]  }
 0x23c   :  { %3727 = vmatprep.subr.bf16.mxu0 %v5872_v5  ;;  %3891 = vmatprep.subr.bf16.mxu1 %v5875_v6 }
 0x23f   :  { %3728 = vmatpush1.bf16.msra.mxu0 %v5870_v7  ;;  %3892 = vmatpush1.bf16.msra.mxu1 %v5873_v8  ;;  %v5942_v8 = vld [vmem:[#allocation8 + $0x5e0] ss:$16 sps:$4 sm:$0xff]  }
 0x240   :  { %3729 = vmatprep.subr.bf16.mxu0 %v5878_v9  ;;  %3893 = vmatprep.subr.bf16.mxu1 %v5881_v10 }
 0x243   :  { %3730 = vmatpush1.bf16.msra.mxu0 %v5876_v11  ;;  %3894 = vmatpush1.bf16.msra.mxu1 %v5879_v13  ;;  %v5945_v13 = vld [vmem:[#allocation8 + $0x5e8] ss:$16 sps:$4 sm:$0xff]  }
 0x244   :  { %3731 = vmatprep.subr.bf16.mxu0 %v5884_v14  ;;  %3895 = vmatprep.subr.bf16.mxu1 %v5887_v15  ;;  %v5950_v14 = vld [vmem:[#allocation8 + $0x604] ss:$16 sps:$4 sm:$0xff]  }
 0x247   :  { %3732 = vmatpush1.bf16.msra.mxu0 %v5882_v16  ;;  %3896 = vmatpush1.bf16.msra.mxu1 %v5885_v17 }
 0x248   :  { %3733 = vmatprep.subr.bf16.mxu0 %v5890_v18  ;;  %3897 = vmatprep.subr.bf16.mxu1 %v5893_v19  ;;  %v5953_v19 = vld [vmem:[#allocation8 + $0x60c] ss:$16 sps:$4 sm:$0xff]  }
 0x24b   :  { %3734 = vmatpush1.bf16.msra.mxu0 %v5888_v20  ;;  %3898 = vmatpush1.bf16.msra.mxu1 %v5891_v21 }
 0x24c   :  { %3735 = vmatprep.subr.bf16.mxu0 %v5896_v22  ;;  %3899 = vmatprep.subr.bf16.mxu1 %v5899_v31 }
 0x24f   :  { %3736 = vmatpush1.bf16.msra.mxu0 %v5894_v32  ;;  %3900 = vmatpush1.bf16.msra.mxu1 %v5897_v33  ;;  %v5948_v32 = vld [vmem:[#allocation8 + $0x600] ss:$16 sps:$4 sm:$0xff]   ;;  %v5951_v33 = vld [vmem:[#allocation8 + $0x608] ss:$16 sps:$4 sm:$0xff]  }
 0x250   :  { %3737 = vmatprep.subr.bf16.mxu0 %v5902_v34  ;;  %3901 = vmatprep.subr.bf16.mxu1 %v5905_v35  ;;  %v5956_v35 = vld [vmem:[#allocation8 + $0x624] ss:$16 sps:$4 sm:$0xff]  }
 0x253   :  { %3738 = vmatpush1.bf16.msra.mxu0 %v5900_v37  ;;  %3902 = vmatpush1.bf16.msra.mxu1 %v5903_v23  ;;  %v5959_v37 = vld [vmem:[#allocation8 + $0x62c] ss:$16 sps:$4 sm:$0xff]  }
 0x254   :  { %3739 = vmatprep.subr.bf16.mxu0 %v5908_v38  ;;  %3903 = vmatprep.subr.bf16.mxu1 %v5911_v39  ;;  %v5954_v38 = vld [vmem:[#allocation8 + $0x620] ss:$16 sps:$4 sm:$0xff]   ;;  %v5957_v39 = vld [vmem:[#allocation8 + $0x628] ss:$16 sps:$4 sm:$0xff]  }
 0x257   :  { %3740 = vmatpush1.bf16.msra.mxu0 %v5906_v40  ;;  %3904 = vmatpush1.bf16.msra.mxu1 %v5909_v41  ;;  %v5962_v40 = vld [vmem:[#allocation8 + $0x644] ss:$16 sps:$4 sm:$0xff]   ;;  %v5965_v41 = vld [vmem:[#allocation8 + $0x64c] ss:$16 sps:$4 sm:$0xff]  }
 0x258   :  { %3741 = vmatprep.subr.bf16.mxu0 %v5914_v42  ;;  %3905 = vmatprep.subr.bf16.mxu1 %v5917_v44  ;;  %v5960_v42 = vld [vmem:[#allocation8 + $0x640] ss:$16 sps:$4 sm:$0xff]   ;;  %v5963_v44 = vld [vmem:[#allocation8 + $0x648] ss:$16 sps:$4 sm:$0xff]  }
 0x25b   :  { %3742 = vmatpush1.bf16.msra.mxu0 %v5912_v45  ;;  %3906 = vmatpush1.bf16.msra.mxu1 %v5915_v46  ;;  %v5968_v45 = vld [vmem:[#allocation8 + $0x664] ss:$16 sps:$4 sm:$0xff]   ;;  %v5971_v46 = vld [vmem:[#allocation8 + $0x66c] ss:$16 sps:$4 sm:$0xff]  }
 0x25c   :  { %3743 = vmatprep.subr.bf16.mxu0 %v5920_v47  ;;  %3907 = vmatprep.subr.bf16.mxu1 %v5923_v48  ;;  %v5966_v47 = vld [vmem:[#allocation8 + $0x660] ss:$16 sps:$4 sm:$0xff]   ;;  %v5969_v48 = vld [vmem:[#allocation8 + $0x668] ss:$16 sps:$4 sm:$0xff]  }
 0x25f   :  { %3744 = vmatpush1.bf16.msra.mxu0 %v5918_v49  ;;  %3908 = vmatpush1.bf16.msra.mxu1 %v5921_v12  ;;  %v5974_v49 = vld [vmem:[#allocation8 + $0x684] ss:$16 sps:$4 sm:$0xff]   ;;  %v5977_v12 = vld [vmem:[#allocation8 + $0x68c] ss:$16 sps:$4 sm:$0xff]  }
 0x260   :  { %3745 = vmatprep.subr.bf16.mxu0 %v5926_v50  ;;  %3909 = vmatprep.subr.bf16.mxu1 %v5929_v51  ;;  %v5972_v50 = vld [vmem:[#allocation8 + $0x680] ss:$16 sps:$4 sm:$0xff]   ;;  %v5975_v51 = vld [vmem:[#allocation8 + $0x688] ss:$16 sps:$4 sm:$0xff]  }
 0x263   :  { %3746 = vmatpush1.bf16.msra.mxu0 %v5924_v52  ;;  %3910 = vmatpush1.bf16.msra.mxu1 %v5927_v57  ;;  %v5980_v52 = vld [vmem:[#allocation8 + $0x6a4] ss:$16 sps:$4 sm:$0xff]   ;;  %v5983_v57 = vld [vmem:[#allocation8 + $0x6ac] ss:$16 sps:$4 sm:$0xff]  }
 0x264   :  { %3747 = vmatprep.subr.bf16.mxu0 %v5932_v53  ;;  %3911 = vmatprep.subr.bf16.mxu1 %v5935_v54  ;;  %v5978_v53 = vld [vmem:[#allocation8 + $0x6a0] ss:$16 sps:$4 sm:$0xff]   ;;  %v5981_v54 = vld [vmem:[#allocation8 + $0x6a8] ss:$16 sps:$4 sm:$0xff]  }
 0x267   :  { %3748 = vmatpush1.bf16.msra.mxu0 %v5930_v56  ;;  %3912 = vmatpush1.bf16.msra.mxu1 %v5933_v24  ;;  %v5989_v56 = vld [vmem:[#allocation8 + $0x6cc] ss:$16 sps:$4 sm:$0xff]   ;;  %v5984_v24 = vld [vmem:[#allocation8 + $0x6c0] ss:$16 sps:$4 sm:$0xff]  }
 0x268   :  { %3749 = vmatprep.subr.bf16.mxu0 %v5938_v59  ;;  %3913 = vmatprep.subr.bf16.mxu1 %v5941_v60  ;;  %v5992_v59 = vld [vmem:[#allocation8 + $0x6e4] ss:$16 sps:$4 sm:$0xff]   ;;  %v5995_v60 = vld [vmem:[#allocation8 + $0x6ec] ss:$16 sps:$4 sm:$0xff]  }
 0x269   :  { %v1976_v4 = vpop.f32.mrb[4].mxu0  ;;  %v6643_v6 = vpop.f32.mrb[4].mxu1 }
 0x26a   :  { %v5587_v5 = vadd.f32 %v1976_v4, %v436_v36  ;;  %v1978_v7 = vpop.f32.mrb[5].mxu0  ;;  %v2060_v10 = vpop.f32.mrb[5].mxu1  ;;  %v5993_v36 = vld [vmem:[#allocation8 + $0x6e8] ss:$16 sps:$4 sm:$0xff]   ;;  %v6002_v4 = vld [vmem:[#allocation8 + $0x720] ss:$16 sps:$4 sm:$0xff]  }
 0x26b   :  { %v5588_v9 = vadd.f32 %v1978_v7, %v440_v0  ;;  %3750 = vmatpush1.bf16.msra.mxu0 %v5936_v62  ;;  %3914 = vmatpush1.bf16.msra.mxu1 %v5939_v63  ;;  %v1980_v11 = vpop.f32.mrb[6].mxu0  ;;  %v5590_v16 = vadd.f32 %v2060_v10, %v448_v1  ;;  %v2062_v17 = vpop.f32.mrb[6].mxu1  ;;  %v5998_v62 = vld [vmem:[#allocation8 + $0x704] ss:$16 sps:$4 sm:$0xff]   ;;  %v6001_v63 = vld [vmem:[#allocation8 + $0x70c] ss:$16 sps:$4 sm:$0xff]  }
 0x26c   :  { %v2069_v15 = vmax.f32 %v5587_v5, 0.0  ;;  %v1981_v18 = vpop.f32.mrb[7].mxu0  ;;  %3751 = vmatprep.subr.bf16.mxu0 %v5944_v2  ;;  %3915 = vmatprep.subr.bf16.mxu1 %v5947_v3  ;;  %v2063_v21 = vpop.f32.mrb[7].mxu1  ;;  %v5996_v0 = vld [vmem:[#allocation8 + $0x700] ss:$16 sps:$4 sm:$0xff]  }
 0x26d   :  { %v2070_v20 = vmax.f32 %v5588_v9, 0.0  ;;  %v2072_v22 = vmax.f32 %v5590_v16, 0.0  ;;  %v5999_v1 = vld [vmem:[#allocation8 + $0x708] ss:$16 sps:$4 sm:$0xff]   ;;  %v6004_v2 = vld [vmem:[#allocation8 + $0x724] ss:$16 sps:$4 sm:$0xff]  }
 0x26e   :  { %v2334_v34 = vpack.c.bf16 %v2069_v15, %v2069_v15  ;;  %v6007_v3 = vld [vmem:[#allocation8 + $0x72c] ss:$16 sps:$4 sm:$0xff]   ;;  %v6005_v5 = vld [vmem:[#allocation8 + $0x728] ss:$16 sps:$4 sm:$0xff]   ;;  %v6010_v7 = vld [vmem:[#allocation8 + $0x744] ss:$16 sps:$4 sm:$0xff]  }
 0x26f   :  { %v2335_v31 = vpack.c.bf16 %v2070_v20, %v2070_v20  ;;  %3752 = vmatpush1.bf16.msra.mxu0 %v5942_v8  ;;  %3916 = vmatpush1.bf16.msra.mxu1 %v5945_v13  ;;  %v2337_v23 = vpack.c.bf16 %v2072_v22, %v2072_v22  ;;  %v6013_v8 = vld [vmem:[#allocation8 + $0x74c] ss:$16 sps:$4 sm:$0xff]   ;;  %v6008_v9 = vld [vmem:[#allocation8 + $0x740] ss:$16 sps:$4 sm:$0xff]   ;;  %v6011_v10 = vld [vmem:[#allocation8 + $0x748] ss:$16 sps:$4 sm:$0xff]  }
 0x270   :  { %3762 = vmatprep.subr.bf16.mxu0 %v5950_v14  ;;  %3926 = vmatprep.subr.bf16.mxu1 %v5953_v19  ;;  %v6016_v11 = vld [vmem:[#allocation8 + $0x764] ss:$16 sps:$4 sm:$0xff]   ;;  %v6019_v13 = vld [vmem:[#allocation8 + $0x76c] ss:$16 sps:$4 sm:$0xff]   ;;  %v6014_v14 = vld [vmem:[#allocation8 + $0x760] ss:$16 sps:$4 sm:$0xff]  }
 0x271   :  { %3753 = vmatprep.mubr.bf16.mxu0 %v2335_v31  ;;  %3917 = vmatprep.mubr.bf16.mxu1 %v2335_v31  ;;  %v6017_v15 = vld [vmem:[#allocation8 + $0x768] ss:$16 sps:$4 sm:$0xff]   ;;  %v6022_v16 = vld [vmem:[#allocation8 + $0x784] ss:$16 sps:$4 sm:$0xff]   ;;  %v6025_v17 = vld [vmem:[#allocation8 + $0x78c] ss:$16 sps:$4 sm:$0xff]  }
 0x272   :  { %3754 = vmatmul.mubr.bf16.vlgmr.msra.gmra.mrb[8].mxu0 %v2334_v34  ;;  %3918 = vmatmul.mubr.bf16.vlgmr.msra.gmra.mrb[8].mxu1 %v2334_v34  ;;  %v6020_v18 = vld [vmem:[#allocation8 + $0x780] ss:$16 sps:$4 sm:$0xff]   ;;  %v6023_v19 = vld [vmem:[#allocation8 + $0x788] ss:$16 sps:$4 sm:$0xff]   ;;  %v443_v20 = vsub.s32 6, %v6612_v26 }
 0x273   :  { %3763 = vmatpush1.bf16.msra.mxu0 %v5948_v32  ;;  %3927 = vmatpush1.bf16.msra.mxu1 %v5951_v33  ;;  %v6028_v21 = vld [vmem:[#allocation8 + $0x7a4] ss:$16 sps:$4 sm:$0xff]   ;;  %v6031_v22 = vld [vmem:[#allocation8 + $0x7ac] ss:$16 sps:$4 sm:$0xff]   ;;  %v6026_v31 = vld [vmem:[#allocation8 + $0x7a0] ss:$16 sps:$4 sm:$0xff]  }
 0x274   :  { %3794 = vmatprep.mubr.bf16.mxu0 %v2337_v23  ;;  %3958 = vmatprep.mubr.bf16.mxu1 %v2337_v23  ;;  %v6029_v32 = vld [vmem:[#allocation8 + $0x7a8] ss:$16 sps:$4 sm:$0xff]   ;;  %v444_v33 = vrot.slane %v6617_v28, %v443_v20  ;;  %v6034_v34 = vld [vmem:[#allocation8 + $0x7c4] ss:$16 sps:$4 sm:$0xff]  }
 0x275   :  { %3764 = vmatprep.subr.bf16.mxu0 %v5956_v35  ;;  %3928 = vmatprep.subr.bf16.mxu1 %v5959_v37  ;;  %v6037_v35 = vld [vmem:[#allocation8 + $0x7cc] ss:$16 sps:$4 sm:$0xff]   ;;  %v6032_v37 = vld [vmem:[#allocation8 + $0x7c0] ss:$16 sps:$4 sm:$0xff]   ;;  %v6035_v23 = vld [vmem:[#allocation8 + $0x7c8] ss:$16 sps:$4 sm:$0xff]  }
 0x276   :  { %v6046_v28 = vld [vmem:[#allocation10 + $0x4] ss:$8 sps:$4 sm:$0xff]   ;;  %v6154_v26 = vld [vmem:[#allocation11 + $0x78] sm:$0xff]  }
 0x277   :  { %3765 = vmatpush1.bf16.msra.mxu0 %v5954_v38  ;;  %3929 = vmatpush1.bf16.msra.mxu1 %v5957_v39  ;;  %v5589_v38 = vadd.f32 %v6643_v6, %v444_v33  ;;  %v6040_v39 = vld [vmem:[#allocation8 + $0x7e4] ss:$16 sps:$4 sm:$0xff]   ;;  %v6047_v6 = vld [vmem:[#allocation10 + $0x10] ss:$8 sps:$4 sm:$0xff]  }
 0x278   :  { %3766 = vmatprep.subr.bf16.mxu0 %v5962_v40  ;;  %3930 = vmatprep.subr.bf16.mxu1 %v5965_v41  ;;  %v6043_v40 = vld [vmem:[#allocation8 + $0x7ec] ss:$16 sps:$4 sm:$0xff]   ;;  %v6038_v41 = vld [vmem:[#allocation8 + $0x7e0] ss:$16 sps:$4 sm:$0xff]  }
 0x279   :  { %v6148_v20 = vld [vmem:[#allocation11 + $0x60] sm:$0xff]  }
 0x27b   :  { %3767 = vmatpush1.bf16.msra.mxu0 %v5960_v42  ;;  %3931 = vmatpush1.bf16.msra.mxu1 %v5963_v44  ;;  %v6041_v42 = vld [vmem:[#allocation8 + $0x7e8] ss:$16 sps:$4 sm:$0xff]   ;;  %v2071_v44 = vmax.f32 %v5589_v38, 0.0 }
 0x27c   :  { %3768 = vmatprep.subr.bf16.mxu0 %v5968_v45  ;;  %3932 = vmatprep.subr.bf16.mxu1 %v5971_v46  ;;  %v6044_v45 = vld [vmem:[#allocation10] ss:$8 sps:$4 sm:$0xff]  }
 0x27d   :  { %v2336_v46 = vpack.c.bf16 %v2071_v44, %v2071_v44 }
 0x27f   :  { %3769 = vmatpush1.bf16.msra.mxu0 %v5966_v47  ;;  %3933 = vmatpush1.bf16.msra.mxu1 %v5969_v48  ;;  %v6049_v47 = vld [vmem:[#allocation10 + $0x14] ss:$8 sps:$4 sm:$0xff]   ;;  %v6052_v48 = vld [vmem:[#allocation10 + $0x24] ss:$8 sps:$4 sm:$0xff]  }
 0x280   :  { %3770 = vmatprep.subr.bf16.mxu0 %v5974_v49  ;;  %3934 = vmatprep.subr.bf16.mxu1 %v5977_v12  ;;  %v6050_v49 = vld [vmem:[#allocation10 + $0x20] ss:$8 sps:$4 sm:$0xff]   ;;  %v6055_v12 = vld [vmem:[#allocation10 + $0x34] ss:$8 sps:$4 sm:$0xff]  }
 0x283   :  { %3771 = vmatpush1.bf16.msra.mxu0 %v5972_v50  ;;  %3935 = vmatpush1.bf16.msra.mxu1 %v5975_v51  ;;  %v6053_v50 = vld [vmem:[#allocation10 + $0x30] ss:$8 sps:$4 sm:$0xff]   ;;  %v6058_v51 = vld [vmem:[#allocation10 + $0x44] ss:$8 sps:$4 sm:$0xff]  }
 0x284   :  { %3772 = vmatprep.subr.bf16.mxu0 %v5980_v52  ;;  %3936 = vmatprep.subr.bf16.mxu1 %v5983_v57  ;;  %v6056_v52 = vld [vmem:[#allocation10 + $0x40] ss:$8 sps:$4 sm:$0xff]   ;;  %v6061_v57 = vld [vmem:[#allocation10 + $0x54] ss:$8 sps:$4 sm:$0xff]  }
 0x287   :  { %3773 = vmatpush1.bf16.msra.mxu0 %v5978_v53  ;;  %3937 = vmatpush1.bf16.msra.mxu1 %v5981_v54  ;;  %v6059_v53 = vld [vmem:[#allocation10 + $0x50] ss:$8 sps:$4 sm:$0xff]   ;;  %v6064_v54 = vld [vmem:[#allocation10 + $0x64] ss:$8 sps:$4 sm:$0xff]  }
 0x288   :  { %3774 = vmatprep.subr.bf16.mxu0 %v5986_v55  ;;  %3938 = vmatprep.subr.bf16.mxu1 %v5989_v56  ;;  %v6062_v55 = vld [vmem:[#allocation10 + $0x60] ss:$8 sps:$4 sm:$0xff]   ;;  %v6067_v56 = vld [vmem:[#allocation10 + $0x74] ss:$8 sps:$4 sm:$0xff]  }
 0x28b   :  { %3775 = vmatpush1.bf16.msra.mxu0 %v5984_v24  ;;  %3939 = vmatpush1.bf16.msra.mxu1 %v5987_v58  ;;  %v6065_v24 = vld [vmem:[#allocation10 + $0x70] ss:$8 sps:$4 sm:$0xff]   ;;  %v6070_v58 = vld [vmem:[#allocation10 + $0x84] ss:$8 sps:$4 sm:$0xff]  }
 0x28c   :  { %3776 = vmatprep.subr.bf16.mxu0 %v5992_v59  ;;  %3940 = vmatprep.subr.bf16.mxu1 %v5995_v60  ;;  %v6068_v59 = vld [vmem:[#allocation10 + $0x80] ss:$8 sps:$4 sm:$0xff]   ;;  %v6073_v60 = vld [vmem:[#allocation10 + $0x94] ss:$8 sps:$4 sm:$0xff]  }
 0x28f   :  { %3777 = vmatpush1.bf16.msra.mxu0 %v5990_v61  ;;  %3941 = vmatpush1.bf16.msra.mxu1 %v5993_v36  ;;  %v6071_v61 = vld [vmem:[#allocation10 + $0x90] ss:$8 sps:$4 sm:$0xff]   ;;  %v6076_v36 = vld [vmem:[#allocation10 + $0xa4] ss:$8 sps:$4 sm:$0xff]  }
 0x290   :  { %3778 = vmatprep.subr.bf16.mxu0 %v5998_v62  ;;  %3942 = vmatprep.subr.bf16.mxu1 %v6001_v63  ;;  %v6074_v62 = vld [vmem:[#allocation10 + $0xa0] ss:$8 sps:$4 sm:$0xff]   ;;  %v6079_v63 = vld [vmem:[#allocation10 + $0xb4] ss:$8 sps:$4 sm:$0xff]  }
 0x293   :  { %3779 = vmatpush1.bf16.msra.mxu0 %v5996_v0  ;;  %3943 = vmatpush1.bf16.msra.mxu1 %v5999_v1  ;;  %v6077_v0 = vld [vmem:[#allocation10 + $0xb0] ss:$8 sps:$4 sm:$0xff]   ;;  %v6082_v1 = vld [vmem:[#allocation10 + $0xc4] ss:$8 sps:$4 sm:$0xff]  }
 0x294   :  { %3780 = vmatprep.subr.bf16.mxu0 %v6004_v2  ;;  %3944 = vmatprep.subr.bf16.mxu1 %v6007_v3  ;;  %v6080_v2 = vld [vmem:[#allocation10 + $0xc0] ss:$8 sps:$4 sm:$0xff]   ;;  %v6085_v3 = vld [vmem:[#allocation10 + $0xd4] ss:$8 sps:$4 sm:$0xff]  }
 0x297   :  { %3781 = vmatpush1.bf16.msra.mxu0 %v6002_v4  ;;  %3945 = vmatpush1.bf16.msra.mxu1 %v6005_v5  ;;  %v6083_v4 = vld [vmem:[#allocation10 + $0xd0] ss:$8 sps:$4 sm:$0xff]   ;;  %v6088_v5 = vld [vmem:[#allocation10 + $0xe4] ss:$8 sps:$4 sm:$0xff]  }
 0x298   :  { %3782 = vmatprep.subr.bf16.mxu0 %v6010_v7  ;;  %3946 = vmatprep.subr.bf16.mxu1 %v6013_v8  ;;  %v6086_v7 = vld [vmem:[#allocation10 + $0xe0] ss:$8 sps:$4 sm:$0xff]   ;;  %v6091_v8 = vld [vmem:[#allocation10 + $0xf4] ss:$8 sps:$4 sm:$0xff]  }
 0x29b   :  { %3783 = vmatpush1.bf16.msra.mxu0 %v6008_v9  ;;  %3947 = vmatpush1.bf16.msra.mxu1 %v6011_v10  ;;  %v6089_v9 = vld [vmem:[#allocation10 + $0xf0] ss:$8 sps:$4 sm:$0xff]   ;;  %v6094_v10 = vld [vmem:[#allocation10 + $0x104] ss:$8 sps:$4 sm:$0xff]  }
 0x29c   :  { %3784 = vmatprep.subr.bf16.mxu0 %v6016_v11  ;;  %3948 = vmatprep.subr.bf16.mxu1 %v6019_v13  ;;  %v6140_v11 = vld [vmem:[#allocation11 + $0x40] sm:$0xff]  }
 0x29d   :  { %v6141_v13 = vld [vmem:[#allocation11] sm:$0xff]  }
 0x29f   :  { %3785 = vmatpush1.bf16.msra.mxu0 %v6014_v14  ;;  %3949 = vmatpush1.bf16.msra.mxu1 %v6017_v15  ;;  %v6142_v14 = vld [vmem:[#allocation11 + $0x48] sm:$0xff]  }
 0x2a0   :  { %3786 = vmatprep.subr.bf16.mxu0 %v6022_v16  ;;  %3950 = vmatprep.subr.bf16.mxu1 %v6025_v17  ;;  %v6143_v15 = vld [vmem:[#allocation11 + $0x8] sm:$0xff]   ;;  %v6144_v16 = vld [vmem:[#allocation11 + $0x50] sm:$0xff]  }
 0x2a1   :  { %v6145_v17 = vld [vmem:[#allocation11 + $0x10] sm:$0xff]  }
 0x2a3   :  { %3787 = vmatpush1.bf16.msra.mxu0 %v6020_v18  ;;  %3951 = vmatpush1.bf16.msra.mxu1 %v6023_v19  ;;  %v6146_v18 = vld [vmem:[#allocation11 + $0x58] sm:$0xff]  }
 0x2a4   :  { %3788 = vmatprep.subr.bf16.mxu0 %v6028_v21  ;;  %3952 = vmatprep.subr.bf16.mxu1 %v6031_v22  ;;  %v6147_v19 = vld [vmem:[#allocation11 + $0x18] sm:$0xff]   ;;  %v6149_v21 = vld [vmem:[#allocation11 + $0x20] sm:$0xff]   ;;  %v6150_v22 = vld [vmem:[#allocation11 + $0x68] sm:$0xff]  }
 0x2a7   :  { %3789 = vmatpush1.bf16.msra.mxu0 %v6026_v31  ;;  %3953 = vmatpush1.bf16.msra.mxu1 %v6029_v32  ;;  %v6151_v31 = vld [vmem:[#allocation11 + $0x28] sm:$0xff]   ;;  %v6651_v32 = vld [vmem:[%s6715_s4] sm:$0xf] }
 0x2a8   :  { %3790 = vmatprep.subr.bf16.mxu0 %v6034_v34  ;;  %3954 = vmatprep.subr.bf16.mxu1 %v6037_v35  ;;  %v2342_v33 = vrot.slane %v6651_v32, %v6615_v27  ;;  %v2346_v34 = vrot.slane %v6651_v32, %v6620_v29  ;;  %v2354_v35 = vrot.slane %v6651_v32, %v431_v30 }
 0x2ab   :  { %3791 = vmatpush1.bf16.msra.mxu0 %v6032_v37  ;;  %3955 = vmatpush1.bf16.msra.mxu1 %v6035_v23 }
 0x2ac   :  { %3792 = vmatprep.subr.bf16.mxu0 %v6040_v39  ;;  %3956 = vmatprep.subr.bf16.mxu1 %v6043_v40 }
 0x2af   :  { %3793 = vmatpush1.bf16.msra.mxu0 %v6038_v41  ;;  %3957 = vmatpush1.bf16.msra.mxu1 %v6041_v42 }
 0x2b0   :  { %4371 = vmatprep.subr.bf16.mxu0 %v6046_v28  ;;  %5503 = vmatprep.subr.bf16.mxu1 %v6140_v11  ;;  %v6131_v11 = vld [vmem:[#allocation10 + $0x1d0] ss:$8 sps:$4 sm:$0xff]  }
 0x2b2   :  { %3795 = vmatmul.mubr.bf16.vlgmr.msra.gmra.mrb[8].mxu0 %v2336_v46  ;;  %3959 = vmatmul.mubr.bf16.vlgmr.msra.gmra.mrb[8].mxu1 %v2336_v46 }
 0x2b3   :  { %4372 = vmatpush1.bf16.msra.mxu0 %v6044_v45  ;;  %5504 = vmatpush3.bf16.msra.mxu1 %v6141_v13  ;;  %v2350_v13 = vrot.slane %v6651_v32, %v427_v43  ;;  %v6155_v43 = vld [vmem:[#allocation11 + $0x38] sm:$0xff]  }
 0x2b4   :  { %4373 = vmatprep.subr.bf16.mxu0 %v6049_v47  ;;  %5505 = vmatprep.subr.bf16.mxu1 %v6142_v14  ;;  %v6136_v14 = vld [vmem:[#allocation10 + $0x1e4] ss:$8 sps:$4 sm:$0xff]   ;;  %v4035_v32 = vld [vmem:[%s6717_s6] sm:$0x3] }
 0x2b7   :  { %4374 = vmatpush1.bf16.msra.mxu0 %v6047_v6  ;;  %5506 = vmatpush3.bf16.msra.mxu1 %v6143_v15  ;;  %v6134_v15 = vld [vmem:[#allocation10 + $0x1e0] ss:$8 sps:$4 sm:$0xff]  }
 0x2b8   :  { %4375 = vmatprep.subr.bf16.mxu0 %v6052_v48  ;;  %5507 = vmatprep.subr.bf16.mxu1 %v6144_v16 }
 0x2bb   :  { %4376 = vmatpush1.bf16.msra.mxu0 %v6050_v49  ;;  %5508 = vmatpush3.bf16.msra.mxu1 %v6145_v17  ;;  %v6139_v17 = vld [vmem:[#allocation10 + $0x1f4] ss:$8 sps:$4 sm:$0xff]  }
 0x2bc   :  { %4377 = vmatprep.subr.bf16.mxu0 %v6055_v12  ;;  %5509 = vmatprep.subr.bf16.mxu1 %v6146_v18  ;;  %v6092_v12 = vld [vmem:[#allocation10 + $0x100] ss:$8 sps:$4 sm:$0xff]   ;;  %v6137_v18 = vld [vmem:[#allocation10 + $0x1f0] ss:$8 sps:$4 sm:$0xff]  }
 0x2bf   :  { %4378 = vmatpush1.bf16.msra.mxu0 %v6053_v50  ;;  %5510 = vmatpush3.bf16.msra.mxu1 %v6147_v19 }
 0x2c0   :  { %4379 = vmatprep.subr.bf16.mxu0 %v6058_v51  ;;  %5511 = vmatprep.subr.bf16.mxu1 %v6148_v20  ;;  %v6097_v51 = vld [vmem:[#allocation10 + $0x114] ss:$8 sps:$4 sm:$0xff]  }
 0x2c3   :  { %4380 = vmatpush1.bf16.msra.mxu0 %v6056_v52  ;;  %5512 = vmatpush3.bf16.msra.mxu1 %v6149_v21  ;;  %v6095_v52 = vld [vmem:[#allocation10 + $0x110] ss:$8 sps:$4 sm:$0xff]  }
 0x2c4   :  { %4381 = vmatprep.subr.bf16.mxu0 %v6061_v57  ;;  %5513 = vmatprep.subr.bf16.mxu1 %v6150_v22  ;;  %v6100_v57 = vld [vmem:[#allocation10 + $0x124] ss:$8 sps:$4 sm:$0xff]   ;;  %v6152_v21 = vld [vmem:[#allocation11 + $0x70] sm:$0xff]  }
 0x2c5   :  { %v6153_v22 = vld [vmem:[#allocation11 + $0x30] sm:$0xff]  }
 0x2c7   :  { %4382 = vmatpush1.bf16.msra.mxu0 %v6059_v53  ;;  %5514 = vmatpush3.bf16.msra.mxu1 %v6151_v31  ;;  %v6098_v53 = vld [vmem:[#allocation10 + $0x120] ss:$8 sps:$4 sm:$0xff]   ;;  %v6402_v31 = vmov 0.0  }
 0x2c8   :  { %4383 = vmatprep.subr.bf16.mxu0 %v6064_v54  ;;  %v6103_v54 = vld [vmem:[#allocation10 + $0x134] ss:$8 sps:$4 sm:$0xff]   ;;  %5515 = vmatprep.subr.bf16.mxu1 %v6152_v21 }
 0x2cb   :  { %4384 = vmatpush1.bf16.msra.mxu0 %v6062_v55  ;;  %v6101_v55 = vld [vmem:[#allocation10 + $0x130] ss:$8 sps:$4 sm:$0xff]   ;;  %5516 = vmatpush3.bf16.msra.mxu1 %v6153_v22 }
 0x2cc   :  { %4385 = vmatprep.subr.bf16.mxu0 %v6067_v56  ;;  %v6106_v56 = vld [vmem:[#allocation10 + $0x144] ss:$8 sps:$4 sm:$0xff]   ;;  %5517 = vmatprep.subr.bf16.mxu1 %v6154_v26 }
 0x2cf   :  { %4386 = vmatpush1.bf16.msra.mxu0 %v6065_v24  ;;  %v6104_v24 = vld [vmem:[#allocation10 + $0x140] ss:$8 sps:$4 sm:$0xff]   ;;  %5518 = vmatpush3.bf16.msra.mxu1 %v6155_v43 }
 0x2d0   :  { %4387 = vmatprep.subr.bf16.mxu0 %v6070_v58  ;;  %v6109_v58 = vld [vmem:[#allocation10 + $0x154] ss:$8 sps:$4 sm:$0xff]   ;;  %5543 = vmatprep.subr.bf16.mxu1 %v6402_v31 }
 0x2d3   :  { %4388 = vmatpush1.bf16.msra.mxu0 %v6068_v59  ;;  %v6107_v59 = vld [vmem:[#allocation10 + $0x150] ss:$8 sps:$4 sm:$0xff]  }
 0x2d4   :  { %4389 = vmatprep.subr.bf16.mxu0 %v6073_v60  ;;  %v6112_v60 = vld [vmem:[#allocation10 + $0x164] ss:$8 sps:$4 sm:$0xff]  }
 0x2d7   :  { %4390 = vmatpush1.bf16.msra.mxu0 %v6071_v61  ;;  %v6110_v61 = vld [vmem:[#allocation10 + $0x160] ss:$8 sps:$4 sm:$0xff]  }
 0x2d8   :  { %4391 = vmatprep.subr.bf16.mxu0 %v6076_v36  ;;  %v6115_v36 = vld [vmem:[#allocation10 + $0x174] ss:$8 sps:$4 sm:$0xff]  }
 0x2db   :  { %4392 = vmatpush1.bf16.msra.mxu0 %v6074_v62  ;;  %v6113_v62 = vld [vmem:[#allocation10 + $0x170] ss:$8 sps:$4 sm:$0xff]  }
 0x2dc   :  { %4393 = vmatprep.subr.bf16.mxu0 %v6079_v63  ;;  %v6118_v63 = vld [vmem:[#allocation10 + $0x184] ss:$8 sps:$4 sm:$0xff]  }
 0x2df   :  { %4394 = vmatpush1.bf16.msra.mxu0 %v6077_v0  ;;  %v6116_v0 = vld [vmem:[#allocation10 + $0x180] ss:$8 sps:$4 sm:$0xff]  }
 0x2e0   :  { %4395 = vmatprep.subr.bf16.mxu0 %v6082_v1  ;;  %v6121_v1 = vld [vmem:[#allocation10 + $0x194] ss:$8 sps:$4 sm:$0xff]  }
 0x2e3   :  { %4396 = vmatpush1.bf16.msra.mxu0 %v6080_v2  ;;  %v6119_v2 = vld [vmem:[#allocation10 + $0x190] ss:$8 sps:$4 sm:$0xff]  }
 0x2e4   :  { %4397 = vmatprep.subr.bf16.mxu0 %v6085_v3  ;;  %v6124_v3 = vld [vmem:[#allocation10 + $0x1a4] ss:$8 sps:$4 sm:$0xff]  }
 0x2e7   :  { %4398 = vmatpush1.bf16.msra.mxu0 %v6083_v4  ;;  %v6122_v4 = vld [vmem:[#allocation10 + $0x1a0] ss:$8 sps:$4 sm:$0xff]  }
 0x2e8   :  { %4399 = vmatprep.subr.bf16.mxu0 %v6088_v5  ;;  %v6127_v5 = vld [vmem:[#allocation10 + $0x1b4] ss:$8 sps:$4 sm:$0xff]  }
 0x2eb   :  { %4400 = vmatpush1.bf16.msra.mxu0 %v6086_v7  ;;  %v6125_v7 = vld [vmem:[#allocation10 + $0x1b0] ss:$8 sps:$4 sm:$0xff]  }
 0x2ec   :  { %4401 = vmatprep.subr.bf16.mxu0 %v6091_v8  ;;  %v6130_v8 = vld [vmem:[#allocation10 + $0x1c4] ss:$8 sps:$4 sm:$0xff]  }
 0x2ef   :  { %4402 = vmatpush1.bf16.msra.mxu0 %v6089_v9  ;;  %v6128_v9 = vld [vmem:[#allocation10 + $0x1c0] ss:$8 sps:$4 sm:$0xff]  }
 0x2f0   :  { %4412 = vmatprep.subr.bf16.mxu0 %v6094_v10  ;;  %v6133_v10 = vld [vmem:[#allocation10 + $0x1d4] ss:$8 sps:$4 sm:$0xff]  }
 0x385   :  { %v3796_v37 = vpop.f32.mrb[8].mxu0  ;;  %v6660_v23 = vpop.f32.mrb[8].mxu1 }
 0x386   :  { %v5591_v38 = vadd.f32 %v3796_v37, %v2342_v33  ;;  %v3798_v39 = vpop.f32.mrb[9].mxu0  ;;  %v3962_v40 = vpop.f32.mrb[9].mxu1  ;;  %v5593_v16 = vadd.f32 %v6660_v23, %v2350_v13  ;;  %v4044_v33 = vrot.slane %v4035_v32, %v6615_v27  ;;  %v6158_v27 = vld [vmem:[#allocation13 + $0x10] sm:$0xff]  }
 0x387   :  { %v5592_v41 = vadd.f32 %v3798_v39, %v2346_v34  ;;  %v5594_v42 = vadd.f32 %v3962_v40, %v2354_v35  ;;  %v3800_v44 = vpop.f32.mrb[10].mxu0  ;;  %v3964_v28 = vpop.f32.mrb[10].mxu1  ;;  %v4048_v34 = vrot.slane %v4035_v32, %v6620_v29  ;;  %v6159_v29 = vld [vmem:[#allocation13 + $0x18] sm:$0xff]  }
 0x388   :  { %v3967_v45 = vmax.f32 %v5591_v38, 0.0  ;;  %v3801_v46 = vpop.f32.mrb[11].mxu0  ;;  %v3965_v47 = vpop.f32.mrb[11].mxu1  ;;  %v3969_v19 = vmax.f32 %v5593_v16, 0.0  ;;  %v6156_v28 = vld [vmem:[#allocation13] sm:$0xff]  }
 0x389   :  { %v3968_v6 = vmax.f32 %v5592_v41, 0.0  ;;  %v3970_v48 = vmax.f32 %v5594_v42, 0.0  ;;  %v6157_v46 = vld [vmem:[#allocation13 + $0x8] sm:$0xff]   ;;  %v6160_v47 = vld [vmem:[#allocation13 + $0x20] sm:$0xff]  }
 0x38a   :  { %v4036_v50 = vpack.c.bf16 %v3967_v45, %v3967_v45  ;;  %v4038_v20 = vpack.c.bf16 %v3969_v19, %v3969_v19 }
 0x38b   :  { %v4037_v49 = vpack.c.bf16 %v3968_v6, %v3968_v6  ;;  %v4039_v30 = vpack.c.bf16 %v3970_v48, %v3970_v48  ;;  %v6161_v6 = vld [vmem:[#allocation13 + $0x28] sm:$0xff]   ;;  %v6162_v48 = vld [vmem:[#allocation13 + $0x30] sm:$0xff]  }
 0x38d   :  { %4403 = vmatprep.mubr.bf16.mxu0 %v4037_v49  ;;  %v6163_v49 = vld [vmem:[#allocation13 + $0x38] sm:$0xff]  }
 0x38e   :  { %4404 = vmatmul.mubr.bf16.vlgmr.msra.gmra.mrb[12].mxu0 %v4036_v50  ;;  %v5468_v50 = vld [vmem:[%s6719_s8] ss:$0 sm:$0xff] }
 0x38f   :  { %4413 = vmatpush1.bf16.msra.mxu0 %v6092_v12  ;;  %4444 = vmatprep.mubr.bf16.mxu0 %v4039_v30 }
 0x390   :  { %4414 = vmatprep.subr.bf16.mxu0 %v6097_v51 }
 0x393   :  { %4415 = vmatpush1.bf16.msra.mxu0 %v6095_v52 }
 0x394   :  { %4416 = vmatprep.subr.bf16.mxu0 %v6100_v57 }
 0x397   :  { %4417 = vmatpush1.bf16.msra.mxu0 %v6098_v53 }
 0x398   :  { %4418 = vmatprep.subr.bf16.mxu0 %v6103_v54 }
 0x39b   :  { %4419 = vmatpush1.bf16.msra.mxu0 %v6101_v55  ;;  %v6164_v55 = vld [vmem:[#allocation14] sm:$0xff]  }
 0x39c   :  { %4420 = vmatprep.subr.bf16.mxu0 %v6106_v56 }
 0x39f   :  { %4421 = vmatpush1.bf16.msra.mxu0 %v6104_v24  ;;  %v6165_v24 = vld [vmem:[#allocation14 + $0x8] sm:$0xff]  }
 0x3a0   :  { %4422 = vmatprep.subr.bf16.mxu0 %v6109_v58  ;;  %v6166_v58 = vld [vmem:[#allocation14 + $0x10] sm:$0xff]  }
 0x3a3   :  { %4423 = vmatpush1.bf16.msra.mxu0 %v6107_v59  ;;  %v6167_v59 = vld [vmem:[#allocation14 + $0x18] sm:$0xff]  }
 0x3a4   :  { %4424 = vmatprep.subr.bf16.mxu0 %v6112_v60  ;;  %v6168_v60 = vld [vmem:[#allocation14 + $0x20] sm:$0xff]  }
 0x3a7   :  { %4425 = vmatpush1.bf16.msra.mxu0 %v6110_v61  ;;  %v6169_v61 = vld [vmem:[#allocation14 + $0x28] sm:$0xff]  }
 0x3a8   :  { %4426 = vmatprep.subr.bf16.mxu0 %v6115_v36  ;;  %v6170_v36 = vld [vmem:[#allocation14 + $0x30] sm:$0xff]  }
 0x3ab   :  { %4427 = vmatpush1.bf16.msra.mxu0 %v6113_v62  ;;  %v6171_v62 = vld [vmem:[#allocation14 + $0x38] sm:$0xff]  }
 0x3ac   :  { %4428 = vmatprep.subr.bf16.mxu0 %v6118_v63  ;;  %v5485_v63 = vld [vmem:[%s6721_s10] ss:$0 sm:$0xff]  ;;  %s6404_s10 = smov [#allocation16]  }
 0x3ad   :  { %s4879_s20 = sshll.u32 %s6404_s10, 4  ;;  %s4880_s20 = int_to_ptr.vmem [resolvable:$true] %s4879_s20 }
 0x3ae   :  { %p6357_p9 = scmp.lt.s32.totalorder %s4880_s20, %s4880_s20 }
 0x3af   :  { %4429 = vmatpush1.bf16.msra.mxu0 %v6116_v0 }
 0x3b0   :  { %4430 = vmatprep.subr.bf16.mxu0 %v6121_v1 }
 0x3b3   :  { %4431 = vmatpush1.bf16.msra.mxu0 %v6119_v2 }
 0x3b4   :  { %4432 = vmatprep.subr.bf16.mxu0 %v6124_v3 }
 0x3b7   :  { %4433 = vmatpush1.bf16.msra.mxu0 %v6122_v4 }
 0x3b8   :  { %4434 = vmatprep.subr.bf16.mxu0 %v6127_v5 }
 0x3bb   :  { %4435 = vmatpush1.bf16.msra.mxu0 %v6125_v7 }
 0x3bc   :  { %4436 = vmatprep.subr.bf16.mxu0 %v6130_v8  ;;  %v4859_v8 = vand.u32 127, %v417_v25 }
 0x3be   :  { %vm4860_vm1 = vcmp.lt.s32.totalorder %v4859_v8, 102 }
 0x3bf   :  { %4437 = vmatpush1.bf16.msra.mxu0 %v6128_v9  ;;  %v5494_v9 = vld [vmem:[%s6723_s12] ss:$0 sm:$0xff]  ;;  %s6352_s12 = scalar_lea.vmem %s4880_s20, 128 }
 0x3c0   :  { %4438 = vmatprep.subr.bf16.mxu0 %v6133_v10  ;;  %p6353_p8 = scmp.ne.s32.totalorder %s4880_s20, %s6352_s12  ;;  %p6358_p10 = scmp.lt.s32.totalorder %s6352_s12, %s6352_s12 }
 0x3c2   :  { %p6359_p11 = por %p6358_p10, %p6357_p9 }
 0x3c3   :  { %4439 = vmatpush1.bf16.msra.mxu0 %v6131_v11 }
 0x3c4   :  { %4440 = vmatprep.subr.bf16.mxu0 %v6136_v14  ;;  %p6360_p12 = pnand %p6359_p11, %p6353_p8 }
 0x3c7   :  { %4441 = vmatpush1.bf16.msra.mxu0 %v6134_v15 }
 0x3c8   :  { %4442 = vmatprep.subr.bf16.mxu0 %v6139_v17 }
 0x3cb   :  { %4443 = vmatpush1.bf16.msra.mxu0 %v6137_v18 }
 0x3ce   :  { %4445 = vmatmul.mubr.bf16.vlgmr.msra.gmra.mrb[12].mxu0 %v4038_v20 }
 0x4a1   :  { %v4446_v35 = vpop.f32.mrb[12].mxu0 }
 0x4a2   :  { %v5595_v37 = vadd.f32 %v4446_v35, %v4044_v33  ;;  %v4448_v23 = vpop.f32.mrb[13].mxu0 }
 0x4a3   :  { %v5596_v38 = vadd.f32 %v4448_v23, %v4048_v34  ;;  %v4450_v39 = vpop.f32.mrb[14].mxu0 }
 0x4a4   :  { %v4453_v40 = vmax.f32 %v5595_v37, 0.0  ;;  %v4451_v41 = vpop.f32.mrb[15].mxu0 }
 0x4a5   :  { %v4454_v42 = vmax.f32 %v5596_v38, 0.0 }
 0x4a6   :  { %v4488_v45 = vpack.c.bf16 %v4453_v40, %v4453_v40 }
 0x4a7   :  { %v4489_v44 = vpack.c.bf16 %v4454_v42, %v4454_v42 }
 0x4a9   :  { %4624 = vmatprep.mubr.bf16.mxu1 %v4489_v44 }
 0x4aa   :  { %4625 = vmatmul.mubr.bf16.vlgmr.msra.gmra.mrb[12].mxu1 %v4488_v45 }
 0x4ab   :  { %5544 = vmatpush3.bf16.msra.mxu1 %v6156_v28  ;;  %5559 = vmatprep.mubr.msk.bf16.mxu1 %vm6403_vm0, %v6402_v31 }
 0x4ac   :  { %5545 = vmatprep.subr.bf16.mxu1 %v6402_v31 }
 0x4af   :  { %5546 = vmatpush3.bf16.msra.mxu1 %v6157_v46 }
 0x4b0   :  { %5547 = vmatprep.subr.bf16.mxu1 %v6402_v31 }
 0x4b3   :  { %5548 = vmatpush3.bf16.msra.mxu1 %v6158_v27 }
 0x4b4   :  { %5549 = vmatprep.subr.bf16.mxu1 %v6402_v31 }
 0x4b7   :  { %5550 = vmatpush3.bf16.msra.mxu1 %v6159_v29 }
 0x4b8   :  { %5551 = vmatprep.subr.bf16.mxu1 %v6402_v31 }
 0x4bb   :  { %5552 = vmatpush3.bf16.msra.mxu1 %v6160_v47 }
 0x4bc   :  { %5553 = vmatprep.subr.bf16.mxu1 %v6402_v31 }
 0x4bf   :  { %5554 = vmatpush3.bf16.msra.mxu1 %v6161_v6 }
 0x4c0   :  { %5555 = vmatprep.subr.bf16.mxu1 %v6402_v31 }
 0x4c3   :  { %5556 = vmatpush3.bf16.msra.mxu1 %v6162_v48 }
 0x4c4   :  { %5557 = vmatprep.subr.bf16.mxu1 %v6402_v31 }
 0x4c7   :  { %5558 = vmatpush3.bf16.msra.mxu1 %v6163_v49 }
 0x4c8   :  { %5563 = vmatprep.subr.bf16.mxu1 %v6402_v31 }
 0x57d   :  { %v5519_v12 = vpop.f32.mrb[12].mxu1 }
 0x57e   :  { %v5520_v51 = vpop.f32.mrb[13].mxu1 }
 0x57f   :  { %v5521_v30 = vadd.f32 %v5520_v51, %v5519_v12  ;;  %v5522_v52 = vpop.f32.mrb[14].mxu1 }
 0x580   :  { %v5523_v57 = vpop.f32.mrb[15].mxu1 }
 0x581   :  { %v4627_v53 = vadd.f32 %v5521_v30, %v5468_v50 }
 0x583   :  { %v4632_v54 = vmax.f32 %v4627_v53, 0.0 }
 0x585   :  { %v4650_v56 = vpack.c.bf16 %v4632_v54, %v4632_v54 }
 0x587   :  { %5560 = vmatmul.mubr.bf16.vlgmr.msra.gmra.mrb[16].mxu1 %v4650_v56 }
 0x588   :  { %5564 = vmatpush3.bf16.msra.mxu1 %v6164_v55  ;;  %5579 = vmatprep.mubr.msk.bf16.mxu1 %vm6403_vm0, %v6402_v31 }
 0x589   :  { %5565 = vmatprep.subr.bf16.mxu1 %v6402_v31 }
 0x58c   :  { %5566 = vmatpush3.bf16.msra.mxu1 %v6165_v24 }
 0x58d   :  { %5567 = vmatprep.subr.bf16.mxu1 %v6402_v31 }
 0x590   :  { %5568 = vmatpush3.bf16.msra.mxu1 %v6166_v58 }
 0x591   :  { %5569 = vmatprep.subr.bf16.mxu1 %v6402_v31 }
 0x594   :  { %5570 = vmatpush3.bf16.msra.mxu1 %v6167_v59 }
 0x595   :  { %5571 = vmatprep.subr.bf16.mxu1 %v6402_v31 }
 0x598   :  { %5572 = vmatpush3.bf16.msra.mxu1 %v6168_v60 }
 0x599   :  { %5573 = vmatprep.subr.bf16.mxu1 %v6402_v31 }
 0x59c   :  { %5574 = vmatpush3.bf16.msra.mxu1 %v6169_v61 }
 0x59d   :  { %5575 = vmatprep.subr.bf16.mxu1 %v6402_v31 }
 0x5a0   :  { %5576 = vmatpush3.bf16.msra.mxu1 %v6170_v36 }
 0x5a1   :  { %5577 = vmatprep.subr.bf16.mxu1 %v6402_v31 }
 0x5a4   :  { %5578 = vmatpush3.bf16.msra.mxu1 %v6171_v62 }
 0x65a   :  { %v4739_v0 = vpop.f32.mrb[16].mxu1 }
 0x65b   :  { %v4740_v1 = vadd.f32 %v5485_v63, %v4739_v0  ;;  %v5561_v2 = vpop.f32.mrb[17].mxu1 }
 0x65c   :  { %v4742_v3 = vpop.f32.mrb[18].mxu1 }
 0x65d   :  { %v4745_v4 = vmax.f32 %v4740_v1, 0.0  ;;  %v5562_v5 = vpop.f32.mrb[19].mxu1 }
 0x65f   :  { %v4763_v7 = vpack.c.bf16 %v4745_v4, %v4745_v4 }
 0x661   :  { %5580 = vmatmul.mubr.bf16.vlgmr.msra.gmra.mrb[20].mxu1 %v4763_v7 }
 0x734   :  { %v4852_v10 = vpop.f32.mrb[20].mxu1 }
 0x735   :  { %v4853_v11 = vadd.f32 %v5494_v9, %v4852_v10  ;;  %v5581_v13 = vpop.f32.mrb[21].mxu1 }
 0x736   :  { %v4855_v14 = vpop.f32.mrb[22].mxu1 }
 0x737   :  { %v5582_v15 = vpop.f32.mrb[23].mxu1  ;;  %v4861_v16 = vsel %vm4860_vm1, %v4853_v11, -inf }
 0x738   :  { %4862 = vmax.xlane.f32.xlu0 %v4861_v16 }
 0x7c5   :  { %v4863_v17 = vpop.xlane.xlu0 %4862 }
 0x7c6   :  { %v4864_v18 = vsub.f32 %v4861_v16, %v4863_v17 }
 0x7c8   :  { %v4865_v19 = vmul.f32 1.442695, %v4864_v18 }
 0x7ca   :  { %6172 = vpow2.f32 %v4865_v19 }
 0x7d4   :  { %v6173_v20 = vpop.eup %6172 }
 0x7d5   :  { %4867 = vadd.xlane.f32.xlu0 %v6173_v20 }
 0x862   :  { %v4868_v21 = vpop.xlane.xlu0 %4867 }
 0x863   :  { %6174 = vlog2.f32 %v4868_v21 }
 0x86d   :  { %v6175_v25 = vpop.eup %6174 }
 0x86e   :  { %v4870_v22 = vmul.f32 0.6931472, %v6175_v25 }
 0x870   :  { %v4871_v26 = vsub.f32 %v4864_v18, %v4870_v22 }
 0x872   :  { %4872 = vst [vmem:[#allocation16] sm:$0xff] %v4871_v26 }
 0x873   :  { %6363 = shalt.err (!%p6360_p12)
}
 0x874   :  { %s6364_s25 = scalar_lea.hbm %s6724_s13, 128 }
 0x875   :  { %p6365_p13 = scmp.ne.s32.totalorder %s6724_s13, %s6364_s25  ;;  %p6368_p0 = scmp.lt.u32.totalorder %s6364_s25, %s6724_s13 }
 0x877   :  { %p6370_p1 = pnand %p6368_p0, %p6365_p13 }
 0x879   :  { %6373 = shalt.err (!%p6370_p1)
}
 0x87a   :  { %4882 = dma.vmem_to_hbm [thread:$0]  %s4880_s20, 128, %s6724_s13, [#allocation4]  }
 0x87b   :  { %6384 = dma.done.wait [#allocation4], 128  }
 0x87c   :  { %6385 = vsyncadd [#allocation4], 4294967168 }
 0x87d   :  { %4886 = vsyncpa [#allocation3], 1 }
 0x87e   :  { %4887 = vsyncpa [#allocation6], 1 }
 0x87f   :  { %4888 = vsyncpa [#allocation9], 1 }
 0x880   :  { %4889 = vsyncpa [#allocation12], 1 }
 0x881   :  { %4890 = vsyncpa [#allocation15], 1 }
 0x882   :  { %4891 = vsyncpa [#allocation4], 1 }

</bundles_post_ra>
